<compile_context>
chip_gen: v6e
topology: v6e:2x2x1
jax: 0.10.0
libtpu: 0.0.40
codegen_flags: <defaults>
</compile_context>

<pallas_src>
import jax
import jax.numpy as jnp
from jax import lax
from jax.experimental import pallas as pl
from jax.experimental.pallas import tpu as pltpu


def node_processor_kernel(snd_ref, recv_ref, x_ref, w1_ref, b1_ref, w2_ref, b2_ref,
                          gamma_ref, beta_ref, out_ref, agg_ref):
    e = pl.program_id(0)                  # edge block (the only, reduction, grid axis)

    N, F = x_ref.shape
    Eb = snd_ref.shape[0]

    @pl.when(e == 0)
    def _():
        agg_ref[...] = jnp.zeros_like(agg_ref)

    senders = snd_ref[...]                # [Eb, 1] int32 (column -> cheap lane splat)
    receivers = recv_ref[...]             # [1, Eb] int32 (row   -> cheap sublane splat)

    # --- gather: messages[e, :] = x[senders[e], :] -------------------------------------
    # one-hot in [Eb, N]: edge on sublanes, node on lanes -> canonical MXU contraction.
    node_lane = lax.broadcasted_iota(jnp.int32, (Eb, N), 1)
    s_onehot = (node_lane == senders).astype(jnp.bfloat16)          # exact 0/1
    messages = jnp.dot(s_onehot, x_ref[...],
                       preferred_element_type=jnp.float32)          # [Eb, F] f32 acc

    # --- scatter-sum by receiver into the full [N, F] accumulator ----------------------
    node_sub = lax.broadcasted_iota(jnp.int32, (N, Eb), 0)
    r_onehot = (node_sub == receivers).astype(jnp.bfloat16)         # exact 0/1
    agg_ref[...] += jnp.dot(r_onehot, messages.astype(jnp.bfloat16),
                            preferred_element_type=jnp.float32)     # [N, F] f32 acc

    # --- MLP + LayerNorm epilogue on the last edge block --------------------------------
    @pl.when(e == pl.num_programs(0) - 1)
    def _():
        x_all = x_ref[...]                                          # [N, F]  bf16
        agg_bf = agg_ref[...].astype(jnp.bfloat16)                  # [N, F]  bf16
        # concat([x, agg], -1) @ W1 as a single K = 2F contraction (full MXU K-depth).
        cat = jnp.concatenate([x_all, agg_bf], axis=-1)             # [N, 2F] bf16
        h = jnp.dot(cat, w1_ref[...],
                    preferred_element_type=jnp.float32) + b1_ref[...]   # [N, H] f32
        h = jnp.maximum(h, 0.0)                                     # ReLU

        y = jnp.dot(h.astype(jnp.bfloat16), w2_ref[...],
                    preferred_element_type=jnp.float32) + b2_ref[...]   # [N, F] f32

        # LayerNorm over features (eps = 1e-5, biased variance, like torch.nn.LayerNorm)
        mean = jnp.mean(y, axis=-1, keepdims=True)
        var = jnp.mean((y - mean) ** 2, axis=-1, keepdims=True)
        y_hat = (y - mean) * lax.rsqrt(var + 1e-5)                  # rsqrt -> EUP
        out_ref[...] = y_hat * gamma_ref[...] + beta_ref[...]


def node_processor(x, edge_index, w1, b1, w2, b2, gamma, beta, *, eb=None):
    """x: [N, F] f32, edge_index: [2, E] int32, w1: [2F, H], w2: [H, F].

    Padded edges (if any) must use indices outside [0, N).
    """
    N, F = x.shape
    E = edge_index.shape[1]
    H = w1.shape[1]
    if eb is None:
        eb = E                       # single edge block -> single grid step at small E
    assert E % eb == 0 and (eb == E or eb % 128 == 0)

    # bf16 matmul operands (0/1 one-hots exact; x/weight rounding ~1e-3 rel, f32 accumulation).
    x_bf = x.astype(jnp.bfloat16)
    w1_bf = w1.astype(jnp.bfloat16)          # [2F, H], applied to concat([x, agg])
    w2_bf = w2.astype(jnp.bfloat16)

    # Edge indices in layouts that avoid in-kernel transposes.
    senders = edge_index[0].astype(jnp.int32).reshape(E, 1)      # [E, 1]
    receivers = edge_index[1].astype(jnp.int32).reshape(1, E)    # [1, E]

    const = lambda e: (0, 0)   # x / weights / biases stay VMEM-resident across the edge grid
    grid_spec = pltpu.PrefetchScalarGridSpec(
        num_scalar_prefetch=0,
        grid=(E // eb,),
        in_specs=[
            pl.BlockSpec((eb, 1), lambda e: (e, 0)),   # senders   (streamed over edges)
            pl.BlockSpec((1, eb), lambda e: (0, e)),   # receivers (streamed over edges)
            pl.BlockSpec((N, F), const),               # x (bf16, full, resident)
            pl.BlockSpec((2 * F, H), const),           # w1
            pl.BlockSpec((1, H), const),               # b1
            pl.BlockSpec((H, F), const),               # w2
            pl.BlockSpec((1, F), const),               # b2
            pl.BlockSpec((1, F), const),               # gamma
            pl.BlockSpec((1, F), const),               # beta
        ],
        out_specs=pl.BlockSpec((N, F), const),
        scratch_shapes=[pltpu.VMEM((N, F), jnp.float32)],        # full-graph agg accumulator
    )

    return pl.pallas_call(
        node_processor_kernel,
        out_shape=jax.ShapeDtypeStruct((N, F), jnp.float32),
        grid_spec=grid_spec,
        compiler_params=pltpu.CompilerParams(
            dimension_semantics=("arbitrary",),        # edge axis is a reduction
            vmem_limit_bytes=32 * 1024 * 1024,         # actual footprint ~2-3 MiB; v7x-safe
        ),
    )(senders, receivers, x_bf, w1_bf, b1, w2_bf, b2, gamma, beta)


def reference(x, edge_index, w1, b1, w2, b2, gamma, beta):
    """Pure-JAX f32 reference reproducing the PyTorch forward."""
    senders, receivers = edge_index[0], edge_index[1]
    msg = x[senders]
    agg = jax.ops.segment_sum(msg, receivers, num_segments=x.shape[0])
    h = jnp.concatenate([x, agg], axis=-1)
    h = jnp.maximum(h @ w1 + b1, 0.0)
    y = h @ w2 + b2
    mean = jnp.mean(y, axis=-1, keepdims=True)
    var = jnp.mean((y - mean) ** 2, axis=-1, keepdims=True)
    return (y - mean) * lax.rsqrt(var + 1e-5) * gamma + beta


if __name__ == "__main__":
    # nodes, node-feature dim, edges, MLP hidden (F and H lane-dense at 128)
    N, F, E, H = 512, 128, 512, 128

    key = jax.random.PRNGKey(0)
    k_x, k_e1, k_e2, k_w1, k_b1, k_w2, k_b2 = jax.random.split(key, 7)

    x = jax.random.normal(k_x, (N, F), dtype=jnp.float32)
    senders = jax.random.randint(k_e1, (E,), 0, N, dtype=jnp.int32)
    receivers = jax.random.randint(k_e2, (E,), 0, N, dtype=jnp.int32)
    edge_index = jnp.stack([senders, receivers], axis=0)      # [2, E] int32

    # Deterministic MLP parameters: Linear(2F->H) -> ReLU -> Linear(H->F) -> LayerNorm(F)
    w1 = jax.random.normal(k_w1, (2 * F, H), dtype=jnp.float32) * 0.1
    b1 = jax.random.normal(k_b1, (1, H), dtype=jnp.float32) * 0.01
    w2 = jax.random.normal(k_w2, (H, F), dtype=jnp.float32) * 0.1
    b2 = jax.random.normal(k_b2, (1, F), dtype=jnp.float32) * 0.01
    gamma = jnp.ones((1, F), dtype=jnp.float32)
    beta = jnp.zeros((1, F), dtype=jnp.float32)

    out = node_processor(x, edge_index, w1, b1, w2, b2, gamma, beta)
    out = jax.block_until_ready(out)

    ref = reference(x, edge_index, w1, b1, w2, b2, gamma, beta)
    assert out.shape == (N, F)
    # Tolerance accounts for bf16 matmul operands (f32 accumulation); structure is exact.
    assert jnp.allclose(out, ref, atol=2e-2, rtol=2e-2), "mismatch vs reference"

    print("KERNEL_OK")
</pallas_src>

<mosaic_0001>
module attributes {stable_mosaic.version = 11 : i64} {
  func.func @node_processor_kernel(%arg0: i32, %arg1: memref<512x1xi32, #tpu.memory_space<vmem>>, %arg2: memref<1x512xi32, #tpu.memory_space<vmem>>, %arg3: memref<512x128xbf16, #tpu.memory_space<vmem>>, %arg4: memref<256x128xbf16, #tpu.memory_space<vmem>>, %arg5: memref<1x128xf32, #tpu.memory_space<vmem>>, %arg6: memref<128x128xbf16, #tpu.memory_space<vmem>>, %arg7: memref<1x128xf32, #tpu.memory_space<vmem>>, %arg8: memref<1x128xf32, #tpu.memory_space<vmem>>, %arg9: memref<1x128xf32, #tpu.memory_space<vmem>>, %arg10: memref<512x128xf32, #tpu.memory_space<vmem>>, %arg11: memref<512x128xf32, #tpu.memory_space<vmem>>) attributes {dimension_semantics = [#tpu.dimension_semantics<arbitrary>], iteration_bounds = array<i64: 1>, scalar_prefetch = 0 : i64, scratch_operands = 1 : i64, tpu.core_type = #tpu.core_type<tc>, window_params = [{transform_indices = @transform_0, window_bounds = array<i64: 512, 1>}, {transform_indices = @transform_1, window_bounds = array<i64: 1, 512>}, {pipeline_mode = #tpu.pipeline_mode<synchronous>, transform_indices = @transform_2, window_bounds = array<i64: 512, 128>}, {pipeline_mode = #tpu.pipeline_mode<synchronous>, transform_indices = @transform_3, window_bounds = array<i64: 256, 128>}, {pipeline_mode = #tpu.pipeline_mode<synchronous>, transform_indices = @transform_4, window_bounds = array<i64: 1, 128>}, {pipeline_mode = #tpu.pipeline_mode<synchronous>, transform_indices = @transform_5, window_bounds = array<i64: 128, 128>}, {pipeline_mode = #tpu.pipeline_mode<synchronous>, transform_indices = @transform_6, window_bounds = array<i64: 1, 128>}, {pipeline_mode = #tpu.pipeline_mode<synchronous>, transform_indices = @transform_7, window_bounds = array<i64: 1, 128>}, {pipeline_mode = #tpu.pipeline_mode<synchronous>, transform_indices = @transform_8, window_bounds = array<i64: 1, 128>}, {pipeline_mode = #tpu.pipeline_mode<synchronous>, transform_indices = @transform_9, window_bounds = array<i64: 512, 128>}]} {
    %c0_i32 = arith.constant 0 : i32
    %0 = arith.cmpi eq, %arg0, %c0_i32 : i32
    %1 = arith.extui %0 : i1 to i32
    %c0_i32_0 = arith.constant 0 : i32
    %2 = arith.cmpi ne, %1, %c0_i32_0 : i32
    scf.if %2 {
      %cst_13 = arith.constant 0.000000e+00 : f32
      %27 = vector.broadcast %cst_13 : f32 to vector<512x128xf32>
      %c0_14 = arith.constant 0 : index
      %c0_15 = arith.constant 0 : index
      %28 = vector.load %arg11[%c0_14, %c0_15] : memref<512x128xf32, #tpu.memory_space<vmem>>, vector<512x128xf32>
      tpu.vector_store %arg11[%c0_14, %c0_15], %27 {strides = array<i32>} : memref<512x128xf32, #tpu.memory_space<vmem>>, vector<512x128xf32>,
    } else {
    }
    %c0 = arith.constant 0 : index
    %c0_1 = arith.constant 0 : index
    %3 = vector.load %arg1[%c0, %c0_1] : memref<512x1xi32, #tpu.memory_space<vmem>>, vector<512x1xi32>
    %c0_2 = arith.constant 0 : index
    %c0_3 = arith.constant 0 : index
    %4 = vector.load %arg2[%c0_2, %c0_3] : memref<1x512xi32, #tpu.memory_space<vmem>>, vector<1x512xi32>
    %5 = tpu.iota {dimensions = array<i32: 1>} : vector<512x512xi32>
    %6 = vector.broadcast %3 : vector<512x1xi32> to vector<512x512xi32>
    %7 = arith.cmpi eq, %5, %6 : vector<512x512xi32>
    %8 = arith.extui %7 : vector<512x512xi1> to vector<512x512xi32>
    %9 = arith.sitofp %8 : vector<512x512xi32> to vector<512x512xf32>
    %10 = arith.truncf %9 : vector<512x512xf32> to vector<512x512xbf16>
    %c0_4 = arith.constant 0 : index
    %c0_5 = arith.constant 0 : index
    %11 = vector.load %arg3[%c0_4, %c0_5] : memref<512x128xbf16, #tpu.memory_space<vmem>>, vector<512x128xbf16>
    %cst = arith.constant dense<0.000000e+00> : vector<512x128xf32>
    %12 = tpu.matmul %10, %11, %cst {dimension_numbers = #tpu.dot_dimension_numbers<[1], [0], [0], [1], [0, 0, 1, 1], [], []>} : vector<512x512xbf16>, vector<512x128xbf16>, vector<512x128xf32> -> vector<512x128xf32>
    %13 = tpu.iota {dimensions = array<i32: 0>} : vector<512x512xi32>
    %14 = vector.broadcast %4 : vector<1x512xi32> to vector<512x512xi32>
    %15 = arith.cmpi eq, %13, %14 : vector<512x512xi32>
    %16 = arith.extui %15 : vector<512x512xi1> to vector<512x512xi32>
    %17 = arith.sitofp %16 : vector<512x512xi32> to vector<512x512xf32>
    %18 = arith.truncf %17 : vector<512x512xf32> to vector<512x512xbf16>
    %c0_6 = arith.constant 0 : index
    %c0_7 = arith.constant 0 : index
    %19 = vector.load %arg11[%c0_6, %c0_7] : memref<512x128xf32, #tpu.memory_space<vmem>>, vector<512x128xf32>
    %20 = arith.truncf %12 : vector<512x128xf32> to vector<512x128xbf16>
    %cst_8 = arith.constant dense<0.000000e+00> : vector<512x128xf32>
    %21 = tpu.matmul %18, %20, %cst_8 {dimension_numbers = #tpu.dot_dimension_numbers<[1], [0], [0], [1], [0, 0, 1, 1], [], []>} : vector<512x512xbf16>, vector<512x128xbf16>, vector<512x128xf32> -> vector<512x128xf32>
    %22 = arith.addf %19, %21 : vector<512x128xf32>
    %c0_9 = arith.constant 0 : index
    %c0_10 = arith.constant 0 : index
    %23 = vector.load %arg11[%c0_9, %c0_10] : memref<512x128xf32, #tpu.memory_space<vmem>>, vector<512x128xf32>
    tpu.vector_store %arg11[%c0_9, %c0_10], %22 {strides = array<i32>} : memref<512x128xf32, #tpu.memory_space<vmem>>, vector<512x128xf32>,
    %c0_i32_11 = arith.constant 0 : i32
    %24 = arith.cmpi eq, %arg0, %c0_i32_11 : i32
    %25 = arith.extui %24 : i1 to i32
    %c0_i32_12 = arith.constant 0 : i32
    %26 = arith.cmpi ne, %25, %c0_i32_12 : i32
    scf.if %26 {
      %c0_13 = arith.constant 0 : index
      %c0_14 = arith.constant 0 : index
      %27 = vector.load %arg3[%c0_13, %c0_14] : memref<512x128xbf16, #tpu.memory_space<vmem>>, vector<512x128xbf16>
      %c0_15 = arith.constant 0 : index
      %c0_16 = arith.constant 0 : index
      %28 = vector.load %arg11[%c0_15, %c0_16] : memref<512x128xf32, #tpu.memory_space<vmem>>, vector<512x128xf32>
      %29 = arith.truncf %28 : vector<512x128xf32> to vector<512x128xbf16>
      %30 = tpu.concatenate %27, %29 in 1 : vector<512x128xbf16>, vector<512x128xbf16> -> vector<512x256xbf16>
      %c0_17 = arith.constant 0 : index
      %c0_18 = arith.constant 0 : index
      %31 = vector.load %arg4[%c0_17, %c0_18] : memref<256x128xbf16, #tpu.memory_space<vmem>>, vector<256x128xbf16>
      %cst_19 = arith.constant dense<0.000000e+00> : vector<512x128xf32>
      %32 = tpu.matmul %30, %31, %cst_19 {dimension_numbers = #tpu.dot_dimension_numbers<[1], [0], [0], [1], [0, 0, 1, 1], [], []>} : vector<512x256xbf16>, vector<256x128xbf16>, vector<512x128xf32> -> vector<512x128xf32>
      %c0_20 = arith.constant 0 : index
      %c0_21 = arith.constant 0 : index
      %33 = vector.load %arg5[%c0_20, %c0_21] : memref<1x128xf32, #tpu.memory_space<vmem>>, vector<1x128xf32>
      %34 = vector.broadcast %33 : vector<1x128xf32> to vector<512x128xf32>
      %35 = arith.addf %32, %34 : vector<512x128xf32>
      %cst_22 = arith.constant 0.000000e+00 : f32
      %36 = vector.broadcast %cst_22 : f32 to vector<512x128xf32>
      %37 = arith.maximumf %35, %36 : vector<512x128xf32>
      %38 = arith.truncf %37 : vector<512x128xf32> to vector<512x128xbf16>
      %c0_23 = arith.constant 0 : index
      %c0_24 = arith.constant 0 : index
      %39 = vector.load %arg6[%c0_23, %c0_24] : memref<128x128xbf16, #tpu.memory_space<vmem>>, vector<128x128xbf16>
      %cst_25 = arith.constant dense<0.000000e+00> : vector<512x128xf32>
      %40 = tpu.matmul %38, %39, %cst_25 {dimension_numbers = #tpu.dot_dimension_numbers<[1], [0], [0], [1], [0, 0, 1, 1], [], []>} : vector<512x128xbf16>, vector<128x128xbf16>, vector<512x128xf32> -> vector<512x128xf32>
      %c0_26 = arith.constant 0 : index
      %c0_27 = arith.constant 0 : index
      %41 = vector.load %arg7[%c0_26, %c0_27] : memref<1x128xf32, #tpu.memory_space<vmem>>, vector<1x128xf32>
      %42 = vector.broadcast %41 : vector<1x128xf32> to vector<512x128xf32>
      %43 = arith.addf %40, %42 : vector<512x128xf32>
      %cst_28 = arith.constant dense<0.000000e+00> : vector<512xf32>
      %44 = vector.multi_reduction <add>, %43, %cst_28 [1] : vector<512x128xf32> to vector<512xf32>
      %45 = vector.shape_cast %44 : vector<512xf32> to vector<512x1xf32>
      %cst_29 = arith.constant 1.280000e+02 : f32
      %46 = vector.broadcast %cst_29 : f32 to vector<512x1xf32>
      %47 = arith.divf %45, %46 : vector<512x1xf32>
      %48 = vector.broadcast %47 : vector<512x1xf32> to vector<512x128xf32>
      %49 = arith.subf %43, %48 : vector<512x128xf32>
      %50 = arith.mulf %49, %49 : vector<512x128xf32>
      %cst_30 = arith.constant dense<0.000000e+00> : vector<512xf32>
      %51 = vector.multi_reduction <add>, %50, %cst_30 [1] : vector<512x128xf32> to vector<512xf32>
      %52 = vector.shape_cast %51 : vector<512xf32> to vector<512x1xf32>
      %cst_31 = arith.constant 1.280000e+02 : f32
      %53 = vector.broadcast %cst_31 : f32 to vector<512x1xf32>
      %54 = arith.divf %52, %53 : vector<512x1xf32>
      %55 = vector.broadcast %47 : vector<512x1xf32> to vector<512x128xf32>
      %56 = arith.subf %43, %55 : vector<512x128xf32>
      %cst_32 = arith.constant 9.99999974E-6 : f32
      %57 = vector.broadcast %cst_32 : f32 to vector<512x1xf32>
      %58 = arith.addf %54, %57 : vector<512x1xf32>
      %59 = math.rsqrt %58 : vector<512x1xf32>
      %60 = vector.broadcast %59 : vector<512x1xf32> to vector<512x128xf32>
      %61 = arith.mulf %56, %60 : vector<512x128xf32>
      %c0_33 = arith.constant 0 : index
      %c0_34 = arith.constant 0 : index
      %62 = vector.load %arg8[%c0_33, %c0_34] : memref<1x128xf32, #tpu.memory_space<vmem>>, vector<1x128xf32>
      %63 = vector.broadcast %62 : vector<1x128xf32> to vector<512x128xf32>
      %64 = arith.mulf %61, %63 : vector<512x128xf32>
      %c0_35 = arith.constant 0 : index
      %c0_36 = arith.constant 0 : index
      %65 = vector.load %arg9[%c0_35, %c0_36] : memref<1x128xf32, #tpu.memory_space<vmem>>, vector<1x128xf32>
      %66 = vector.broadcast %65 : vector<1x128xf32> to vector<512x128xf32>
      %67 = arith.addf %64, %66 : vector<512x128xf32>
      %c0_37 = arith.constant 0 : index
      %c0_38 = arith.constant 0 : index
      %68 = vector.load %arg10[%c0_37, %c0_38] : memref<512x128xf32, #tpu.memory_space<vmem>>, vector<512x128xf32>
      tpu.vector_store %arg10[%c0_37, %c0_38], %67 {strides = array<i32>} : memref<512x128xf32, #tpu.memory_space<vmem>>, vector<512x128xf32>,
    } else {
    }
    return
  }
  func.func @transform_0(%arg0: i32) -> (i32, i32) {
    %c0_i32 = arith.constant 0 : i32
    %c0_i32_0 = arith.constant 0 : i32
    return %arg0, %c0_i32 : i32, i32
  }
  func.func @transform_1(%arg0: i32) -> (i32, i32) {
    %c0_i32 = arith.constant 0 : i32
    %c0_i32_0 = arith.constant 0 : i32
    return %c0_i32, %arg0 : i32, i32
  }
  func.func @transform_2(%arg0: i32) -> (i32, i32) {
    %c0_i32 = arith.constant 0 : i32
    %c0_i32_0 = arith.constant 0 : i32
    %c0_i32_1 = arith.constant 0 : i32
    return %c0_i32, %c0_i32_0 : i32, i32
  }
  func.func @transform_3(%arg0: i32) -> (i32, i32) {
    %c0_i32 = arith.constant 0 : i32
    %c0_i32_0 = arith.constant 0 : i32
    %c0_i32_1 = arith.constant 0 : i32
    return %c0_i32, %c0_i32_0 : i32, i32
  }
  func.func @transform_4(%arg0: i32) -> (i32, i32) {
    %c0_i32 = arith.constant 0 : i32
    %c0_i32_0 = arith.constant 0 : i32
    %c0_i32_1 = arith.constant 0 : i32
    return %c0_i32, %c0_i32_0 : i32, i32
  }
  func.func @transform_5(%arg0: i32) -> (i32, i32) {
    %c0_i32 = arith.constant 0 : i32
    %c0_i32_0 = arith.constant 0 : i32
    %c0_i32_1 = arith.constant 0 : i32
    return %c0_i32, %c0_i32_0 : i32, i32
  }
  func.func @transform_6(%arg0: i32) -> (i32, i32) {
    %c0_i32 = arith.constant 0 : i32
    %c0_i32_0 = arith.constant 0 : i32
    %c0_i32_1 = arith.constant 0 : i32
    return %c0_i32, %c0_i32_0 : i32, i32
  }
  func.func @transform_7(%arg0: i32) -> (i32, i32) {
    %c0_i32 = arith.constant 0 : i32
    %c0_i32_0 = arith.constant 0 : i32
    %c0_i32_1 = arith.constant 0 : i32
    return %c0_i32, %c0_i32_0 : i32, i32
  }
  func.func @transform_8(%arg0: i32) -> (i32, i32) {
    %c0_i32 = arith.constant 0 : i32
    %c0_i32_0 = arith.constant 0 : i32
    %c0_i32_1 = arith.constant 0 : i32
    return %c0_i32, %c0_i32_0 : i32, i32
  }
  func.func @transform_9(%arg0: i32) -> (i32, i32) {
    %c0_i32 = arith.constant 0 : i32
    %c0_i32_0 = arith.constant 0 : i32
    %c0_i32_1 = arith.constant 0 : i32
    return %c0_i32, %c0_i32_0 : i32, i32
  }
}

</mosaic_0001>

<bundles_post_ra>
// kernel: tpu_custom_call.1
= control target key start
LH: loop header
LB: loop body
LE: loop exit
PB: predicated region body
PF: predicated region fallthrough
CT: control target
= control target key end

     0   :  { %v11237_v2 = vmov 0   ;;  %s11224_s0 = inlined_call_operand.vmem [shape: s32[512,1], index: 0, kind: input, shape index: {}]   ;;  %s11225_s1 = inlined_call_operand.vmem [shape: s32[1,512], index: 1, kind: input, shape index: {}]   ;;  %s11226_s2 = inlined_call_operand.vmem [shape: bf16[512,128], index: 2, kind: input, shape index: {}]   ;;  %s11227_s3 = inlined_call_operand.vmem [shape: bf16[256,128], index: 3, kind: input, shape index: {}]   ;;  %s11228_s4 = inlined_call_operand.vmem [shape: f32[1,128], index: 4, kind: input, shape index: {}]   ;;  %s11229_s5 = inlined_call_operand.vmem [shape: bf16[128,128], index: 5, kind: input, shape index: {}]   ;;  %s11230_s6 = inlined_call_operand.vmem [shape: f32[1,128], index: 6, kind: input, shape index: {}]   ;;  %s11231_s7 = inlined_call_operand.vmem [shape: f32[1,128], index: 7, kind: input, shape index: {}]   ;;  %s11232_s8 = inlined_call_operand.vmem [shape: f32[1,128], index: 8, kind: input, shape index: {}]   ;;  %s11233_s9 = inlined_call_operand.hbm [shape: f32[512,128], index: 9, kind: output, shape index: {}]  }
   0x1   :  { %v152_v0 = vld [vmem:[%s11224_s0 + $0x190] sm:$0xff]  ;;  %v150_v1 = vld [vmem:[%s11224_s0 + $0x180] sm:$0xff]  ;;  %7309 = vset.pattern.permute.xlu1 %v11237_v2  ;;  %7308 = vset.pattern.permute.xlu0 %v11237_v2  ;;  %v153_v3 = vld [vmem:[%s11224_s0 + $0x198] sm:$0xff] }
   0x2   :  { %323 = vperm.xlu1 %7309, %v152_v0   ;;  %317 = vperm.xlu0 %7308, %v150_v1   ;;  %v151_v4 = vld [vmem:[%s11224_s0 + $0x188] sm:$0xff]  ;;  %v154_v6 = vld [vmem:[%s11224_s0 + $0x1a0] sm:$0xff]  ;;  %v157_v7 = vld [vmem:[%s11224_s0 + $0x1b8] sm:$0xff] }
   0x3   :  { %7271 = vmatprep.subr.bf16.mxu1 %v11237_v2  ;;  %1516 = vmatprep.subr.bf16.mxu0 %v11237_v2  ;;  %v155_v5 = vld [vmem:[%s11224_s0 + $0x1a8] sm:$0xff]  ;;  %v156_v8 = vld [vmem:[%s11224_s0 + $0x1b0] sm:$0xff]  ;;  %v7310_v9 = vld [vmem:[%s11226_s2 + $0x38] sm:$0xff]  }
   0x4   :  { %v159_v10 = vld [vmem:[%s11224_s0 + $0x1c8] sm:$0xff]  ;;  %v158_v11 = vld [vmem:[%s11224_s0 + $0x1c0] sm:$0xff]  ;;  %7287 = vmatpush1.bf16.msra.mxu1 %v7310_v9  ;;  %v7311_v12 = vld [vmem:[%s11226_s2 + $0x30] sm:$0xff]   ;;  %1517 = vmatpush1.bf16.msra.mxu0 %v7310_v9 }
   0x5   :  { %7272 = vmatprep.subr.bf16.mxu1 %v11237_v2  ;;  %1518 = vmatprep.subr.bf16.mxu0 %v11237_v2  ;;  %v161_v13 = vld [vmem:[%s11224_s0 + $0x1d8] sm:$0xff]  ;;  %v160_v14 = vld [vmem:[%s11224_s0 + $0x1d0] sm:$0xff]  ;;  %v7312_v15 = vld [vmem:[%s11226_s2 + $0x28] sm:$0xff]  }
   0x6   :  { %326 = vperm.xlu1 %7309, %v153_v3   ;;  %320 = vperm.xlu0 %7308, %v151_v4   ;;  %v163_v16 = vld [vmem:[%s11224_s0 + $0x1e8] sm:$0xff]  ;;  %v162_v17 = vld [vmem:[%s11224_s0 + $0x1e0] sm:$0xff]  ;;  %v165_v19 = vld [vmem:[%s11224_s0 + $0x1f8] sm:$0xff] }
   0x7   :  { %v7313_v18 = vld [vmem:[%s11226_s2 + $0x20] sm:$0xff]   ;;  %v164_v20 = vld [vmem:[%s11224_s0 + $0x1f0] sm:$0xff]  ;;  %v7314_v21 = vld [vmem:[%s11226_s2 + $0x18] sm:$0xff]  }
   0x8   :  { %7288 = vmatpush1.bf16.msra.mxu1 %v7311_v12  ;;  %1519 = vmatpush1.bf16.msra.mxu0 %v7311_v12  ;;  %v103_v22 = vld [vmem:[%s11224_s0 + $0x8] sm:$0xff]  ;;  %v102_v23 = vld [vmem:[%s11224_s0] sm:$0xff]  ;;  %v7315_v24 = vld [vmem:[%s11226_s2 + $0x10] sm:$0xff]  }
   0x9   :  { %7273 = vmatprep.subr.bf16.mxu1 %v11237_v2  ;;  %1520 = vmatprep.subr.bf16.mxu0 %v11237_v2  ;;  %v105_v25 = vld [vmem:[%s11224_s0 + $0x18] sm:$0xff]  ;;  %v104_v26 = vld [vmem:[%s11224_s0 + $0x10] sm:$0xff]  ;;  %v7316_v27 = vld [vmem:[%s11226_s2 + $0x8] sm:$0xff]  }
   0xa   :  { %332 = vperm.xlu1 %7309, %v155_v5   ;;  %329 = vperm.xlu0 %7308, %v154_v6   ;;  %v107_v28 = vld [vmem:[%s11224_s0 + $0x28] sm:$0xff]  ;;  %v106_v29 = vld [vmem:[%s11224_s0 + $0x20] sm:$0xff]  ;;  %v109_v31 = vld [vmem:[%s11224_s0 + $0x38] sm:$0xff] }
   0xb   :  { %v7317_v30 = vld [vmem:[%s11226_s2] sm:$0xff]   ;;  %v108_v32 = vld [vmem:[%s11224_s0 + $0x30] sm:$0xff]  ;;  %v7318_v33 = vld [vmem:[%s11226_s2 + $0x78] sm:$0xff]  }
   0xc   :  { %7289 = vmatpush1.bf16.msra.mxu1 %v7312_v15  ;;  %1521 = vmatpush1.bf16.msra.mxu0 %v7312_v15  ;;  %v111_v34 = vld [vmem:[%s11224_s0 + $0x48] sm:$0xff]  ;;  %v110_v35 = vld [vmem:[%s11224_s0 + $0x40] sm:$0xff]  ;;  %v7319_v36 = vld [vmem:[%s11226_s2 + $0x70] sm:$0xff]  }
   0xd   :  { %7274 = vmatprep.subr.bf16.mxu1 %v11237_v2  ;;  %1522 = vmatprep.subr.bf16.mxu0 %v11237_v2  ;;  %v113_v37 = vld [vmem:[%s11224_s0 + $0x58] sm:$0xff]  ;;  %v112_v38 = vld [vmem:[%s11224_s0 + $0x50] sm:$0xff]  ;;  %v7320_v39 = vld [vmem:[%s11226_s2 + $0x68] sm:$0xff]  }
   0xe   :  { %338 = vperm.xlu1 %7309, %v157_v7   ;;  %335 = vperm.xlu0 %7308, %v156_v8   ;;  %v115_v40 = vld [vmem:[%s11224_s0 + $0x68] sm:$0xff]  ;;  %v114_v41 = vld [vmem:[%s11224_s0 + $0x60] sm:$0xff]  ;;  %v117_v43 = vld [vmem:[%s11224_s0 + $0x78] sm:$0xff] }
   0xf   :  { %v7321_v42 = vld [vmem:[%s11226_s2 + $0x60] sm:$0xff]   ;;  %v116_v44 = vld [vmem:[%s11224_s0 + $0x70] sm:$0xff]  ;;  %v7322_v45 = vld [vmem:[%s11226_s2 + $0x58] sm:$0xff]  }
  0x10   :  { %7290 = vmatpush1.bf16.msra.mxu1 %v7313_v18  ;;  %1523 = vmatpush1.bf16.msra.mxu0 %v7313_v18  ;;  %v119_v46 = vld [vmem:[%s11224_s0 + $0x88] sm:$0xff]  ;;  %v118_v47 = vld [vmem:[%s11224_s0 + $0x80] sm:$0xff]  ;;  %v7323_v48 = vld [vmem:[%s11226_s2 + $0x50] sm:$0xff]  }
  0x11   :  { %7275 = vmatprep.subr.bf16.mxu1 %v11237_v2  ;;  %1524 = vmatprep.subr.bf16.mxu0 %v11237_v2  ;;  %v121_v49 = vld [vmem:[%s11224_s0 + $0x98] sm:$0xff]  ;;  %v120_v50 = vld [vmem:[%s11224_s0 + $0x90] sm:$0xff]  ;;  %v7324_v51 = vld [vmem:[%s11226_s2 + $0x48] sm:$0xff]  }
  0x12   :  { %344 = vperm.xlu1 %7309, %v159_v10   ;;  %341 = vperm.xlu0 %7308, %v158_v11   ;;  %v123_v52 = vld [vmem:[%s11224_s0 + $0xa8] sm:$0xff]  ;;  %v122_v53 = vld [vmem:[%s11224_s0 + $0xa0] sm:$0xff]  ;;  %v125_v55 = vld [vmem:[%s11224_s0 + $0xb8] sm:$0xff] }
  0x13   :  { %v7325_v54 = vld [vmem:[%s11226_s2 + $0x40] sm:$0xff]   ;;  %v124_v56 = vld [vmem:[%s11224_s0 + $0xb0] sm:$0xff]  ;;  %v127_v57 = vld [vmem:[%s11224_s0 + $0xc8] sm:$0xff] }
  0x14   :  { %7291 = vmatpush1.bf16.msra.mxu1 %v7314_v21  ;;  %1525 = vmatpush1.bf16.msra.mxu0 %v7314_v21  ;;  %v126_v58 = vld [vmem:[%s11224_s0 + $0xc0] sm:$0xff]  ;;  %v129_v59 = vld [vmem:[%s11224_s0 + $0xd8] sm:$0xff]  ;;  %v128_v60 = vld [vmem:[%s11224_s0 + $0xd0] sm:$0xff] }
  0x15   :  { %7276 = vmatprep.subr.bf16.mxu1 %v11237_v2  ;;  %1526 = vmatprep.subr.bf16.mxu0 %v11237_v2  ;;  %v131_v61 = vld [vmem:[%s11224_s0 + $0xe8] sm:$0xff]  ;;  %v130_v62 = vld [vmem:[%s11224_s0 + $0xe0] sm:$0xff] }
  0x16   :  { %350 = vperm.xlu1 %7309, %v161_v13   ;;  %347 = vperm.xlu0 %7308, %v160_v14  }
  0x18   :  { %7292 = vmatpush1.bf16.msra.mxu1 %v7315_v24  ;;  %1527 = vmatpush1.bf16.msra.mxu0 %v7315_v24 }
  0x19   :  { %7277 = vmatprep.subr.bf16.mxu1 %v11237_v2  ;;  %1528 = vmatprep.subr.bf16.mxu0 %v11237_v2 }
  0x1a   :  { %356 = vperm.xlu1 %7309, %v163_v16   ;;  %353 = vperm.xlu0 %7308, %v162_v17  }
  0x1c   :  { %7293 = vmatpush1.bf16.msra.mxu1 %v7316_v27  ;;  %1529 = vmatpush1.bf16.msra.mxu0 %v7316_v27 }
  0x1d   :  { %7278 = vmatprep.subr.bf16.mxu1 %v11237_v2  ;;  %1530 = vmatprep.subr.bf16.mxu0 %v11237_v2 }
  0x1e   :  { %362 = vperm.xlu1 %7309, %v165_v19   ;;  %359 = vperm.xlu0 %7308, %v164_v20  }
  0x20   :  { %7294 = vmatpush1.bf16.msra.mxu1 %v7317_v30  ;;  %1531 = vmatpush1.bf16.msra.mxu0 %v7317_v30 }
  0x21   :  { %7279 = vmatprep.subr.bf16.mxu1 %v11237_v2  ;;  %1532 = vmatprep.subr.bf16.mxu0 %v11237_v2 }
  0x22   :  { %176 = vperm.xlu1 %7309, %v103_v22   ;;  %173 = vperm.xlu0 %7308, %v102_v23  }
  0x24   :  { %7295 = vmatpush2.bf16.msra.mxu1 %v7318_v33  ;;  %1533 = vmatpush2.bf16.msra.mxu0 %v7318_v33 }
  0x25   :  { %7280 = vmatprep.subr.bf16.mxu1 %v11237_v2  ;;  %1534 = vmatprep.subr.bf16.mxu0 %v11237_v2 }
  0x26   :  { %182 = vperm.xlu1 %7309, %v105_v25   ;;  %179 = vperm.xlu0 %7308, %v104_v26  }
  0x28   :  { %7296 = vmatpush2.bf16.msra.mxu1 %v7319_v36  ;;  %1535 = vmatpush2.bf16.msra.mxu0 %v7319_v36 }
  0x29   :  { %7281 = vmatprep.subr.bf16.mxu1 %v11237_v2  ;;  %1536 = vmatprep.subr.bf16.mxu0 %v11237_v2 }
  0x2a   :  { %188 = vperm.xlu1 %7309, %v107_v28   ;;  %185 = vperm.xlu0 %7308, %v106_v29  }
  0x2c   :  { %7297 = vmatpush2.bf16.msra.mxu1 %v7320_v39  ;;  %1537 = vmatpush2.bf16.msra.mxu0 %v7320_v39 }
  0x2d   :  { %7282 = vmatprep.subr.bf16.mxu1 %v11237_v2  ;;  %1538 = vmatprep.subr.bf16.mxu0 %v11237_v2 }
  0x2e   :  { %194 = vperm.xlu1 %7309, %v109_v31   ;;  %191 = vperm.xlu0 %7308, %v108_v32  }
  0x30   :  { %7298 = vmatpush2.bf16.msra.mxu1 %v7321_v42  ;;  %1539 = vmatpush2.bf16.msra.mxu0 %v7321_v42 }
  0x31   :  { %7283 = vmatprep.subr.bf16.mxu1 %v11237_v2  ;;  %1540 = vmatprep.subr.bf16.mxu0 %v11237_v2 }
  0x32   :  { %200 = vperm.xlu1 %7309, %v111_v34   ;;  %197 = vperm.xlu0 %7308, %v110_v35  }
  0x34   :  { %7299 = vmatpush2.bf16.msra.mxu1 %v7322_v45  ;;  %1541 = vmatpush2.bf16.msra.mxu0 %v7322_v45 }
  0x35   :  { %7284 = vmatprep.subr.bf16.mxu1 %v11237_v2  ;;  %1542 = vmatprep.subr.bf16.mxu0 %v11237_v2 }
  0x36   :  { %206 = vperm.xlu1 %7309, %v113_v37   ;;  %203 = vperm.xlu0 %7308, %v112_v38  }
  0x38   :  { %7300 = vmatpush2.bf16.msra.mxu1 %v7323_v48  ;;  %1543 = vmatpush2.bf16.msra.mxu0 %v7323_v48 }
  0x39   :  { %7285 = vmatprep.subr.bf16.mxu1 %v11237_v2  ;;  %1544 = vmatprep.subr.bf16.mxu0 %v11237_v2 }
  0x3a   :  { %212 = vperm.xlu1 %7309, %v115_v40   ;;  %209 = vperm.xlu0 %7308, %v114_v41  }
  0x3c   :  { %7301 = vmatpush2.bf16.msra.mxu1 %v7324_v51  ;;  %1545 = vmatpush2.bf16.msra.mxu0 %v7324_v51 }
  0x3d   :  { %7286 = vmatprep.subr.bf16.mxu1 %v11237_v2  ;;  %1546 = vmatprep.subr.bf16.mxu0 %v11237_v2 }
  0x3e   :  { %218 = vperm.xlu1 %7309, %v117_v43   ;;  %215 = vperm.xlu0 %7308, %v116_v44  }
  0x40   :  { %7302 = vmatpush2.bf16.msra.mxu1 %v7325_v54  ;;  %1547 = vmatpush2.bf16.msra.mxu0 %v7325_v54 }
  0x41   :  { %1805 = vmatprep.subr.bf16.mxu1 %v11237_v2  ;;  %3167 = vmatprep.subr.bf16.mxu0 %v11237_v2 }
  0x42   :  { %224 = vperm.xlu1 %7309, %v119_v46   ;;  %221 = vperm.xlu0 %7308, %v118_v47  }
  0x46   :  { %230 = vperm.xlu1 %7309, %v121_v49   ;;  %227 = vperm.xlu0 %7308, %v120_v50  }
  0x4a   :  { %236 = vperm.xlu1 %7309, %v123_v52   ;;  %233 = vperm.xlu0 %7308, %v122_v53  }
  0x4e   :  { %242 = vperm.xlu1 %7309, %v125_v55   ;;  %239 = vperm.xlu0 %7308, %v124_v56  }
  0x52   :  { %248 = vperm.xlu1 %7309, %v127_v57   ;;  %245 = vperm.xlu0 %7308, %v126_v58  }
  0x56   :  { %254 = vperm.xlu1 %7309, %v129_v59   ;;  %251 = vperm.xlu0 %7308, %v128_v60  }
  0x5a   :  { %260 = vperm.xlu1 %7309, %v131_v61   ;;  %257 = vperm.xlu0 %7308, %v130_v62  }
  0x5b   :  { %14 = vsyncpa [#allocation4], 0  ;;  %v133_v63 = vld [vmem:[%s11224_s0 + $0xf8] sm:$0xff]  ;;  %v132_v0 = vld [vmem:[%s11224_s0 + $0xf0] sm:$0xff]  ;;  %v11234_v14 = vlaneseq  ;;  %v11235_v26 = vmov 1.0|1.0  }
  0x5c   :  { %v135_v1 = vld [vmem:[%s11224_s0 + $0x108] sm:$0xff]  ;;  %v134_v3 = vld [vmem:[%s11224_s0 + $0x100] sm:$0xff]  ;;  %v137_v4 = vld [vmem:[%s11224_s0 + $0x118] sm:$0xff] }
  0x5d   :  { %v136_v5 = vld [vmem:[%s11224_s0 + $0x110] sm:$0xff]  ;;  %v139_v6 = vld [vmem:[%s11224_s0 + $0x128] sm:$0xff]  ;;  %v138_v7 = vld [vmem:[%s11224_s0 + $0x120] sm:$0xff]  ;;  %v7876_v17 = vand.u32 127, %v11234_v14 }
  0x5e   :  { %266 = vperm.xlu1 %7309, %v133_v63   ;;  %263 = vperm.xlu0 %7308, %v132_v0   ;;  %v141_v8 = vld [vmem:[%s11224_s0 + $0x138] sm:$0xff]  ;;  %v140_v9 = vld [vmem:[%s11224_s0 + $0x130] sm:$0xff]  ;;  %v143_v10 = vld [vmem:[%s11224_s0 + $0x148] sm:$0xff] }
  0x5f   :  { %v142_v11 = vld [vmem:[%s11224_s0 + $0x140] sm:$0xff]  ;;  %v145_v12 = vld [vmem:[%s11224_s0 + $0x158] sm:$0xff]  ;;  %v144_v13 = vld [vmem:[%s11224_s0 + $0x150] sm:$0xff]  ;;  %v7889_v22 = vadd.s32 128, %v7876_v17  ;;  %v8113_v62 = vadd.s32 384, %v7876_v17 }
  0x60   :  { %v147_v15 = vld [vmem:[%s11224_s0 + $0x168] sm:$0xff]  ;;  %v146_v16 = vld [vmem:[%s11224_s0 + $0x160] sm:$0xff]  ;;  %v149_v18 = vld [vmem:[%s11224_s0 + $0x178] sm:$0xff] }
  0x61   :  { %v148_v19 = vld [vmem:[%s11224_s0 + $0x170] sm:$0xff]  ;;  %v7326_v25 = vld [vmem:[%s11226_s2 + $0xb8] sm:$0xff]   ;;  %v7328_v32 = vld [vmem:[%s11226_s2 + $0xa8] sm:$0xff]  }
  0x62   :  { %272 = vperm.xlu1 %7309, %v135_v1   ;;  %269 = vperm.xlu0 %7308, %v134_v3   ;;  %v7327_v29 = vld [vmem:[%s11226_s2 + $0xb0] sm:$0xff]   ;;  %v7329_v35 = vld [vmem:[%s11226_s2 + $0xa0] sm:$0xff]   ;;  %v7330_v38 = vld [vmem:[%s11226_s2 + $0x98] sm:$0xff]  }
  0x63   :  { %v7331_v41 = vld [vmem:[%s11226_s2 + $0x90] sm:$0xff]   ;;  %v7332_v44 = vld [vmem:[%s11226_s2 + $0x88] sm:$0xff]   ;;  %v7333_v47 = vld [vmem:[%s11226_s2 + $0x80] sm:$0xff]  }
  0x64   :  { %v7334_v50 = vld [vmem:[%s11226_s2 + $0xf8] sm:$0xff]   ;;  %v7335_v53 = vld [vmem:[%s11226_s2 + $0xf0] sm:$0xff]   ;;  %v7336_v54 = vld [vmem:[%s11226_s2 + $0xe8] sm:$0xff]  }
  0x65   :  { %v7337_v57 = vld [vmem:[%s11226_s2 + $0xe0] sm:$0xff]   ;;  %v7338_v58 = vld [vmem:[%s11226_s2 + $0xd8] sm:$0xff]   ;;  %v7339_v61 = vld [vmem:[%s11226_s2 + $0xd0] sm:$0xff]  }
  0x66   :  { %278 = vperm.xlu1 %7309, %v137_v4   ;;  %275 = vperm.xlu0 %7308, %v136_v5   ;;  %v7340_v63 = vld [vmem:[%s11226_s2 + $0xc8] sm:$0xff]   ;;  %v7341_v3 = vld [vmem:[%s11226_s2 + $0xc0] sm:$0xff]   ;;  %v8143_v4 = vadd.s32 256, %v7876_v17 }
  0x6a   :  { %284 = vperm.xlu1 %7309, %v139_v6   ;;  %281 = vperm.xlu0 %7308, %v138_v7  }
  0x6e   :  { %290 = vperm.xlu1 %7309, %v141_v8   ;;  %287 = vperm.xlu0 %7308, %v140_v9  }
  0x72   :  { %296 = vperm.xlu1 %7309, %v143_v10   ;;  %293 = vperm.xlu0 %7308, %v142_v11  }
  0x76   :  { %302 = vperm.xlu1 %7309, %v145_v12   ;;  %299 = vperm.xlu0 %7308, %v144_v13  }
  0x7a   :  { %308 = vperm.xlu1 %7309, %v147_v15   ;;  %305 = vperm.xlu0 %7308, %v146_v16  }
  0x7d   :  { %v7884_v20 = vpop.permute.xlu1 %323  ;;  %v7886_v21 = vpop.permute.xlu0 %317 }
  0x7e   :  { %314 = vperm.xlu1 %7309, %v149_v18   ;;  %311 = vperm.xlu0 %7308, %v148_v19   ;;  %vm557_vm0 = vcmp.eq.s32.totalorder %v7889_v22, %v7886_v21  ;;  %vm565_vm3 = vcmp.eq.s32.totalorder %v7889_v22, %v7884_v20  ;;  %vm556_vm6 = vcmp.eq.s32.totalorder %v7876_v17, %v7886_v21 }
  0x7f   :  { %vm564_vm9 = vcmp.eq.s32.totalorder %v7876_v17, %v7884_v20 }
  0x81   :  { %v7891_v23 = vpop.permute.xlu1 %326  ;;  %v7893_v24 = vpop.permute.xlu0 %320 }
  0x82   :  { %vm561_vm1 = vcmp.eq.s32.totalorder %v7889_v22, %v7893_v24  ;;  %vm560_vm2 = vcmp.eq.s32.totalorder %v7876_v17, %v7893_v24  ;;  %vm569_vm4 = vcmp.eq.s32.totalorder %v7889_v22, %v7891_v23  ;;  %vm568_vm10 = vcmp.eq.s32.totalorder %v7876_v17, %v7891_v23 }
  0x83   :  { %vm6419_vm5 = vmpackc.low %vm561_vm1, %vm557_vm0 }
  0x84   :  { %6420 = vmatprep.mubr.msk.bf16.mxu1 %vm6419_vm5, %v11235_v26  ;;  %vm6421_vm7 = vmpackc.low %vm560_vm2, %vm556_vm6 }
  0x85   :  { %v7911_v27 = vpop.permute.xlu1 %332  ;;  %6422 = vmatmul.mubr.msk.bf16.vlgmr.msra.gmra.mxu1 %vm6421_vm7, %v11235_v26  ;;  %v7914_v28 = vpop.permute.xlu0 %329  ;;  %vm6423_vm8 = vmpackc.low %vm569_vm4, %vm565_vm3 }
  0x86   :  { %1806 = vmatpush1.bf16.msra.mxu1 %v7326_v25  ;;  %6424 = vmatprep.mubr.msk.bf16.mxu1 %vm6423_vm8, %v11235_v26  ;;  %vm573_vm11 = vcmp.eq.s32.totalorder %v7889_v22, %v7914_v28  ;;  %vm577_vm12 = vcmp.eq.s32.totalorder %v7889_v22, %v7911_v27  ;;  %vm6425_vm13 = vmpackc.low %vm568_vm10, %vm564_vm9  ;;  %vm572_vm15 = vcmp.eq.s32.totalorder %v7876_v17, %v7914_v28 }
  0x87   :  { %1807 = vmatprep.subr.bf16.mxu1 %v11237_v2  ;;  %vm6427_vm14 = vmpackc.low %vm577_vm12, %vm573_vm11  ;;  %vm576_vm0 = vcmp.eq.s32.totalorder %v7876_v17, %v7911_v27 }
  0x88   :  { %vm6429_vm3 = vmpackc.low %vm576_vm0, %vm572_vm15 }
  0x89   :  { %v7921_v30 = vpop.permute.xlu1 %338  ;;  %v7923_v31 = vpop.permute.xlu0 %335 }
  0x8a   :  { %1808 = vmatpush1.bf16.msra.mxu1 %v7327_v29  ;;  %vm581_vm1 = vcmp.eq.s32.totalorder %v7889_v22, %v7923_v31  ;;  %vm585_vm2 = vcmp.eq.s32.totalorder %v7889_v22, %v7921_v30  ;;  %vm580_vm5 = vcmp.eq.s32.totalorder %v7876_v17, %v7923_v31  ;;  %vm584_vm6 = vcmp.eq.s32.totalorder %v7876_v17, %v7921_v30 }
  0x8b   :  { %1809 = vmatprep.subr.bf16.mxu1 %v11237_v2  ;;  %vm6431_vm4 = vmpackc.low %vm585_vm2, %vm581_vm1 }
  0x8c   :  { %vm6433_vm9 = vmpackc.low %vm584_vm6, %vm580_vm5 }
  0x8d   :  { %v7937_v33 = vpop.permute.xlu1 %344  ;;  %6426 = vmatmul.mubr.msk.bf16.gmra.mxu1 %vm6425_vm13, %v11235_v26  ;;  %v7940_v34 = vpop.permute.xlu0 %341 }
  0x8e   :  { %6428 = vmatprep.mubr.msk.bf16.mxu1 %vm6427_vm14, %v11235_v26  ;;  %1810 = vmatpush1.bf16.msra.mxu1 %v7328_v32  ;;  %vm589_vm7 = vcmp.eq.s32.totalorder %v7889_v22, %v7940_v34  ;;  %vm593_vm8 = vcmp.eq.s32.totalorder %v7889_v22, %v7937_v33  ;;  %vm588_vm1 = vcmp.eq.s32.totalorder %v7876_v17, %v7940_v34 }
  0x8f   :  { %1811 = vmatprep.subr.bf16.mxu1 %v11237_v2  ;;  %vm6435_vm10 = vmpackc.low %vm593_vm8, %vm589_vm7  ;;  %vm592_vm2 = vcmp.eq.s32.totalorder %v7876_v17, %v7937_v33 }
  0x90   :  { %vm6437_vm8 = vmpackc.low %vm592_vm2, %vm588_vm1 }
  0x91   :  { %v7947_v36 = vpop.permute.xlu1 %350  ;;  %v7949_v37 = vpop.permute.xlu0 %347 }
  0x92   :  { %1812 = vmatpush1.bf16.msra.mxu1 %v7329_v35  ;;  %vm601_vm6 = vcmp.eq.s32.totalorder %v7889_v22, %v7947_v36 }
  0x93   :  { %1813 = vmatprep.subr.bf16.mxu1 %v11237_v2 }
  0x95   :  { %v7963_v39 = vpop.permute.xlu1 %356  ;;  %6430 = vmatmul.mubr.msk.bf16.gmra.mxu1 %vm6429_vm3, %v11235_v26  ;;  %v7966_v40 = vpop.permute.xlu0 %353  ;;  %vm597_vm3 = vcmp.eq.s32.totalorder %v7889_v22, %v7949_v37 }
  0x96   :  { %6432 = vmatprep.mubr.msk.bf16.mxu1 %vm6431_vm4, %v11235_v26  ;;  %1814 = vmatpush1.bf16.msra.mxu1 %v7330_v38  ;;  %vm605_vm2 = vcmp.eq.s32.totalorder %v7889_v22, %v7966_v40 }
  0x97   :  { %1815 = vmatprep.subr.bf16.mxu1 %v11237_v2 }
  0x99   :  { %v7973_v42 = vpop.permute.xlu1 %362  ;;  %v7975_v43 = vpop.permute.xlu0 %359 }
  0x9a   :  { %1816 = vmatpush1.bf16.msra.mxu1 %v7331_v41 }
  0x9b   :  { %1817 = vmatprep.subr.bf16.mxu1 %v11237_v2 }
  0x9d   :  { %6434 = vmatmul.mubr.msk.bf16.gmra.mxu1 %vm6433_vm9, %v11235_v26  ;;  %v7990_v45 = vpop.permute.xlu1 %176  ;;  %v7992_v46 = vpop.permute.xlu0 %173  ;;  %vm6439_vm9 = vmpackc.low %vm601_vm6, %vm597_vm3  ;;  %vm609_vm3 = vcmp.eq.s32.totalorder %v7889_v22, %v7963_v39 }
  0x9e   :  { %6436 = vmatprep.mubr.msk.bf16.mxu1 %vm6435_vm10, %v11235_v26  ;;  %1818 = vmatpush1.bf16.msra.mxu1 %v7332_v44  ;;  %vm365_vm11 = vcmp.eq.s32.totalorder %v7889_v22, %v7992_v46  ;;  %vm369_vm12 = vcmp.eq.s32.totalorder %v7889_v22, %v7990_v45  ;;  %vm364_vm13 = vcmp.eq.s32.totalorder %v7876_v17, %v7992_v46 }
  0x9f   :  { %1819 = vmatprep.subr.bf16.mxu1 %v11237_v2  ;;  %vm368_vm14 = vcmp.eq.s32.totalorder %v7876_v17, %v7990_v45  ;;  %vm6323_vm15 = vmpackc.low %vm369_vm12, %vm365_vm11 }
  0xa0   :  { %6324 = vmatprep.mubr.msk.bf16.mxu0 %vm6323_vm15, %v11235_v26  ;;  %vm6325_vm0 = vmpackc.low %vm368_vm14, %vm364_vm13  ;;  %vm596_vm15 = vcmp.eq.s32.totalorder %v7876_v17, %v7949_v37 }
  0xa1   :  { %v8008_v48 = vpop.permute.xlu1 %182  ;;  %v8010_v49 = vpop.permute.xlu0 %179  ;;  %6326 = vmatmul.mubr.msk.bf16.vlgmr.msra.gmra.mxu0 %vm6325_vm0, %v11235_v26  ;;  %vm600_vm0 = vcmp.eq.s32.totalorder %v7876_v17, %v7947_v36 }
  0xa2   :  { %1820 = vmatpush1.bf16.msra.mxu1 %v7333_v47  ;;  %vm373_vm4 = vcmp.eq.s32.totalorder %v7889_v22, %v8010_v49  ;;  %vm377_vm5 = vcmp.eq.s32.totalorder %v7889_v22, %v8008_v48  ;;  %vm372_vm10 = vcmp.eq.s32.totalorder %v7876_v17, %v8010_v49  ;;  %vm376_vm11 = vcmp.eq.s32.totalorder %v7876_v17, %v8008_v48 }
  0xa3   :  { %vm6327_vm7 = vmpackc.low %vm377_vm5, %vm373_vm4  ;;  %1821 = vmatprep.subr.bf16.mxu1 %v11237_v2 }
  0xa4   :  { %6328 = vmatprep.mubr.msk.bf16.mxu0 %vm6327_vm7, %v11235_v26  ;;  %vm6329_vm14 = vmpackc.low %vm376_vm11, %vm372_vm10  ;;  %vm604_vm11 = vcmp.eq.s32.totalorder %v7876_v17, %v7966_v40 }
  0xa5   :  { %6438 = vmatmul.mubr.msk.bf16.gmra.mxu1 %vm6437_vm8, %v11235_v26  ;;  %v8031_v51 = vpop.permute.xlu1 %188  ;;  %v8033_v52 = vpop.permute.xlu0 %185  ;;  %vm6441_vm4 = vmpackc.low %vm600_vm0, %vm596_vm15  ;;  %vm617_vm15 = vcmp.eq.s32.totalorder %v7889_v22, %v7973_v42 }
  0xa6   :  { %6440 = vmatprep.mubr.msk.bf16.mxu1 %vm6439_vm9, %v11235_v26  ;;  %1822 = vmatpush2.bf16.msra.mxu1 %v7334_v50  ;;  %vm381_vm12 = vcmp.eq.s32.totalorder %v7889_v22, %v8033_v52  ;;  %vm385_vm13 = vcmp.eq.s32.totalorder %v7889_v22, %v8031_v51  ;;  %vm6443_vm5 = vmpackc.low %vm609_vm3, %vm605_vm2  ;;  %vm380_vm6 = vcmp.eq.s32.totalorder %v7876_v17, %v8033_v52 }
  0xa7   :  { %1823 = vmatprep.subr.bf16.mxu1 %v11237_v2  ;;  %vm6331_vm1 = vmpackc.low %vm385_vm13, %vm381_vm12  ;;  %vm384_vm7 = vcmp.eq.s32.totalorder %v7876_v17, %v8031_v51  ;;  %vm608_vm12 = vcmp.eq.s32.totalorder %v7876_v17, %v7963_v39 }
  0xa8   :  { %vm6333_vm10 = vmpackc.low %vm384_vm7, %vm380_vm6  ;;  %vm612_vm7 = vcmp.eq.s32.totalorder %v7876_v17, %v7975_v43 }
  0xa9   :  { %6330 = vmatmul.mubr.msk.bf16.gmra.mxu0 %vm6329_vm14, %v11235_v26  ;;  %v8062_v55 = vpop.permute.xlu1 %194  ;;  %v8064_v56 = vpop.permute.xlu0 %191  ;;  %vm613_vm14 = vcmp.eq.s32.totalorder %v7889_v22, %v7975_v43  ;;  %vm6445_vm0 = vmpackc.low %vm608_vm12, %vm604_vm11  ;;  %vm371_vm11 = vcmp.eq.s32.totalorder %v8113_v62, %v7990_v45 }
  0xaa   :  { %1824 = vmatpush2.bf16.msra.mxu1 %v7335_v53  ;;  %6332 = vmatprep.mubr.msk.bf16.mxu0 %vm6331_vm1, %v11235_v26  ;;  %vm389_vm8 = vcmp.eq.s32.totalorder %v7889_v22, %v8064_v56  ;;  %vm393_vm9 = vcmp.eq.s32.totalorder %v7889_v22, %v8062_v55  ;;  %vm6447_vm1 = vmpackc.low %vm617_vm15, %vm613_vm14  ;;  %vm388_vm2 = vcmp.eq.s32.totalorder %v7876_v17, %v8064_v56 }
  0xab   :  { %1825 = vmatprep.subr.bf16.mxu1 %v11237_v2  ;;  %vm6335_vm13 = vmpackc.low %vm393_vm9, %vm389_vm8  ;;  %vm392_vm3 = vcmp.eq.s32.totalorder %v7876_v17, %v8062_v55  ;;  %vm616_vm8 = vcmp.eq.s32.totalorder %v7876_v17, %v7973_v42 }
  0xac   :  { %vm6337_vm6 = vmpackc.low %vm392_vm3, %vm388_vm2  ;;  %vm370_vm2 = vcmp.eq.s32.totalorder %v8143_v4, %v7990_v45  ;;  %vm366_vm3 = vcmp.eq.s32.totalorder %v8143_v4, %v7992_v46 }
  0xad   :  { %6442 = vmatmul.mubr.msk.bf16.gmra.mxu1 %vm6441_vm4, %v11235_v26  ;;  %v8094_v59 = vpop.permute.xlu1 %200  ;;  %v8096_v60 = vpop.permute.xlu0 %197  ;;  %vm6449_vm12 = vmpackc.low %vm616_vm8, %vm612_vm7  ;;  %vm379_vm7 = vcmp.eq.s32.totalorder %v8113_v62, %v8008_v48 }
  0xae   :  { %6444 = vmatprep.mubr.msk.bf16.mxu1 %vm6443_vm5, %v11235_v26  ;;  %1826 = vmatpush2.bf16.msra.mxu1 %v7336_v54  ;;  %vm397_vm4 = vcmp.eq.s32.totalorder %v7889_v22, %v8096_v60  ;;  %vm401_vm5 = vcmp.eq.s32.totalorder %v7889_v22, %v8094_v59  ;;  %vm396_vm14 = vcmp.eq.s32.totalorder %v7876_v17, %v8096_v60  ;;  %vm6453_vm8 = vmpackc.low %vm370_vm2, %vm366_vm3 }
  0xaf   :  { %1827 = vmatprep.subr.bf16.mxu1 %v11237_v2  ;;  %vm6339_vm9 = vmpackc.low %vm401_vm5, %vm397_vm4  ;;  %vm400_vm15 = vcmp.eq.s32.totalorder %v7876_v17, %v8094_v59  ;;  %vm383_vm2 = vcmp.eq.s32.totalorder %v8113_v62, %v8033_v52  ;;  %vm387_vm3 = vcmp.eq.s32.totalorder %v8113_v62, %v8031_v51 }
  0xb0   :  { %vm6341_vm4 = vmpackc.low %vm400_vm15, %vm396_vm14  ;;  %vm374_vm15 = vcmp.eq.s32.totalorder %v8143_v4, %v8010_v49 }
  0xb1   :  { %6334 = vmatmul.mubr.msk.bf16.gmra.mxu0 %vm6333_vm10, %v11235_v26  ;;  %vm367_vm10 = vcmp.eq.s32.totalorder %v8113_v62, %v7992_v46  ;;  %v8129_v0 = vpop.permute.xlu1 %206  ;;  %v8131_v1 = vpop.permute.xlu0 %203 }
  0xb2   :  { %1828 = vmatpush2.bf16.msra.mxu1 %v7337_v57  ;;  %6336 = vmatprep.mubr.msk.bf16.mxu0 %vm6335_vm13, %v11235_v26  ;;  %vm6451_vm13 = vmpackc.low %vm371_vm11, %vm367_vm10  ;;  %vm404_vm10 = vcmp.eq.s32.totalorder %v7876_v17, %v8131_v1  ;;  %vm408_vm11 = vcmp.eq.s32.totalorder %v7876_v17, %v8129_v0 }
  0xb3   :  { %1829 = vmatprep.subr.bf16.mxu1 %v11237_v2  ;;  %vm6345_vm14 = vmpackc.low %vm408_vm11, %vm404_vm10  ;;  %vm382_vm11 = vcmp.eq.s32.totalorder %v8143_v4, %v8033_v52 }
  0xb5   :  { %6446 = vmatmul.mubr.msk.bf16.gmra.mxu1 %vm6445_vm0, %v11235_v26  ;;  %vm405_vm0 = vcmp.eq.s32.totalorder %v7889_v22, %v8131_v1  ;;  %v8160_v5 = vpop.permute.xlu1 %212  ;;  %v8162_v6 = vpop.permute.xlu0 %209 }
  0xb6   :  { %6448 = vmatprep.mubr.msk.bf16.mxu1 %vm6447_vm1, %v11235_v26  ;;  %1830 = vmatpush2.bf16.msra.mxu1 %v7338_v58  ;;  %vm409_vm1 = vcmp.eq.s32.totalorder %v7889_v22, %v8129_v0 }
  0xb7   :  { %1831 = vmatprep.subr.bf16.mxu1 %v11237_v2  ;;  %vm6343_vm5 = vmpackc.low %vm409_vm1, %vm405_vm0  ;;  %vm378_vm0 = vcmp.eq.s32.totalorder %v8143_v4, %v8008_v48 }
  0xb9   :  { %6338 = vmatmul.mubr.msk.bf16.gmra.mxu0 %vm6337_vm6, %v11235_v26  ;;  %vm375_vm6 = vcmp.eq.s32.totalorder %v8113_v62, %v8010_v49  ;;  %v8185_v7 = vpop.permute.xlu1 %218  ;;  %v8187_v8 = vpop.permute.xlu0 %215 }
  0xba   :  { %1832 = vmatpush2.bf16.msra.mxu1 %v7339_v61  ;;  %6340 = vmatprep.mubr.msk.bf16.mxu0 %vm6339_vm9, %v11235_v26  ;;  %vm6455_vm9 = vmpackc.low %vm379_vm7, %vm375_vm6  ;;  %vm412_vm6 = vcmp.eq.s32.totalorder %v7876_v17, %v8162_v6  ;;  %vm416_vm7 = vcmp.eq.s32.totalorder %v7876_v17, %v8160_v5 }
  0xbb   :  { %1833 = vmatprep.subr.bf16.mxu1 %v11237_v2  ;;  %vm6349_vm10 = vmpackc.low %vm416_vm7, %vm412_vm6  ;;  %vm390_vm7 = vcmp.eq.s32.totalorder %v8143_v4, %v8064_v56 }
  0xbd   :  { %6450 = vmatmul.mubr.msk.bf16.gmra.mxu1 %vm6449_vm12, %v11235_v26  ;;  %vm413_vm12 = vcmp.eq.s32.totalorder %v7889_v22, %v8162_v6  ;;  %v8209_v9 = vpop.permute.xlu1 %224  ;;  %v8211_v10 = vpop.permute.xlu0 %221 }
  0xbe   :  { %1834 = vmatpush2.bf16.msra.mxu1 %v7340_v63  ;;  %6452 = vmatprep.mubr.msk.bf16.mxu1 %vm6451_vm13, %v11235_v26  ;;  %vm417_vm13 = vcmp.eq.s32.totalorder %v7889_v22, %v8160_v5 }
  0xbf   :  { %1835 = vmatprep.subr.bf16.mxu1 %v11237_v2  ;;  %vm6347_vm1 = vmpackc.low %vm417_vm13, %vm413_vm12  ;;  %vm386_vm12 = vcmp.eq.s32.totalorder %v8143_v4, %v8031_v51 }
  0xc1   :  { %6342 = vmatmul.mubr.msk.bf16.gmra.mxu0 %vm6341_vm4, %v11235_v26  ;;  %vm6457_vm4 = vmpackc.low %vm378_vm0, %vm374_vm15  ;;  %vm395_vm15 = vcmp.eq.s32.totalorder %v8113_v62, %v8062_v55  ;;  %v8233_v11 = vpop.permute.xlu1 %230  ;;  %v8235_v12 = vpop.permute.xlu0 %227 }
  0xc2   :  { %1836 = vmatpush2.bf16.msra.mxu1 %v7341_v3  ;;  %6344 = vmatprep.mubr.msk.bf16.mxu0 %vm6343_vm5, %v11235_v26  ;;  %vm6459_vm5 = vmpackc.low %vm387_vm3, %vm383_vm2  ;;  %vm420_vm2 = vcmp.eq.s32.totalorder %v7876_v17, %v8187_v8  ;;  %vm424_vm3 = vcmp.eq.s32.totalorder %v7876_v17, %v8185_v7 }
  0xc3   :  { %3456 = vmatprep.subr.bf16.mxu1 %v11237_v2  ;;  %vm6461_vm0 = vmpackc.low %vm386_vm12, %vm382_vm11  ;;  %vm403_vm11 = vcmp.eq.s32.totalorder %v8113_v62, %v8094_v59 }
  0xc4   :  { %vm6353_vm6 = vmpackc.low %vm424_vm3, %vm420_vm2  ;;  %vm398_vm3 = vcmp.eq.s32.totalorder %v8143_v4, %v8096_v60 }
  0xc5   :  { %6454 = vmatmul.mubr.msk.bf16.vlgmr.msra.gmra.mxu1 %vm6453_vm8, %v11235_v26  ;;  %vm421_vm8 = vcmp.eq.s32.totalorder %v7889_v22, %v8187_v8  ;;  %v8257_v13 = vpop.permute.xlu1 %236  ;;  %v8259_v15 = vpop.permute.xlu0 %233 }
  0xc6   :  { %6456 = vmatprep.mubr.msk.bf16.mxu1 %vm6455_vm9, %v11235_v26  ;;  %vm425_vm9 = vcmp.eq.s32.totalorder %v7889_v22, %v8185_v7 }
  0xc7   :  { %vm6351_vm13 = vmpackc.low %vm425_vm9, %vm421_vm8  ;;  %vm394_vm8 = vcmp.eq.s32.totalorder %v8143_v4, %v8062_v55 }
  0xc8   :  { %vm6465_vm12 = vmpackc.low %vm394_vm8, %vm390_vm7  ;;  %vm411_vm7 = vcmp.eq.s32.totalorder %v8113_v62, %v8129_v0 }
  0xc9   :  { %6346 = vmatmul.mubr.msk.bf16.gmra.mxu0 %vm6345_vm14, %v11235_v26  ;;  %vm391_vm14 = vcmp.eq.s32.totalorder %v8113_v62, %v8064_v56  ;;  %v8281_v16 = vpop.permute.xlu1 %242  ;;  %v8283_v18 = vpop.permute.xlu0 %239 }
  0xca   :  { %6348 = vmatprep.mubr.msk.bf16.mxu0 %vm6347_vm1, %v11235_v26  ;;  %vm6463_vm1 = vmpackc.low %vm395_vm15, %vm391_vm14  ;;  %vm428_vm14 = vcmp.eq.s32.totalorder %v7876_v17, %v8211_v10  ;;  %vm432_vm15 = vcmp.eq.s32.totalorder %v7876_v17, %v8209_v9 }
  0xcb   :  { %vm6357_vm2 = vmpackc.low %vm432_vm15, %vm428_vm14  ;;  %vm406_vm15 = vcmp.eq.s32.totalorder %v8143_v4, %v8131_v1 }
  0xcd   :  { %6458 = vmatmul.mubr.msk.bf16.gmra.mxu1 %vm6457_vm4, %v11235_v26  ;;  %vm429_vm4 = vcmp.eq.s32.totalorder %v7889_v22, %v8211_v10  ;;  %v8305_v19 = vpop.permute.xlu1 %248  ;;  %v8307_v25 = vpop.permute.xlu0 %245 }
  0xce   :  { %6460 = vmatprep.mubr.msk.bf16.mxu1 %vm6459_vm5, %v11235_v26  ;;  %vm433_vm5 = vcmp.eq.s32.totalorder %v7889_v22, %v8209_v9 }
  0xcf   :  { %vm6355_vm9 = vmpackc.low %vm433_vm5, %vm429_vm4  ;;  %vm402_vm4 = vcmp.eq.s32.totalorder %v8143_v4, %v8094_v59 }
  0xd0   :  { %vm6469_vm8 = vmpackc.low %vm402_vm4, %vm398_vm3  ;;  %vm419_vm3 = vcmp.eq.s32.totalorder %v8113_v62, %v8160_v5 }
  0xd1   :  { %6350 = vmatmul.mubr.msk.bf16.gmra.mxu0 %vm6349_vm10, %v11235_v26  ;;  %vm399_vm10 = vcmp.eq.s32.totalorder %v8113_v62, %v8096_v60  ;;  %v8329_v29 = vpop.permute.xlu1 %254  ;;  %v8331_v32 = vpop.permute.xlu0 %251 }
  0xd2   :  { %6352 = vmatprep.mubr.msk.bf16.mxu0 %vm6351_vm13, %v11235_v26  ;;  %vm6467_vm13 = vmpackc.low %vm403_vm11, %vm399_vm10  ;;  %vm436_vm10 = vcmp.eq.s32.totalorder %v7876_v17, %v8235_v12  ;;  %vm440_vm11 = vcmp.eq.s32.totalorder %v7876_v17, %v8233_v11 }
  0xd3   :  { %vm6361_vm14 = vmpackc.low %vm440_vm11, %vm436_vm10  ;;  %vm414_vm11 = vcmp.eq.s32.totalorder %v8143_v4, %v8162_v6 }
  0xd5   :  { %6462 = vmatmul.mubr.msk.bf16.gmra.mxu1 %vm6461_vm0, %v11235_v26  ;;  %vm437_vm0 = vcmp.eq.s32.totalorder %v7889_v22, %v8235_v12  ;;  %v8353_v35 = vpop.permute.xlu1 %260  ;;  %v8355_v38 = vpop.permute.xlu0 %257 }
  0xd6   :  { %6464 = vmatprep.mubr.msk.bf16.mxu1 %vm6463_vm1, %v11235_v26  ;;  %vm441_vm1 = vcmp.eq.s32.totalorder %v7889_v22, %v8233_v11 }
  0xd7   :  { %vm6359_vm5 = vmpackc.low %vm441_vm1, %vm437_vm0  ;;  %vm410_vm0 = vcmp.eq.s32.totalorder %v8143_v4, %v8129_v0 }
  0xd8   :  { %vm6473_vm4 = vmpackc.low %vm410_vm0, %vm406_vm15  ;;  %vm427_vm15 = vcmp.eq.s32.totalorder %v8113_v62, %v8185_v7 }
  0xd9   :  { %6354 = vmatmul.mubr.msk.bf16.gmra.mxu0 %vm6353_vm6, %v11235_v26  ;;  %vm407_vm6 = vcmp.eq.s32.totalorder %v8113_v62, %v8131_v1  ;;  %v8377_v41 = vpop.permute.xlu1 %266  ;;  %v8379_v44 = vpop.permute.xlu0 %263 }
  0xda   :  { %6356 = vmatprep.mubr.msk.bf16.mxu0 %vm6355_vm9, %v11235_v26  ;;  %vm6471_vm9 = vmpackc.low %vm411_vm7, %vm407_vm6  ;;  %vm444_vm6 = vcmp.eq.s32.totalorder %v7876_v17, %v8259_v15  ;;  %vm448_vm7 = vcmp.eq.s32.totalorder %v7876_v17, %v8257_v13 }
  0xdb   :  { %vm6365_vm10 = vmpackc.low %vm448_vm7, %vm444_vm6  ;;  %vm422_vm7 = vcmp.eq.s32.totalorder %v8143_v4, %v8187_v8 }
  0xdd   :  { %6466 = vmatmul.mubr.msk.bf16.gmra.mxu1 %vm6465_vm12, %v11235_v26  ;;  %vm445_vm12 = vcmp.eq.s32.totalorder %v7889_v22, %v8259_v15  ;;  %v8401_v45 = vpop.permute.xlu1 %272  ;;  %v8403_v46 = vpop.permute.xlu0 %269 }
  0xde   :  { %6468 = vmatprep.mubr.msk.bf16.mxu1 %vm6467_vm13, %v11235_v26  ;;  %vm449_vm13 = vcmp.eq.s32.totalorder %v7889_v22, %v8257_v13 }
  0xdf   :  { %vm6363_vm1 = vmpackc.low %vm449_vm13, %vm445_vm12  ;;  %vm418_vm12 = vcmp.eq.s32.totalorder %v8143_v4, %v8160_v5 }
  0xe0   :  { %vm6477_vm0 = vmpackc.low %vm418_vm12, %vm414_vm11  ;;  %vm435_vm11 = vcmp.eq.s32.totalorder %v8113_v62, %v8209_v9 }
  0xe1   :  { %6358 = vmatmul.mubr.msk.bf16.gmra.mxu0 %vm6357_vm2, %v11235_v26  ;;  %vm415_vm2 = vcmp.eq.s32.totalorder %v8113_v62, %v8162_v6  ;;  %v8425_v47 = vpop.permute.xlu1 %278  ;;  %v8427_v48 = vpop.permute.xlu0 %275 }
  0xe2   :  { %6360 = vmatprep.mubr.msk.bf16.mxu0 %vm6359_vm5, %v11235_v26  ;;  %vm6475_vm5 = vmpackc.low %vm419_vm3, %vm415_vm2  ;;  %vm452_vm2 = vcmp.eq.s32.totalorder %v7876_v17, %v8283_v18  ;;  %vm456_vm3 = vcmp.eq.s32.totalorder %v7876_v17, %v8281_v16 }
  0xe3   :  { %vm6369_vm6 = vmpackc.low %vm456_vm3, %vm452_vm2  ;;  %vm430_vm3 = vcmp.eq.s32.totalorder %v8143_v4, %v8211_v10 }
  0xe5   :  { %6470 = vmatmul.mubr.msk.bf16.gmra.mxu1 %vm6469_vm8, %v11235_v26  ;;  %vm453_vm8 = vcmp.eq.s32.totalorder %v7889_v22, %v8283_v18  ;;  %v8449_v49 = vpop.permute.xlu1 %284  ;;  %v8451_v50 = vpop.permute.xlu0 %281 }
  0xe6   :  { %6472 = vmatprep.mubr.msk.bf16.mxu1 %vm6471_vm9, %v11235_v26  ;;  %vm457_vm9 = vcmp.eq.s32.totalorder %v7889_v22, %v8281_v16 }
  0xe7   :  { %vm6367_vm13 = vmpackc.low %vm457_vm9, %vm453_vm8  ;;  %vm426_vm8 = vcmp.eq.s32.totalorder %v8143_v4, %v8185_v7 }
  0xe8   :  { %vm6481_vm12 = vmpackc.low %vm426_vm8, %vm422_vm7  ;;  %vm443_vm7 = vcmp.eq.s32.totalorder %v8113_v62, %v8233_v11 }
  0xe9   :  { %6362 = vmatmul.mubr.msk.bf16.gmra.mxu0 %vm6361_vm14, %v11235_v26  ;;  %vm423_vm14 = vcmp.eq.s32.totalorder %v8113_v62, %v8187_v8  ;;  %v8473_v51 = vpop.permute.xlu1 %290  ;;  %v8475_v52 = vpop.permute.xlu0 %287 }
  0xea   :  { %6364 = vmatprep.mubr.msk.bf16.mxu0 %vm6363_vm1, %v11235_v26  ;;  %vm6479_vm1 = vmpackc.low %vm427_vm15, %vm423_vm14  ;;  %vm460_vm14 = vcmp.eq.s32.totalorder %v7876_v17, %v8307_v25  ;;  %vm464_vm15 = vcmp.eq.s32.totalorder %v7876_v17, %v8305_v19 }
  0xeb   :  { %vm6373_vm2 = vmpackc.low %vm464_vm15, %vm460_vm14  ;;  %vm438_vm15 = vcmp.eq.s32.totalorder %v8143_v4, %v8235_v12 }
  0xed   :  { %6474 = vmatmul.mubr.msk.bf16.gmra.mxu1 %vm6473_vm4, %v11235_v26  ;;  %vm461_vm4 = vcmp.eq.s32.totalorder %v7889_v22, %v8307_v25  ;;  %v8497_v53 = vpop.permute.xlu1 %296  ;;  %v8499_v54 = vpop.permute.xlu0 %293 }
  0xee   :  { %6476 = vmatprep.mubr.msk.bf16.mxu1 %vm6475_vm5, %v11235_v26  ;;  %vm465_vm5 = vcmp.eq.s32.totalorder %v7889_v22, %v8305_v19 }
  0xef   :  { %vm6371_vm9 = vmpackc.low %vm465_vm5, %vm461_vm4  ;;  %vm434_vm4 = vcmp.eq.s32.totalorder %v8143_v4, %v8209_v9 }
  0xf0   :  { %vm6485_vm8 = vmpackc.low %vm434_vm4, %vm430_vm3  ;;  %vm451_vm3 = vcmp.eq.s32.totalorder %v8113_v62, %v8257_v13 }
  0xf1   :  { %6366 = vmatmul.mubr.msk.bf16.gmra.mxu0 %vm6365_vm10, %v11235_v26  ;;  %vm431_vm10 = vcmp.eq.s32.totalorder %v8113_v62, %v8211_v10  ;;  %v8521_v55 = vpop.permute.xlu1 %302  ;;  %v8523_v56 = vpop.permute.xlu0 %299 }
  0xf2   :  { %6368 = vmatprep.mubr.msk.bf16.mxu0 %vm6367_vm13, %v11235_v26  ;;  %vm6483_vm13 = vmpackc.low %vm435_vm11, %vm431_vm10  ;;  %vm468_vm10 = vcmp.eq.s32.totalorder %v7876_v17, %v8331_v32  ;;  %vm472_vm11 = vcmp.eq.s32.totalorder %v7876_v17, %v8329_v29 }
  0xf3   :  { %vm6377_vm14 = vmpackc.low %vm472_vm11, %vm468_vm10  ;;  %vm446_vm11 = vcmp.eq.s32.totalorder %v8143_v4, %v8259_v15 }
  0xf5   :  { %6478 = vmatmul.mubr.msk.bf16.gmra.mxu1 %vm6477_vm0, %v11235_v26  ;;  %vm469_vm0 = vcmp.eq.s32.totalorder %v7889_v22, %v8331_v32  ;;  %v8545_v57 = vpop.permute.xlu1 %308  ;;  %v8547_v58 = vpop.permute.xlu0 %305 }
  0xf6   :  { %6480 = vmatprep.mubr.msk.bf16.mxu1 %vm6479_vm1, %v11235_v26  ;;  %vm473_vm1 = vcmp.eq.s32.totalorder %v7889_v22, %v8329_v29 }
  0xf7   :  { %vm6375_vm5 = vmpackc.low %vm473_vm1, %vm469_vm0  ;;  %vm442_vm0 = vcmp.eq.s32.totalorder %v8143_v4, %v8233_v11 }
  0xf8   :  { %vm6489_vm4 = vmpackc.low %vm442_vm0, %vm438_vm15  ;;  %vm459_vm15 = vcmp.eq.s32.totalorder %v8113_v62, %v8281_v16 }
  0xf9   :  { %6370 = vmatmul.mubr.msk.bf16.gmra.mxu0 %vm6369_vm6, %v11235_v26  ;;  %vm439_vm6 = vcmp.eq.s32.totalorder %v8113_v62, %v8235_v12  ;;  %v8573_v0 = vpop.permute.xlu1 %314  ;;  %v8575_v1 = vpop.permute.xlu0 %311 }
  0xfa   :  { %6372 = vmatprep.mubr.msk.bf16.mxu0 %vm6371_vm9, %v11235_v26  ;;  %vm6487_vm9 = vmpackc.low %vm443_vm7, %vm439_vm6  ;;  %vm476_vm6 = vcmp.eq.s32.totalorder %v7876_v17, %v8355_v38  ;;  %vm480_vm7 = vcmp.eq.s32.totalorder %v7876_v17, %v8353_v35 }
  0xfb   :  { %vm6381_vm10 = vmpackc.low %vm480_vm7, %vm476_vm6  ;;  %vm454_vm7 = vcmp.eq.s32.totalorder %v8143_v4, %v8283_v18 }
  0xfd   :  { %6482 = vmatmul.mubr.msk.bf16.gmra.mxu1 %vm6481_vm12, %v11235_v26  ;;  %vm477_vm12 = vcmp.eq.s32.totalorder %v7889_v22, %v8355_v38 }
  0xfe   :  { %6484 = vmatprep.mubr.msk.bf16.mxu1 %vm6483_vm13, %v11235_v26  ;;  %vm481_vm13 = vcmp.eq.s32.totalorder %v7889_v22, %v8353_v35 }
  0xff   :  { %vm6379_vm1 = vmpackc.low %vm481_vm13, %vm477_vm12  ;;  %vm450_vm12 = vcmp.eq.s32.totalorder %v8143_v4, %v8257_v13 }
 0x100   :  { %vm6493_vm0 = vmpackc.low %vm450_vm12, %vm446_vm11  ;;  %vm467_vm11 = vcmp.eq.s32.totalorder %v8113_v62, %v8305_v19 }
 0x101   :  { %6374 = vmatmul.mubr.msk.bf16.gmra.mxu0 %vm6373_vm2, %v11235_v26  ;;  %vm447_vm2 = vcmp.eq.s32.totalorder %v8113_v62, %v8259_v15 }
 0x102   :  { %6376 = vmatprep.mubr.msk.bf16.mxu0 %vm6375_vm5, %v11235_v26  ;;  %vm6491_vm5 = vmpackc.low %vm451_vm3, %vm447_vm2  ;;  %vm484_vm2 = vcmp.eq.s32.totalorder %v7876_v17, %v8379_v44  ;;  %vm488_vm3 = vcmp.eq.s32.totalorder %v7876_v17, %v8377_v41 }
 0x103   :  { %vm6385_vm6 = vmpackc.low %vm488_vm3, %vm484_vm2  ;;  %vm462_vm3 = vcmp.eq.s32.totalorder %v8143_v4, %v8307_v25 }
 0x105   :  { %6486 = vmatmul.mubr.msk.bf16.gmra.mxu1 %vm6485_vm8, %v11235_v26  ;;  %vm485_vm8 = vcmp.eq.s32.totalorder %v7889_v22, %v8379_v44 }
 0x106   :  { %6488 = vmatprep.mubr.msk.bf16.mxu1 %vm6487_vm9, %v11235_v26  ;;  %vm489_vm9 = vcmp.eq.s32.totalorder %v7889_v22, %v8377_v41 }
 0x107   :  { %vm6383_vm13 = vmpackc.low %vm489_vm9, %vm485_vm8  ;;  %vm458_vm8 = vcmp.eq.s32.totalorder %v8143_v4, %v8281_v16 }
 0x108   :  { %vm6497_vm12 = vmpackc.low %vm458_vm8, %vm454_vm7  ;;  %vm475_vm7 = vcmp.eq.s32.totalorder %v8113_v62, %v8329_v29 }
 0x109   :  { %6378 = vmatmul.mubr.msk.bf16.gmra.mxu0 %vm6377_vm14, %v11235_v26  ;;  %vm455_vm14 = vcmp.eq.s32.totalorder %v8113_v62, %v8283_v18 }
 0x10a   :  { %6380 = vmatprep.mubr.msk.bf16.mxu0 %vm6379_vm1, %v11235_v26  ;;  %vm6495_vm1 = vmpackc.low %vm459_vm15, %vm455_vm14  ;;  %vm492_vm14 = vcmp.eq.s32.totalorder %v7876_v17, %v8403_v46  ;;  %vm496_vm15 = vcmp.eq.s32.totalorder %v7876_v17, %v8401_v45 }
 0x10b   :  { %vm6389_vm2 = vmpackc.low %vm496_vm15, %vm492_vm14  ;;  %vm470_vm15 = vcmp.eq.s32.totalorder %v8143_v4, %v8331_v32 }
 0x10d   :  { %6490 = vmatmul.mubr.msk.bf16.gmra.mxu1 %vm6489_vm4, %v11235_v26  ;;  %vm493_vm4 = vcmp.eq.s32.totalorder %v7889_v22, %v8403_v46 }
 0x10e   :  { %6492 = vmatprep.mubr.msk.bf16.mxu1 %vm6491_vm5, %v11235_v26  ;;  %vm497_vm5 = vcmp.eq.s32.totalorder %v7889_v22, %v8401_v45 }
 0x10f   :  { %vm6387_vm9 = vmpackc.low %vm497_vm5, %vm493_vm4  ;;  %vm466_vm4 = vcmp.eq.s32.totalorder %v8143_v4, %v8305_v19 }
 0x110   :  { %vm6501_vm8 = vmpackc.low %vm466_vm4, %vm462_vm3  ;;  %vm483_vm3 = vcmp.eq.s32.totalorder %v8113_v62, %v8353_v35 }
 0x111   :  { %6382 = vmatmul.mubr.msk.bf16.gmra.mxu0 %vm6381_vm10, %v11235_v26  ;;  %vm463_vm10 = vcmp.eq.s32.totalorder %v8113_v62, %v8307_v25 }
 0x112   :  { %6384 = vmatprep.mubr.msk.bf16.mxu0 %vm6383_vm13, %v11235_v26  ;;  %vm6499_vm13 = vmpackc.low %vm467_vm11, %vm463_vm10  ;;  %vm500_vm10 = vcmp.eq.s32.totalorder %v7876_v17, %v8427_v48  ;;  %vm504_vm11 = vcmp.eq.s32.totalorder %v7876_v17, %v8425_v47 }
 0x113   :  { %vm6393_vm14 = vmpackc.low %vm504_vm11, %vm500_vm10  ;;  %vm478_vm11 = vcmp.eq.s32.totalorder %v8143_v4, %v8355_v38 }
 0x115   :  { %6494 = vmatmul.mubr.msk.bf16.gmra.mxu1 %vm6493_vm0, %v11235_v26  ;;  %vm501_vm0 = vcmp.eq.s32.totalorder %v7889_v22, %v8427_v48 }
 0x116   :  { %6496 = vmatprep.mubr.msk.bf16.mxu1 %vm6495_vm1, %v11235_v26  ;;  %vm505_vm1 = vcmp.eq.s32.totalorder %v7889_v22, %v8425_v47 }
 0x117   :  { %vm6391_vm5 = vmpackc.low %vm505_vm1, %vm501_vm0  ;;  %vm474_vm0 = vcmp.eq.s32.totalorder %v8143_v4, %v8329_v29 }
 0x118   :  { %vm6505_vm4 = vmpackc.low %vm474_vm0, %vm470_vm15  ;;  %vm491_vm15 = vcmp.eq.s32.totalorder %v8113_v62, %v8377_v41 }
 0x119   :  { %6386 = vmatmul.mubr.msk.bf16.gmra.mxu0 %vm6385_vm6, %v11235_v26  ;;  %vm471_vm6 = vcmp.eq.s32.totalorder %v8113_v62, %v8331_v32 }
 0x11a   :  { %6388 = vmatprep.mubr.msk.bf16.mxu0 %vm6387_vm9, %v11235_v26  ;;  %vm6503_vm9 = vmpackc.low %vm475_vm7, %vm471_vm6  ;;  %vm508_vm6 = vcmp.eq.s32.totalorder %v7876_v17, %v8451_v50  ;;  %vm512_vm7 = vcmp.eq.s32.totalorder %v7876_v17, %v8449_v49 }
 0x11b   :  { %vm6397_vm10 = vmpackc.low %vm512_vm7, %vm508_vm6  ;;  %vm486_vm7 = vcmp.eq.s32.totalorder %v8143_v4, %v8379_v44 }
 0x11d   :  { %6498 = vmatmul.mubr.msk.bf16.gmra.mxu1 %vm6497_vm12, %v11235_v26  ;;  %vm509_vm12 = vcmp.eq.s32.totalorder %v7889_v22, %v8451_v50 }
 0x11e   :  { %6500 = vmatprep.mubr.msk.bf16.mxu1 %vm6499_vm13, %v11235_v26  ;;  %vm513_vm13 = vcmp.eq.s32.totalorder %v7889_v22, %v8449_v49 }
 0x11f   :  { %vm6395_vm1 = vmpackc.low %vm513_vm13, %vm509_vm12  ;;  %vm482_vm12 = vcmp.eq.s32.totalorder %v8143_v4, %v8353_v35 }
 0x120   :  { %vm6509_vm0 = vmpackc.low %vm482_vm12, %vm478_vm11  ;;  %vm499_vm11 = vcmp.eq.s32.totalorder %v8113_v62, %v8401_v45 }
 0x121   :  { %6390 = vmatmul.mubr.msk.bf16.gmra.mxu0 %vm6389_vm2, %v11235_v26  ;;  %vm479_vm2 = vcmp.eq.s32.totalorder %v8113_v62, %v8355_v38 }
 0x122   :  { %6392 = vmatprep.mubr.msk.bf16.mxu0 %vm6391_vm5, %v11235_v26  ;;  %vm6507_vm5 = vmpackc.low %vm483_vm3, %vm479_vm2  ;;  %vm516_vm2 = vcmp.eq.s32.totalorder %v7876_v17, %v8475_v52  ;;  %vm520_vm3 = vcmp.eq.s32.totalorder %v7876_v17, %v8473_v51 }
 0x123   :  { %vm6401_vm6 = vmpackc.low %vm520_vm3, %vm516_vm2  ;;  %vm494_vm3 = vcmp.eq.s32.totalorder %v8143_v4, %v8403_v46 }
 0x125   :  { %6502 = vmatmul.mubr.msk.bf16.gmra.mxu1 %vm6501_vm8, %v11235_v26  ;;  %vm517_vm8 = vcmp.eq.s32.totalorder %v7889_v22, %v8475_v52 }
 0x126   :  { %6504 = vmatprep.mubr.msk.bf16.mxu1 %vm6503_vm9, %v11235_v26  ;;  %vm521_vm9 = vcmp.eq.s32.totalorder %v7889_v22, %v8473_v51 }
 0x127   :  { %vm6399_vm13 = vmpackc.low %vm521_vm9, %vm517_vm8  ;;  %vm490_vm8 = vcmp.eq.s32.totalorder %v8143_v4, %v8377_v41 }
 0x128   :  { %vm6513_vm12 = vmpackc.low %vm490_vm8, %vm486_vm7  ;;  %vm507_vm7 = vcmp.eq.s32.totalorder %v8113_v62, %v8425_v47 }
 0x129   :  { %6394 = vmatmul.mubr.msk.bf16.gmra.mxu0 %vm6393_vm14, %v11235_v26  ;;  %vm487_vm14 = vcmp.eq.s32.totalorder %v8113_v62, %v8379_v44 }
 0x12a   :  { %6396 = vmatprep.mubr.msk.bf16.mxu0 %vm6395_vm1, %v11235_v26  ;;  %vm6511_vm1 = vmpackc.low %vm491_vm15, %vm487_vm14  ;;  %vm524_vm14 = vcmp.eq.s32.totalorder %v7876_v17, %v8499_v54  ;;  %vm528_vm15 = vcmp.eq.s32.totalorder %v7876_v17, %v8497_v53 }
 0x12b   :  { %vm6405_vm2 = vmpackc.low %vm528_vm15, %vm524_vm14  ;;  %vm502_vm15 = vcmp.eq.s32.totalorder %v8143_v4, %v8427_v48 }
 0x12d   :  { %6506 = vmatmul.mubr.msk.bf16.gmra.mxu1 %vm6505_vm4, %v11235_v26  ;;  %vm525_vm4 = vcmp.eq.s32.totalorder %v7889_v22, %v8499_v54 }
 0x12e   :  { %6508 = vmatprep.mubr.msk.bf16.mxu1 %vm6507_vm5, %v11235_v26  ;;  %vm529_vm5 = vcmp.eq.s32.totalorder %v7889_v22, %v8497_v53 }
 0x12f   :  { %vm6403_vm9 = vmpackc.low %vm529_vm5, %vm525_vm4  ;;  %vm498_vm4 = vcmp.eq.s32.totalorder %v8143_v4, %v8401_v45 }
 0x130   :  { %vm6517_vm8 = vmpackc.low %vm498_vm4, %vm494_vm3  ;;  %vm515_vm3 = vcmp.eq.s32.totalorder %v8113_v62, %v8449_v49 }
 0x131   :  { %6398 = vmatmul.mubr.msk.bf16.gmra.mxu0 %vm6397_vm10, %v11235_v26  ;;  %vm495_vm10 = vcmp.eq.s32.totalorder %v8113_v62, %v8403_v46 }
 0x132   :  { %6400 = vmatprep.mubr.msk.bf16.mxu0 %vm6399_vm13, %v11235_v26  ;;  %vm6515_vm13 = vmpackc.low %vm499_vm11, %vm495_vm10  ;;  %vm532_vm10 = vcmp.eq.s32.totalorder %v7876_v17, %v8523_v56  ;;  %vm536_vm11 = vcmp.eq.s32.totalorder %v7876_v17, %v8521_v55 }
 0x133   :  { %vm6409_vm14 = vmpackc.low %vm536_vm11, %vm532_vm10  ;;  %vm510_vm11 = vcmp.eq.s32.totalorder %v8143_v4, %v8451_v50 }
 0x135   :  { %6510 = vmatmul.mubr.msk.bf16.gmra.mxu1 %vm6509_vm0, %v11235_v26  ;;  %vm533_vm0 = vcmp.eq.s32.totalorder %v7889_v22, %v8523_v56 }
 0x136   :  { %6512 = vmatprep.mubr.msk.bf16.mxu1 %vm6511_vm1, %v11235_v26  ;;  %vm537_vm1 = vcmp.eq.s32.totalorder %v7889_v22, %v8521_v55 }
 0x137   :  { %vm6407_vm5 = vmpackc.low %vm537_vm1, %vm533_vm0  ;;  %vm506_vm0 = vcmp.eq.s32.totalorder %v8143_v4, %v8425_v47 }
 0x138   :  { %vm6521_vm4 = vmpackc.low %vm506_vm0, %vm502_vm15  ;;  %vm523_vm15 = vcmp.eq.s32.totalorder %v8113_v62, %v8473_v51 }
 0x139   :  { %6402 = vmatmul.mubr.msk.bf16.gmra.mxu0 %vm6401_vm6, %v11235_v26  ;;  %vm503_vm6 = vcmp.eq.s32.totalorder %v8113_v62, %v8427_v48 }
 0x13a   :  { %6404 = vmatprep.mubr.msk.bf16.mxu0 %vm6403_vm9, %v11235_v26  ;;  %vm6519_vm9 = vmpackc.low %vm507_vm7, %vm503_vm6  ;;  %vm540_vm6 = vcmp.eq.s32.totalorder %v7876_v17, %v8547_v58  ;;  %vm544_vm7 = vcmp.eq.s32.totalorder %v7876_v17, %v8545_v57 }
 0x13b   :  { %vm6413_vm10 = vmpackc.low %vm544_vm7, %vm540_vm6  ;;  %vm522_vm6 = vcmp.eq.s32.totalorder %v8143_v4, %v8473_v51  ;;  %vm527_vm7 = vcmp.eq.s32.totalorder %v8113_v62, %v8499_v54 }
 0x13d   :  { %6514 = vmatmul.mubr.msk.bf16.gmra.mxu1 %vm6513_vm12, %v11235_v26  ;;  %vm541_vm12 = vcmp.eq.s32.totalorder %v7889_v22, %v8547_v58 }
 0x13e   :  { %6516 = vmatprep.mubr.msk.bf16.mxu1 %vm6515_vm13, %v11235_v26  ;;  %vm545_vm13 = vcmp.eq.s32.totalorder %v7889_v22, %v8545_v57 }
 0x13f   :  { %vm6411_vm1 = vmpackc.low %vm545_vm13, %vm541_vm12  ;;  %vm514_vm12 = vcmp.eq.s32.totalorder %v8143_v4, %v8449_v49 }
 0x140   :  { %vm6525_vm0 = vmpackc.low %vm514_vm12, %vm510_vm11  ;;  %vm526_vm11 = vcmp.eq.s32.totalorder %v8143_v4, %v8499_v54  ;;  %vm530_vm12 = vcmp.eq.s32.totalorder %v8143_v4, %v8497_v53 }
 0x141   :  { %6406 = vmatmul.mubr.msk.bf16.gmra.mxu0 %vm6405_vm2, %v11235_v26  ;;  %vm511_vm2 = vcmp.eq.s32.totalorder %v8113_v62, %v8451_v50 }
 0x142   :  { %6408 = vmatprep.mubr.msk.bf16.mxu0 %vm6407_vm5, %v11235_v26  ;;  %vm6523_vm5 = vmpackc.low %vm515_vm3, %vm511_vm2  ;;  %vm548_vm2 = vcmp.eq.s32.totalorder %v7876_v17, %v8575_v1  ;;  %vm552_vm3 = vcmp.eq.s32.totalorder %v7876_v17, %v8573_v0 }
 0x145   :  { %v8549_v59 = vpop.f32.mrf.mxu1  ;;  %6518 = vmatmul.mubr.msk.bf16.gmra.mxu1 %vm6517_vm8, %v11235_v26  ;;  %vm549_vm8 = vcmp.eq.s32.totalorder %v7889_v22, %v8575_v1 }
 0x146   :  { %6520 = vmatprep.mubr.msk.bf16.mxu1 %vm6519_vm9, %v11235_v26  ;;  %vm553_vm9 = vcmp.eq.s32.totalorder %v7889_v22, %v8573_v0 }
 0x147   :  { %v1744_v60 = vpop.f32.mrf.mxu1  ;;  %vm6415_vm13 = vmpackc.low %vm553_vm9, %vm549_vm8  ;;  %vm531_vm8 = vcmp.eq.s32.totalorder %v8113_v62, %v8497_v53 }
 0x149   :  { %v8561_v61 = vpop.f32.mrf.mxu1  ;;  %6410 = vmatmul.mubr.msk.bf16.gmra.mxu0 %vm6409_vm14, %v11235_v26  ;;  %vm519_vm14 = vcmp.eq.s32.totalorder %v8113_v62, %v8475_v52 }
 0x14a   :  { %6412 = vmatprep.mubr.msk.bf16.mxu0 %vm6411_vm1, %v11235_v26  ;;  %vm6527_vm1 = vmpackc.low %vm523_vm15, %vm519_vm14  ;;  %vm539_vm14 = vcmp.eq.s32.totalorder %v8113_v62, %v8521_v55 }
 0x14b   :  { %v1747_v63 = vpop.f32.mrf.mxu1  ;;  %vm6533_vm15 = vmpackc.low %vm530_vm12, %vm526_vm11 }
 0x14d   :  { %v8577_v3 = vpop.f32.mrf.mxu1  ;;  %6522 = vmatmul.mubr.msk.bf16.gmra.mxu1 %vm6521_vm4, %v11235_v26  ;;  %vm6417_vm4 = vmpackc.low %vm552_vm3, %vm548_vm2  ;;  %vm538_vm2 = vcmp.eq.s32.totalorder %v8143_v4, %v8521_v55  ;;  %vm543_vm3 = vcmp.eq.s32.totalorder %v8113_v62, %v8547_v58 }
 0x14e   :  { %6524 = vmatprep.mubr.msk.bf16.mxu1 %vm6523_vm5, %v11235_v26  ;;  %vm518_vm5 = vcmp.eq.s32.totalorder %v8143_v4, %v8475_v52 }
 0x14f   :  { %v1752_v5 = vpop.f32.mrf.mxu1  ;;  %vm6529_vm9 = vmpackc.low %vm522_vm6, %vm518_vm5 }
 0x151   :  { %v8589_v6 = vpop.f32.mrf.mxu1  ;;  %6414 = vmatmul.mubr.msk.bf16.gmra.mxu0 %vm6413_vm10, %v11235_v26  ;;  %vm6531_vm10 = vmpackc.low %vm531_vm8, %vm527_vm7  ;;  %vm542_vm7 = vcmp.eq.s32.totalorder %v8143_v4, %v8547_v58  ;;  %vm546_vm8 = vcmp.eq.s32.totalorder %v8143_v4, %v8545_v57 }
 0x152   :  { %6416 = vmatprep.mubr.msk.bf16.mxu0 %vm6415_vm13, %v11235_v26  ;;  %vm535_vm13 = vcmp.eq.s32.totalorder %v8113_v62, %v8523_v56  ;;  %vm6541_vm11 = vmpackc.low %vm546_vm8, %vm542_vm7 }
 0x153   :  { %v1755_v22 = vpop.f32.mrf.mxu1 }
 0x155   :  { %v8601_v7 = vpop.f32.mrf.mxu1  ;;  %6526 = vmatmul.mubr.msk.bf16.gmra.mxu1 %vm6525_vm0, %v11235_v26  ;;  %vm6535_vm0 = vmpackc.low %vm539_vm14, %vm535_vm13  ;;  %vm550_vm13 = vcmp.eq.s32.totalorder %v8143_v4, %v8575_v1  ;;  %vm554_vm14 = vcmp.eq.s32.totalorder %v8143_v4, %v8573_v0 }
 0x156   :  { %6528 = vmatprep.mubr.msk.bf16.mxu1 %vm6527_vm1, %v11235_v26  ;;  %vm534_vm1 = vcmp.eq.s32.totalorder %v8143_v4, %v8523_v56 }
 0x157   :  { %v1760_v8 = vpop.f32.mrf.mxu1  ;;  %vm6537_vm5 = vmpackc.low %vm538_vm2, %vm534_vm1  ;;  %vm559_vm1 = vcmp.eq.s32.totalorder %v8113_v62, %v7886_v21 }
 0x159   :  { %v8609_v9 = vpop.f32.mrf.mxu1  ;;  %6418 = vmatmul.mubr.msk.bf16.gmra.mxu0 %vm6417_vm4, %v11235_v26  ;;  %vm547_vm4 = vcmp.eq.s32.totalorder %v8113_v62, %v8545_v57 }
 0x15a   :  { %vm6539_vm6 = vmpackc.low %vm547_vm4, %vm543_vm3  ;;  %vm562_vm3 = vcmp.eq.s32.totalorder %v8143_v4, %v7893_v24  ;;  %vm567_vm4 = vcmp.eq.s32.totalorder %v8113_v62, %v7884_v20 }
 0x15b   :  { %v1763_v10 = vpop.f32.mrf.mxu1 }
 0x15d   :  { %v8620_v17 = vpop.f32.mrf.mxu1  ;;  %6530 = vmatmul.mubr.msk.bf16.gmra.mxu1 %vm6529_vm9, %v11235_v26  ;;  %vm551_vm9 = vcmp.eq.s32.totalorder %v8113_v62, %v8575_v1 }
 0x15e   :  { %6532 = vmatprep.mubr.msk.bf16.mxu1 %vm6531_vm10, %v11235_v26  ;;  %vm555_vm10 = vcmp.eq.s32.totalorder %v8113_v62, %v8573_v0 }
 0x15f   :  { %v1768_v11 = vpop.f32.mrf.mxu1  ;;  %vm6543_vm12 = vmpackc.low %vm555_vm10, %vm551_vm9  ;;  %vm566_vm9 = vcmp.eq.s32.totalorder %v8143_v4, %v7884_v20  ;;  %vm570_vm10 = vcmp.eq.s32.totalorder %v8143_v4, %v7891_v23 }
 0x161   :  { %v8624_v12 = vpop.f32.mrf.mxu1  ;;  %v8630_v13 = vpop.f32.mrf.mxu0 }
 0x163   :  { %v1771_v15 = vpop.f32.mrf.mxu1  ;;  %v1552_v16 = vpop.f32.mrf.mxu0 }
 0x165   :  { %v8636_v18 = vpop.f32.mrf.mxu1  ;;  %6534 = vmatmul.mubr.msk.bf16.gmra.mxu1 %vm6533_vm15, %v11235_v26  ;;  %v8639_v19 = vpop.f32.mrf.mxu0  ;;  %vm563_vm15 = vcmp.eq.s32.totalorder %v8113_v62, %v7893_v24 }
 0x166   :  { %6536 = vmatprep.mubr.msk.bf16.mxu1 %vm6535_vm0, %v11235_v26  ;;  %vm6545_vm0 = vmpackc.low %vm554_vm14, %vm550_vm13 }
 0x167   :  { %v1776_v25 = vpop.f32.mrf.mxu1  ;;  %v1555_v29 = vpop.f32.mrf.mxu0  ;;  %vm6547_vm2 = vmpackc.low %vm563_vm15, %vm559_vm1  ;;  %vm574_vm15 = vcmp.eq.s32.totalorder %v8143_v4, %v7914_v28  ;;  %vm583_vm1 = vcmp.eq.s32.totalorder %v8113_v62, %v7923_v31 }
 0x168   :  { %vm6553_vm13 = vmpackc.low %vm570_vm10, %vm566_vm9 }
 0x169   :  { %v8642_v32 = vpop.f32.mrf.mxu1  ;;  %v8648_v35 = vpop.f32.mrf.mxu0 }
 0x16b   :  { %v1779_v38 = vpop.f32.mrf.mxu1  ;;  %v1560_v41 = vpop.f32.mrf.mxu0 }
 0x16d   :  { %v8654_v44 = vpop.f32.mrf.mxu1  ;;  %6538 = vmatmul.mubr.msk.bf16.gmra.mxu1 %vm6537_vm5, %v11235_v26  ;;  %v8657_v45 = vpop.f32.mrf.mxu0  ;;  %vm571_vm5 = vcmp.eq.s32.totalorder %v8113_v62, %v7891_v23 }
 0x16e   :  { %6540 = vmatprep.mubr.msk.bf16.mxu1 %vm6539_vm6, %v11235_v26  ;;  %vm558_vm6 = vcmp.eq.s32.totalorder %v8143_v4, %v7886_v21  ;;  %vm6551_vm8 = vmpackc.low %vm571_vm5, %vm567_vm4  ;;  %vm582_vm5 = vcmp.eq.s32.totalorder %v8143_v4, %v7923_v31 }
 0x16f   :  { %v1784_v46 = vpop.f32.mrf.mxu1  ;;  %v1563_v47 = vpop.f32.mrf.mxu0  ;;  %vm6549_vm7 = vmpackc.low %vm562_vm3, %vm558_vm6  ;;  %vm586_vm6 = vcmp.eq.s32.totalorder %v8143_v4, %v7921_v30 }
 0x170   :  { %vm6561_vm9 = vmpackc.low %vm586_vm6, %vm582_vm5 }
 0x171   :  { %v8660_v48 = vpop.f32.mrf.mxu1  ;;  %v8666_v49 = vpop.f32.mrf.mxu0 }
 0x173   :  { %v1787_v50 = vpop.f32.mrf.mxu1  ;;  %v1568_v51 = vpop.f32.mrf.mxu0 }
 0x175   :  { %v8672_v52 = vpop.f32.mrf.mxu1  ;;  %6542 = vmatmul.mubr.msk.bf16.gmra.mxu1 %vm6541_vm11, %v11235_v26  ;;  %v8675_v53 = vpop.f32.mrf.mxu0  ;;  %vm575_vm11 = vcmp.eq.s32.totalorder %v8113_v62, %v7914_v28 }
 0x176   :  { %6544 = vmatprep.mubr.msk.bf16.mxu1 %vm6543_vm12, %v11235_v26  ;;  %vm579_vm12 = vcmp.eq.s32.totalorder %v8113_v62, %v7911_v27 }
 0x177   :  { %v1792_v54 = vpop.f32.mrf.mxu1  ;;  %v1571_v55 = vpop.f32.mrf.mxu0  ;;  %vm6555_vm14 = vmpackc.low %vm579_vm12, %vm575_vm11  ;;  %vm590_vm11 = vcmp.eq.s32.totalorder %v8143_v4, %v7940_v34  ;;  %vm594_vm12 = vcmp.eq.s32.totalorder %v8143_v4, %v7937_v33 }
 0x179   :  { %v8678_v56 = vpop.f32.mrf.mxu1  ;;  %v8684_v57 = vpop.f32.mrf.mxu0 }
 0x17b   :  { %v1795_v58 = vpop.f32.mrf.mxu1  ;;  %v1576_v60 = vpop.f32.mrf.mxu0 }
 0x17d   :  { %v8690_v63 = vpop.f32.mrf.mxu1  ;;  %6546 = vmatmul.mubr.msk.bf16.gmra.mxu1 %vm6545_vm0, %v11235_v26  ;;  %v8693_v1 = vpop.f32.mrf.mxu0  ;;  %vm578_vm0 = vcmp.eq.s32.totalorder %v8143_v4, %v7911_v27 }
 0x17e   :  { %6548 = vmatprep.mubr.msk.bf16.mxu1 %vm6547_vm2, %v11235_v26  ;;  %vm587_vm2 = vcmp.eq.s32.totalorder %v8113_v62, %v7921_v30  ;;  %vm6557_vm3 = vmpackc.low %vm578_vm0, %vm574_vm15 }
 0x17f   :  { %v1800_v0 = vpop.f32.mrf.mxu1  ;;  %v1579_v5 = vpop.f32.mrf.mxu0  ;;  %vm6559_vm4 = vmpackc.low %vm587_vm2, %vm583_vm1  ;;  %vm598_vm1 = vcmp.eq.s32.totalorder %v8143_v4, %v7949_v37  ;;  %vm602_vm2 = vcmp.eq.s32.totalorder %v8143_v4, %v7947_v36 }
 0x180   :  { %vm6565_vm15 = vmpackc.low %vm594_vm12, %vm590_vm11 }
 0x181   :  { %v8696_v22 = vpop.f32.mrf.mxu1  ;;  %v8700_v8 = vpop.f32.mrf.mxu0  ;;  %vm6569_vm5 = vmpackc.low %vm602_vm2, %vm598_vm1 }
 0x183   :  { %v1803_v10 = vpop.f32.mrf.mxu1  ;;  %v1584_v11 = vpop.f32.mrf.mxu0 }
 0x185   :  { %v1839_v15 = vpop.f32.mrf.mxu1  ;;  %6550 = vmatmul.mubr.msk.bf16.gmra.mxu1 %vm6549_vm7, %v11235_v26  ;;  %v8709_v16 = vpop.f32.mrf.mxu0  ;;  %vm591_vm7 = vcmp.eq.s32.totalorder %v8113_v62, %v7940_v34 }
 0x186   :  { %v8712_v24 = vadd.f32 %v1839_v15, %v8630_v13  ;;  %6552 = vmatprep.mubr.msk.bf16.mxu1 %vm6551_vm8, %v11235_v26  ;;  %vm595_vm8 = vcmp.eq.s32.totalorder %v8113_v62, %v7937_v33 }
 0x187   :  { %v1841_v25 = vpop.f32.mrf.mxu1  ;;  %v1587_v29 = vpop.f32.mrf.mxu0  ;;  %vm6563_vm10 = vmpackc.low %vm595_vm8, %vm591_vm7  ;;  %vm606_vm7 = vcmp.eq.s32.totalorder %v8143_v4, %v7966_v40  ;;  %vm610_vm8 = vcmp.eq.s32.totalorder %v8143_v4, %v7963_v39 }
 0x188   :  { %vm6573_vm11 = vmpackc.low %vm610_vm8, %vm606_vm7 }
 0x189   :  { %v1842_v38 = vpop.f32.mrf.mxu1  ;;  %v8719_v21 = vpop.f32.mrf.mxu0 }
 0x18a   :  { %v8722_v41 = vadd.f32 %v1842_v38, %v8639_v19 }
 0x18b   :  { %v1844_v13 = vpop.f32.mrf.mxu1  ;;  %v1592_v47 = vpop.f32.mrf.mxu0 }
 0x18c   :  { %v3135_v46 = vpack.c.bf16 %v8722_v41, %v8712_v24 }
 0x18d   :  { %v1847_v20 = vpop.f32.mrf.mxu1  ;;  %6554 = vmatmul.mubr.msk.bf16.gmra.mxu1 %vm6553_vm13, %v11235_v26  ;;  %v8731_v23 = vpop.f32.mrf.mxu0  ;;  %vm599_vm13 = vcmp.eq.s32.totalorder %v8113_v62, %v7949_v37 }
 0x18e   :  { %v8734_v19 = vadd.f32 %v1847_v20, %v8648_v35  ;;  %6556 = vmatprep.mubr.msk.bf16.mxu1 %vm6555_vm14, %v11235_v26  ;;  %vm603_vm14 = vcmp.eq.s32.totalorder %v8113_v62, %v7947_v36 }
 0x18f   :  { %v1849_v50 = vpop.f32.mrf.mxu1  ;;  %v1595_v51 = vpop.f32.mrf.mxu0  ;;  %vm6567_vm0 = vmpackc.low %vm603_vm14, %vm599_vm13  ;;  %vm614_vm13 = vcmp.eq.s32.totalorder %v8143_v4, %v7975_v43  ;;  %vm618_vm14 = vcmp.eq.s32.totalorder %v8143_v4, %v7973_v42 }
 0x191   :  { %v1850_v54 = vpop.f32.mrf.mxu1  ;;  %v8741_v55 = vpop.f32.mrf.mxu0 }
 0x192   :  { %v8744_v58 = vadd.f32 %v1850_v54, %v8657_v45 }
 0x193   :  { %v1852_v35 = vpop.f32.mrf.mxu1  ;;  %v1600_v0 = vpop.f32.mrf.mxu0 }
 0x194   :  { %v3136_v60 = vpack.c.bf16 %v8744_v58, %v8734_v19 }
 0x195   :  { %v1855_v28 = vpop.f32.mrf.mxu1  ;;  %6558 = vmatmul.mubr.msk.bf16.gmra.mxu1 %vm6557_vm3, %v11235_v26  ;;  %v8753_v27 = vpop.f32.mrf.mxu0  ;;  %vm607_vm3 = vcmp.eq.s32.totalorder %v8113_v62, %v7966_v40 }
 0x196   :  { %v8756_v45 = vadd.f32 %v1855_v28, %v8666_v49  ;;  %6560 = vmatprep.mubr.msk.bf16.mxu1 %vm6559_vm4, %v11235_v26  ;;  %vm611_vm4 = vcmp.eq.s32.totalorder %v8113_v62, %v7963_v39 }
 0x197   :  { %v1857_v5 = vpop.f32.mrf.mxu1  ;;  %v1603_v10 = vpop.f32.mrf.mxu0  ;;  %vm6571_vm6 = vmpackc.low %vm611_vm4, %vm607_vm3 }
 0x199   :  { %v1858_v11 = vpop.f32.mrf.mxu1  ;;  %v8763_v15 = vpop.f32.mrf.mxu0 }
 0x19a   :  { %v8766_v25 = vadd.f32 %v1858_v11, %v8675_v53 }
 0x19b   :  { %v1860_v49 = vpop.f32.mrf.mxu1  ;;  %v1608_v38 = vpop.f32.mrf.mxu0 }
 0x19c   :  { %v3137_v29 = vpack.c.bf16 %v8766_v25, %v8756_v45 }
 0x19d   :  { %v1863_v31 = vpop.f32.mrf.mxu1  ;;  %6562 = vmatmul.mubr.msk.bf16.gmra.mxu1 %vm6561_vm9, %v11235_v26  ;;  %v8775_v30 = vpop.f32.mrf.mxu0  ;;  %vm615_vm9 = vcmp.eq.s32.totalorder %v8113_v62, %v7975_v43 }
 0x19e   :  { %6564 = vmatprep.mubr.msk.bf16.mxu1 %vm6563_vm10, %v11235_v26  ;;  %v8783_v20 = vadd.f32 %v1863_v31, %v8684_v57  ;;  %vm619_vm10 = vcmp.eq.s32.totalorder %v8113_v62, %v7973_v42 }
 0x19f   :  { %v1865_v53 = vpop.f32.mrf.mxu1  ;;  %v1611_v13 = vpop.f32.mrf.mxu0  ;;  %vm6575_vm12 = vmpackc.low %vm619_vm10, %vm615_vm9 }
 0x1a1   :  { %v1866_v47 = vpop.f32.mrf.mxu1  ;;  %v8785_v50 = vpop.f32.mrf.mxu0 }
 0x1a2   :  { %v8788_v51 = vadd.f32 %v1866_v47, %v8693_v1 }
 0x1a3   :  { %v1868_v54 = vpop.f32.mrf.mxu1  ;;  %v1616_v35 = vpop.f32.mrf.mxu0 }
 0x1a4   :  { %v3138_v34 = vpack.c.bf16 %v8788_v51, %v8783_v20 }
 0x1a5   :  { %v1871_v33 = vpop.f32.mrf.mxu1  ;;  %6566 = vmatmul.mubr.msk.bf16.gmra.mxu1 %vm6565_vm15, %v11235_v26  ;;  %v8797_v57 = vpop.f32.mrf.mxu0  ;;  %vm6577_vm15 = vmpackc.low %vm618_vm14, %vm614_vm13 }
 0x1a6   :  { %6568 = vmatprep.mubr.msk.bf16.mxu1 %vm6567_vm0, %v11235_v26  ;;  %v8805_v5 = vadd.f32 %v1871_v33, %v8700_v8 }
 0x1a7   :  { %v1873_v1 = vpop.f32.mrf.mxu1  ;;  %v1619_v0 = vpop.f32.mrf.mxu0 }
 0x1a9   :  { %v1874_v28 = vpop.f32.mrf.mxu1  ;;  %v8807_v10 = vpop.f32.mrf.mxu0 }
 0x1aa   :  { %v8810_v11 = vadd.f32 %v1874_v28, %v8709_v16 }
 0x1ab   :  { %v1876_v49 = vpop.f32.mrf.mxu1  ;;  %v1624_v38 = vpop.f32.mrf.mxu0 }
 0x1ac   :  { %v3139_v37 = vpack.c.bf16 %v8810_v11, %v8805_v5 }
 0x1ad   :  { %v1879_v36 = vpop.f32.mrf.mxu1  ;;  %6570 = vmatmul.mubr.msk.bf16.gmra.mxu1 %vm6569_vm5, %v11235_v26  ;;  %v8819_v8 = vpop.f32.mrf.mxu0 }
 0x1ae   :  { %6572 = vmatprep.mubr.msk.bf16.mxu1 %vm6571_vm6, %v11235_v26 }
 0x1af   :  { %v1881_v16 = vpop.f32.mrf.mxu1  ;;  %v1627_v31 = vpop.f32.mrf.mxu0 }
 0x1b1   :  { %v1882_v53 = vpop.f32.mrf.mxu1  ;;  %v8826_v13 = vpop.f32.mrf.mxu0 }
 0x1b3   :  { %v1884_v47 = vpop.f32.mrf.mxu1  ;;  %v1632_v54 = vpop.f32.mrf.mxu0 }
 0x1b5   :  { %v1887_v35 = vpop.f32.mrf.mxu1  ;;  %6574 = vmatmul.mubr.msk.bf16.gmra.mxu1 %vm6573_vm11, %v11235_v26  ;;  %v8833_v33 = vpop.f32.mrf.mxu0 }
 0x1b6   :  { %6576 = vmatprep.mubr.msk.bf16.mxu1 %vm6575_vm12, %v11235_v26  ;;  %v1888_v14 = vadd.f32 %v1887_v35, %v8741_v55 }
 0x1b7   :  { %v1889_v39 = vpop.f32.mrf.mxu1  ;;  %v1635_v40 = vpop.f32.mrf.mxu0 }
 0x1b9   :  { %v1890_v1 = vpop.f32.mrf.mxu1  ;;  %v8840_v62 = vpop.f32.mrf.mxu0 }
 0x1ba   :  { %v1891_v4 = vadd.f32 %v1890_v1, %v8753_v27  ;;  %v1880_v27 = vadd.f32 %v1879_v36, %v8719_v21 }
 0x1bb   :  { %v1892_v0 = vpop.f32.mrf.mxu1  ;;  %v1640_v28 = vpop.f32.mrf.mxu0 }
 0x1bd   :  { %v1895_v49 = vpop.f32.mrf.mxu1  ;;  %6578 = vmatmul.mubr.msk.bf16.gmra.mxu1 %vm6577_vm15, %v11235_v26  ;;  %v8843_v38 = vpop.f32.mrf.mxu0 }
 0x1be   :  { %v1896_v54 = vadd.f32 %v1895_v49, %v8763_v15  ;;  %v1883_v15 = vadd.f32 %v1882_v53, %v8731_v23 }
 0x1bf   :  { %v1897_v16 = vpop.f32.mrf.mxu1  ;;  %v1643_v31 = vpop.f32.mrf.mxu0 }
 0x1c1   :  { %v1898_v47 = vpop.f32.mrf.mxu1  ;;  %v8846_v39 = vpop.f32.mrf.mxu0 }
 0x1c2   :  { %v1899_v43 = vadd.f32 %v1898_v47, %v8775_v30  ;;  %v3141_v30 = vpack.c.bf16 %v1891_v4, %v1888_v14 }
 0x1c3   :  { %v1900_v42 = vpop.f32.mrf.mxu1  ;;  %v1648_v0 = vpop.f32.mrf.mxu0 }
 0x1c4   :  { %v3142_v40 = vpack.c.bf16 %v1899_v43, %v1896_v54 }
 0x1c5   :  { %v1903_v28 = vpop.f32.mrf.mxu1  ;;  %v8851_v26 = vpop.f32.mrf.mxu0 }
 0x1c6   :  { %v8854_v16 = vadd.f32 %v1903_v28, %v8785_v50  ;;  %3168 = vmatpush1.bf16.msra.mxu0 %v3142_v40  ;;  %v3140_v50 = vpack.c.bf16 %v1883_v15, %v1880_v27 }
 0x1c7   :  { %v1905_v31 = vpop.f32.mrf.mxu1  ;;  %3169 = vmatprep.subr.bf16.mxu0 %v11237_v2  ;;  %v1651_v49 = vpop.f32.mrf.mxu0 }
 0x1c9   :  { %v1906_v47 = vpop.f32.mrf.mxu1  ;;  %v8859_v1 = vpop.f32.mrf.mxu0 }
 0x1ca   :  { %v8862_v55 = vadd.f32 %v1906_v47, %v8797_v57  ;;  %3170 = vmatpush1.bf16.msra.mxu0 %v3141_v30 }
 0x1cb   :  { %v1908_v35 = vpop.f32.mrf.mxu1  ;;  %3171 = vmatprep.subr.bf16.mxu0 %v11237_v2  ;;  %v1656_v43 = vpop.f32.mrf.mxu0 }
 0x1cd   :  { %v1911_v23 = vpop.f32.mrf.mxu1  ;;  %v8867_v14 = vpop.f32.mrf.mxu0 }
 0x1ce   :  { %v8870_v53 = vadd.f32 %v1911_v23, %v8807_v10  ;;  %3172 = vmatpush1.bf16.msra.mxu0 %v3140_v50 }
 0x1cf   :  { %v1913_v21 = vpop.f32.mrf.mxu1  ;;  %3173 = vmatprep.subr.bf16.mxu0 %v11237_v2  ;;  %v1659_v57 = vpop.f32.mrf.mxu0 }
 0x1d1   :  { %v1914_v36 = vpop.f32.mrf.mxu1  ;;  %v8873_v42 = vpop.f32.mrf.mxu0 }
 0x1d2   :  { %v8876_v4 = vadd.f32 %v1914_v36, %v8819_v8  ;;  %3174 = vmatpush1.bf16.msra.mxu0 %v3139_v37 }
 0x1d3   :  { %v1916_v40 = vpop.f32.mrf.mxu1  ;;  %3175 = vmatprep.subr.bf16.mxu0 %v11237_v2  ;;  %v1664_v0 = vpop.f32.mrf.mxu0 }
 0x1d4   :  { %v11261_v0 = vlaneseq }
 0x1d5   :  { %v1919_v28 = vpop.f32.mrf.mxu1  ;;  %v8884_v31 = vpop.f32.mrf.mxu0 }
 0x1d6   :  { %v8887_v15 = vadd.f32 %v1919_v28, %v8826_v13  ;;  %3176 = vmatpush1.bf16.msra.mxu0 %v3138_v34  ;;  %v8933_v28 = vshrl.u32 %v11261_v0, 7 }
 0x1d7   :  { %v1921_v8 = vpop.f32.mrf.mxu1  ;;  %3177 = vmatprep.subr.bf16.mxu0 %v11237_v2  ;;  %v1667_v5 = vpop.f32.mrf.mxu0 }
 0x1d9   :  { %v1922_v11 = vpop.f32.mrf.mxu1  ;;  %v8893_v37 = vpop.f32.mrf.mxu0 }
 0x1da   :  { %v8896_v30 = vadd.f32 %v1922_v11, %v8833_v33  ;;  %3178 = vmatpush1.bf16.msra.mxu0 %v3137_v29  ;;  %v2165_v11 = vsub.s32 1, %v8933_v28 }
 0x1db   :  { %v1924_v13 = vpop.f32.mrf.mxu1  ;;  %3179 = vmatprep.subr.bf16.mxu0 %v11237_v2  ;;  %v1672_v51 = vpop.f32.mrf.mxu0 }
 0x1dd   :  { %v1927_v34 = vpop.f32.mrf.mxu1  ;;  %v1673_v49 = vpop.f32.mrf.mxu0 }
 0x1de   :  { %3180 = vmatpush1.bf16.msra.mxu0 %v3136_v60  ;;  %v8909_v45 = vadd.f32 %v1927_v34, %v8840_v62 }
 0x1df   :  { %v1929_v47 = vpop.f32.mrf.mxu1  ;;  %3181 = vmatprep.subr.bf16.mxu0 %v11237_v2  ;;  %v1675_v33 = vpop.f32.mrf.mxu0 }
 0x1e1   :  { %v1930_v27 = vpop.f32.mrf.mxu1  ;;  %v1678_v25 = vpop.f32.mrf.mxu0 }
 0x1e2   :  { %v8912_v29 = vadd.f32 %v1930_v27, %v8843_v38  ;;  %3182 = vmatpush1.bf16.msra.mxu0 %v3135_v46 }
 0x1e3   :  { %v1932_v35 = vpop.f32.mrf.mxu1  ;;  %3183 = vmatprep.subr.bf16.mxu0 %v11237_v2  ;;  %v1680_v58 = vpop.f32.mrf.mxu0 }
 0x1e4   :  { %v11262_v58 = vmov 1.0|1.0  }
 0x1e5   :  { %v1935_v60 = vpop.f32.mrf.mxu1  ;;  %v1681_v50 = vpop.f32.mrf.mxu0 }
 0x1e6   :  { %v8921_v21 = vadd.f32 %v1935_v60, %v8846_v39  ;;  %v8938_v39 = vld [vmem:[%s11225_s1] sm:$0xf] }
 0x1e7   :  { %v1937_v43 = vpop.f32.mrf.mxu1  ;;  %v1683_v62 = vpop.f32.mrf.mxu0  ;;  %v8947_v34 = vrot.slane %v8938_v39, %v2165_v11 }
 0x1e9   :  { %v1938_v23 = vpop.f32.mrf.mxu1  ;;  %v8923_v38 = vpop.f32.mrf.mxu0  ;;  %vm2176_vm0 = vcmp.eq.s32.totalorder %v8933_v28, %v8947_v34 }
 0x1ea   :  { %v8926_v24 = vadd.f32 %v1938_v23, %v8851_v26  ;;  %v8941_v26 = vadd.s32 8, %v8933_v28 }
 0x1eb   :  { %v1940_v41 = vpop.f32.mrf.mxu1  ;;  %v1688_v57 = vpop.f32.mrf.mxu0 }
 0x1ec   :  { %vm2180_vm1 = vcmp.eq.s32.totalorder %v8941_v26, %v8947_v34 }
 0x1ed   :  { %v1943_v36 = vpop.f32.mrf.mxu1  ;;  %v8930_v40 = vpop.f32.mrf.mxu0  ;;  %vm6835_vm2 = vmpackc.low %vm2180_vm1, %vm2176_vm0 }
 0x1ee   :  { %6836 = vmatprep.mubr.msk.bf16.mxu0 %vm6835_vm2, %v11262_v58 }
 0x1ef   :  { %v1945_v8 = vpop.f32.mrf.mxu1  ;;  %v1691_v5 = vpop.f32.mrf.mxu0 }
 0x1f1   :  { %v1946_v13 = vpop.f32.mrf.mxu1  ;;  %v8944_v51 = vpop.f32.mrf.mxu0 }
 0x1f3   :  { %v1948_v47 = vpop.f32.mrf.mxu1  ;;  %v1696_v33 = vpop.f32.mrf.mxu0 }
 0x1f5   :  { %v1951_v27 = vpop.f32.mrf.mxu1  ;;  %v8953_v35 = vpop.f32.mrf.mxu0 }
 0x1f7   :  { %v1953_v60 = vpop.f32.mrf.mxu1  ;;  %v1699_v43 = vpop.f32.mrf.mxu0 }
 0x1f9   :  { %v1954_v62 = vpop.f32.mrf.mxu1  ;;  %v8956_v23 = vpop.f32.mrf.mxu0 }
 0x1fa   :  { %v1955_v60 = vadd.f32 %v1954_v62, %v8884_v31  ;;  %v1944_v31 = vadd.f32 %v1943_v36, %v8859_v1 }
 0x1fb   :  { %v1956_v41 = vpop.f32.mrf.mxu1  ;;  %v1704_v57 = vpop.f32.mrf.mxu0 }
 0x1fc   :  { %v1952_v41 = vadd.f32 %v1951_v27, %v8873_v42 }
 0x1fd   :  { %v1959_v0 = vpop.f32.mrf.mxu1  ;;  %v8958_v8 = vpop.f32.mrf.mxu0 }
 0x1fe   :  { %v1960_v33 = vadd.f32 %v1959_v0, %v8893_v37  ;;  %v1947_v37 = vadd.f32 %v1946_v13, %v8867_v14  ;;  %v3149_v0 = vpack.c.bf16 %v1955_v60, %v1952_v41  ;;  %v11264_v60 = vpack.c.bf16 %v8926_v24, %v8921_v21 }
 0x1ff   :  { %v1961_v5 = vpop.f32.mrf.mxu1  ;;  %v1707_v11 = vpop.f32.mrf.mxu0  ;;  %v2161_v21 = vsub.s32 0, %v8933_v28 }
 0x200   :  { %v11263_v11 = vmov 0  }
 0x201   :  { %v1962_v47 = vpop.f32.mrf.mxu1  ;;  %v8961_v54 = vpop.f32.mrf.mxu0 }
 0x202   :  { %v1963_v10 = vadd.f32 %v1962_v47, %v1673_v49 }
 0x203   :  { %v1964_v20 = vpop.f32.mrf.mxu1  ;;  %v1712_v19 = vpop.f32.mrf.mxu0 }
 0x204   :  { %v3150_v43 = vpack.c.bf16 %v1963_v10, %v1960_v33 }
 0x205   :  { %v1967_v46 = vpop.f32.mrf.mxu1  ;;  %v8965_v57 = vpop.f32.mrf.mxu0 }
 0x206   :  { %v8967_v2 = vadd.f32 %v1967_v46, %v1678_v25  ;;  %3184 = vmatpush2.bf16.msra.mxu0 %v3150_v43  ;;  %v3148_v25 = vpack.c.bf16 %v1947_v37, %v1944_v31 }
 0x207   :  { %v1969_v5 = vpop.f32.mrf.mxu1  ;;  %3185 = vmatprep.subr.bf16.mxu0 %v11263_v11  ;;  %v1715_v49 = vpop.f32.mrf.mxu0 }
 0x209   :  { %v1970_v20 = vpop.f32.mrf.mxu1  ;;  %v8972_v10 = vpop.f32.mrf.mxu0 }
 0x20a   :  { %v8974_v19 = vadd.f32 %v1970_v20, %v1681_v50  ;;  %3186 = vmatpush2.bf16.msra.mxu0 %v3149_v0 }
 0x20b   :  { %v1972_v42 = vpop.f32.mrf.mxu1  ;;  %3187 = vmatprep.subr.bf16.mxu0 %v11263_v11  ;;  %v1720_v27 = vpop.f32.mrf.mxu0 }
 0x20d   :  { %v1975_v62 = vpop.f32.mrf.mxu1  ;;  %v8979_v14 = vpop.f32.mrf.mxu0 }
 0x20e   :  { %v8982_v13 = vadd.f32 %v1975_v62, %v8923_v38  ;;  %3188 = vmatpush2.bf16.msra.mxu0 %v3148_v25  ;;  %v2097_v62 = vadd.s32 16, %v8933_v28 }
 0x20f   :  { %v1977_v1 = vpop.f32.mrf.mxu1  ;;  %3189 = vmatprep.subr.bf16.mxu0 %v11263_v11  ;;  %v1723_v50 = vpop.f32.mrf.mxu0 }
 0x210   :  { %v2098_v1 = vadd.s32 24, %v8933_v28  ;;  %vm2184_vm5 = vcmp.eq.s32.totalorder %v2097_v62, %v8947_v34 }
 0x211   :  { %v1978_v36 = vpop.f32.mrf.mxu1  ;;  %v8985_v47 = vpop.f32.mrf.mxu0 }
 0x212   :  { %v8988_v33 = vadd.f32 %v1978_v36, %v8930_v40  ;;  %3190 = vmatpush2.bf16.msra.mxu0 %v11264_v60  ;;  %v11265_v40 = vpack.c.bf16 %v8912_v29, %v8909_v45  ;;  %v9016_v45 = vrot.slane %v8938_v39, %v2161_v21  ;;  %vm2188_vm6 = vcmp.eq.s32.totalorder %v2098_v1, %v8947_v34 }
 0x213   :  { %v1980_v43 = vpop.f32.mrf.mxu1  ;;  %3191 = vmatprep.subr.bf16.mxu0 %v11263_v11  ;;  %v1728_v41 = vpop.f32.mrf.mxu0  ;;  %vm6839_vm8 = vmpackc.low %vm2188_vm6, %vm2184_vm5 }
 0x214   :  { %vm2175_vm3 = vcmp.eq.s32.totalorder %v8933_v28, %v9016_v45  ;;  %vm2179_vm4 = vcmp.eq.s32.totalorder %v8941_v26, %v9016_v45  ;;  %v2169_v43 = vsub.s32 2, %v8933_v28  ;;  %vm2183_vm9 = vcmp.eq.s32.totalorder %v2097_v62, %v9016_v45 }
 0x215   :  { %v1983_v5 = vpop.f32.mrf.mxu1  ;;  %v8996_v37 = vpop.f32.mrf.mxu0  ;;  %vm6837_vm7 = vmpackc.low %vm2179_vm4, %vm2175_vm3  ;;  %vm2187_vm10 = vcmp.eq.s32.totalorder %v2098_v1, %v9016_v45 }
 0x216   :  { %v8999_v0 = vadd.f32 %v1983_v5, %v8944_v51  ;;  %3192 = vmatpush2.bf16.msra.mxu0 %v11265_v40  ;;  %v11266_v51 = vpack.c.bf16 %v8896_v30, %v8887_v15  ;;  %v11267_v15 = vpack.c.bf16 %v8876_v4, %v8870_v53  ;;  %v2099_v53 = vadd.s32 32, %v8933_v28  ;;  %vm9067_vm1 = vmpackc.low %vm2187_vm10, %vm2183_vm9 }
 0x217   :  { %v1985_v49 = vpop.f32.mrf.mxu1  ;;  %3193 = vmatprep.subr.bf16.mxu0 %v11263_v11  ;;  %v1731_v24 = vpop.f32.mrf.mxu0  ;;  %v11268_v5 = vpack.c.bf16 %v8862_v55, %v8854_v16  ;;  %v2100_v40 = vadd.s32 40, %v8933_v28 }
 0x218   :  { %v2173_v49 = vsub.s32 3, %v8933_v28  ;;  %vm2192_vm11 = vcmp.eq.s32.totalorder %v2099_v53, %v8947_v34 }
 0x219   :  { %v1986_v20 = vpop.f32.mrf.mxu1  ;;  %v9006_v31 = vpop.f32.mrf.mxu0  ;;  %vm2196_vm12 = vcmp.eq.s32.totalorder %v2100_v40, %v8947_v34 }
 0x21a   :  { %v9009_v42 = vadd.f32 %v1986_v20, %v8953_v35  ;;  %3194 = vmatpush2.bf16.msra.mxu0 %v11266_v51  ;;  %v9051_v24 = vrot.slane %v8938_v39, %v2173_v49  ;;  %v9054_v20 = vrot.slane %v8938_v39, %v2169_v43  ;;  %vm6843_vm5 = vmpackc.low %vm2196_vm12, %vm2192_vm11  ;;  %v2103_v49 = vadd.s32 64, %v8933_v28 }
 0x21b   :  { %v1988_v25 = vpop.f32.mrf.mxu1  ;;  %3195 = vmatprep.subr.bf16.mxu0 %v11263_v11  ;;  %v1736_v27 = vpop.f32.mrf.mxu0 }
 0x21c   :  { %vm2178_vm13 = vcmp.eq.s32.totalorder %v8933_v28, %v9051_v24  ;;  %vm2182_vm14 = vcmp.eq.s32.totalorder %v8941_v26, %v9051_v24  ;;  %vm2186_vm0 = vcmp.eq.s32.totalorder %v2097_v62, %v9051_v24  ;;  %vm2190_vm2 = vcmp.eq.s32.totalorder %v2098_v1, %v9051_v24 }
 0x21d   :  { %v1991_v35 = vpop.f32.mrf.mxu1  ;;  %v9022_v50 = vpop.f32.mrf.mxu0  ;;  %vm6963_vm15 = vmpackc.low %vm2182_vm14, %vm2178_vm13  ;;  %vm2185_vm3 = vcmp.eq.s32.totalorder %v2097_v62, %v9054_v20  ;;  %vm2189_vm4 = vcmp.eq.s32.totalorder %v2098_v1, %v9054_v20  ;;  %v2101_v1 = vadd.s32 48, %v8933_v28  ;;  %vm2198_vm9 = vcmp.eq.s32.totalorder %v2100_v40, %v9051_v24 }
 0x21e   :  { %3196 = vmatpush2.bf16.msra.mxu0 %v11267_v15  ;;  %v9037_v4 = vadd.f32 %v1991_v35, %v8956_v23  ;;  %6964 = vmatprep.mubr.msk.bf16.mxu1 %vm6963_vm15, %v11262_v58  ;;  %vm9081_vm6 = vmpackc.low %vm2190_vm2, %vm2186_vm0  ;;  %vm2193_vm11 = vcmp.eq.s32.totalorder %v2099_v53, %v9054_v20  ;;  %vm2197_vm12 = vcmp.eq.s32.totalorder %v2100_v40, %v9054_v20  ;;  %v2108_v23 = vadd.s32 104, %v8933_v28 }
 0x21f   :  { %v1993_v30 = vpop.f32.mrf.mxu1  ;;  %3197 = vmatprep.subr.bf16.mxu0 %v11263_v11  ;;  %v1739_v36 = vpop.f32.mrf.mxu0  ;;  %vm2191_vm13 = vcmp.eq.s32.totalorder %v2099_v53, %v9016_v45  ;;  %vm2195_vm14 = vcmp.eq.s32.totalorder %v2100_v40, %v9016_v45  ;;  %vm9109_vm15 = vmpackc.low %vm2197_vm12, %vm2193_vm11  ;;  %vm2200_vm0 = vcmp.eq.s32.totalorder %v2101_v1, %v8947_v34  ;;  %vm2199_vm12 = vcmp.eq.s32.totalorder %v2101_v1, %v9016_v45 }
 0x220   :  { %vm6845_vm2 = vmpackc.low %vm2195_vm14, %vm2191_vm13  ;;  %v2133_v27 = vadd.s32 304, %v8933_v28  ;;  %v11354_v15 = vmov 0  ;;  %v11358_v40 = vmov 0 }
 0x221   :  { %v1994_v60 = vpop.f32.mrf.mxu1 }
 0x222   :  { %v9040_v41 = vadd.f32 %v1994_v60, %v8958_v8  ;;  %3198 = vmatpush2.bf16.msra.mxu0 %v11268_v5  ;;  %v7345_v60 = vld [vmem:[%s11227_s3 + $0x20] sm:$0xff]  }
 0x223   :  { %v1996_v21 = vpop.f32.mrf.mxu1  ;;  %4363 = vmatprep.subr.bf16.mxu0 %v11263_v11 }
 0x224   :  { %v2104_v21 = vadd.s32 72, %v8933_v28 }
 0x225   :  { %v1999_v8 = vpop.f32.mrf.mxu1  ;;  %6838 = vmatmul.mubr.msk.bf16.vlgmr.msra.gmra.mxu0 %vm6837_vm7, %v11262_v58  ;;  %vm9085_vm7 = vmpackc.low %vm2189_vm4, %vm2185_vm3  ;;  %vm2202_vm4 = vcmp.eq.s32.totalorder %v2101_v1, %v9051_v24 }
 0x226   :  { %6840 = vmatprep.mubr.msk.bf16.mxu0 %vm6839_vm8, %v11262_v58  ;;  %v9076_v51 = vadd.f32 %v1999_v8, %v8961_v54  ;;  %v2102_v54 = vadd.s32 56, %v8933_v28  ;;  %vm2194_vm8 = vcmp.eq.s32.totalorder %v2099_v53, %v9051_v24 }
 0x227   :  { %v2001_v16 = vpop.f32.mrf.mxu1  ;;  %vm9101_vm10 = vmpackc.low %vm2198_vm9, %vm2194_vm8  ;;  %vm2201_vm9 = vcmp.eq.s32.totalorder %v2101_v1, %v9054_v20  ;;  %v11283_v1 = vmov 0 }
 0x228   :  { %vm2205_vm11 = vcmp.eq.s32.totalorder %v2102_v54, %v9054_v20  ;;  %vm2203_vm13 = vcmp.eq.s32.totalorder %v2102_v54, %v9016_v45  ;;  %v11281_v16 = vmov 0 }
 0x229   :  { %v2002_v39 = vpop.f32.mrf.mxu1  ;;  %vm9131_vm14 = vmpackc.low %vm2205_vm11, %vm2201_vm9  ;;  %vm2209_vm11 = vcmp.eq.s32.totalorder %v2103_v49, %v9054_v20 }
 0x22a   :  { %v9079_v25 = vadd.f32 %v2002_v39, %v8965_v57  ;;  %v11282_v16 = vsel %vm9131_vm14, 4294967295, %v11281_v16  ;;  %v2135_v57 = vadd.s32 320, %v8933_v28 }
 0x22b   :  { %v2004_v35 = vpop.f32.mrf.mxu1 }
 0x22c   :  { %v2105_v35 = vadd.s32 80, %v8933_v28 }
 0x22d   :  { %v9093_v30 = vpop.f32.mrf.mxu1  ;;  %6842 = vmatmul.mubr.msk.bf16.gmra.mxu0 %vm9067_vm1, %v11262_v58  ;;  %vm2204_vm1 = vcmp.eq.s32.totalorder %v2102_v54, %v8947_v34 }
 0x22e   :  { %6844 = vmatprep.mubr.msk.bf16.mxu0 %vm6843_vm5, %v11262_v58  ;;  %vm6847_vm3 = vmpackc.low %vm2204_vm1, %vm2200_vm0  ;;  %vm2206_vm5 = vcmp.eq.s32.totalorder %v2102_v54, %v9051_v24  ;;  %vm2208_vm0 = vcmp.eq.s32.totalorder %v2103_v49, %v8947_v34  ;;  %vm2212_vm1 = vcmp.eq.s32.totalorder %v2104_v21, %v8947_v34 }
 0x22f   :  { %v2009_v36 = vpop.f32.mrf.mxu1  ;;  %vm9123_vm8 = vmpackc.low %vm2206_vm5, %vm2202_vm4  ;;  %vm2210_vm4 = vcmp.eq.s32.totalorder %v2103_v49, %v9051_v24  ;;  %vm2214_vm5 = vcmp.eq.s32.totalorder %v2104_v21, %v9051_v24 }
 0x230   :  { %v2106_v36 = vadd.s32 88, %v8933_v28  ;;  %vm9143_vm9 = vmpackc.low %vm2214_vm5, %vm2210_vm4 }
 0x231   :  { %v9115_v43 = vpop.f32.mrf.mxu1  ;;  %v11284_v1 = vsel %vm9143_vm9, 4294967295, %v11283_v1 }
 0x233   :  { %v2012_v5 = vpop.f32.mrf.mxu1 }
 0x235   :  { %v2015_v53 = vpop.f32.mrf.mxu1  ;;  %6846 = vmatmul.mubr.msk.bf16.gmra.mxu0 %vm6845_vm2, %v11262_v58  ;;  %vm6849_vm2 = vmpackc.low %vm2203_vm13, %vm2199_vm12  ;;  %vm2213_vm12 = vcmp.eq.s32.totalorder %v2104_v21, %v9054_v20  ;;  %vm2207_vm13 = vcmp.eq.s32.totalorder %v2103_v49, %v9016_v45 }
 0x236   :  { %6848 = vmatprep.mubr.msk.bf16.mxu0 %vm6847_vm3, %v11262_v58  ;;  %vm6851_vm3 = vmpackc.low %vm2212_vm1, %vm2208_vm0  ;;  %vm2211_vm0 = vcmp.eq.s32.totalorder %v2104_v21, %v9016_v45  ;;  %v2107_v21 = vadd.s32 96, %v8933_v28 }
 0x237   :  { %v2017_v8 = vpop.f32.mrf.mxu1  ;;  %vm9151_vm1 = vmpackc.low %vm2213_vm12, %vm2209_vm11  ;;  %vm2218_vm11 = vcmp.eq.s32.totalorder %v2105_v35, %v9051_v24  ;;  %vm2222_vm12 = vcmp.eq.s32.totalorder %v2106_v36, %v9051_v24 }
 0x238   :  { %v11285_v8 = vmov 0  ;;  %vm6853_vm4 = vmpackc.low %vm2211_vm0, %vm2207_vm13  ;;  %vm2217_vm0 = vcmp.eq.s32.totalorder %v2105_v35, %v9054_v20 }
 0x239   :  { %v2018_v55 = vpop.f32.mrf.mxu1  ;;  %v11286_v8 = vsel %vm9151_vm1, 4294967295, %v11285_v8  ;;  %vm9167_vm13 = vmpackc.low %vm2222_vm12, %vm2218_vm11  ;;  %vm2228_vm11 = vcmp.eq.s32.totalorder %v2108_v23, %v8947_v34 }
 0x23a   :  { %v2019_v49 = vadd.f32 %v2018_v55, %v8996_v37 }
 0x23b   :  { %v2020_v39 = vpop.f32.mrf.mxu1 }
 0x23d   :  { %v2023_v5 = vpop.f32.mrf.mxu1  ;;  %6850 = vmatmul.mubr.msk.bf16.gmra.mxu0 %vm6849_vm2, %v11262_v58  ;;  %vm2216_vm2 = vcmp.eq.s32.totalorder %v2105_v35, %v8947_v34 }
 0x23e   :  { %6852 = vmatprep.mubr.msk.bf16.mxu0 %vm6851_vm3, %v11262_v58  ;;  %vm2220_vm3 = vcmp.eq.s32.totalorder %v2106_v36, %v8947_v34  ;;  %v2024_v46 = vadd.f32 %v2023_v5, %v9006_v31  ;;  %v2016_v31 = vadd.f32 %v2015_v53, %v8985_v47  ;;  %v11289_v47 = vmov 0 }
 0x23f   :  { %v2025_v54 = vpop.f32.mrf.mxu1  ;;  %vm6855_vm5 = vmpackc.low %vm2220_vm3, %vm2216_vm2  ;;  %vm2221_vm2 = vcmp.eq.s32.totalorder %v2106_v36, %v9054_v20  ;;  %vm2215_vm3 = vcmp.eq.s32.totalorder %v2105_v35, %v9016_v45  ;;  %v2008_v53 = vadd.f32 %v9093_v30, %v8972_v10  ;;  %v2109_v5 = vadd.s32 112, %v8933_v28 }
 0x240   :  { %vm9176_vm1 = vmpackc.low %vm2221_vm2, %vm2217_vm0  ;;  %v3157_v37 = vpack.c.bf16 %v2019_v49, %v2016_v31  ;;  %v2110_v10 = vadd.s32 120, %v8933_v28  ;;  %vm2226_vm2 = vcmp.eq.s32.totalorder %v2107_v21, %v9051_v24 }
 0x241   :  { %v2026_v39 = vpop.f32.mrf.mxu1  ;;  %v11290_v47 = vsel %vm9176_vm1, 4294967295, %v11289_v47  ;;  %vm2230_vm1 = vcmp.eq.s32.totalorder %v2108_v23, %v9051_v24 }
 0x242   :  { %v2027_v38 = vadd.f32 %v2026_v39, %v9022_v50 }
 0x243   :  { %v2028_v29 = vpop.f32.mrf.mxu1 }
 0x244   :  { %v3158_v54 = vpack.c.bf16 %v2027_v38, %v2024_v46  ;;  %v11287_v29 = vmov 0  ;;  %v2011_v38 = vadd.f32 %v9115_v43, %v8979_v14  ;;  %v2121_v43 = vadd.s32 208, %v8933_v28 }
 0x245   :  { %v2031_v62 = vpop.f32.mrf.mxu1  ;;  %6854 = vmatmul.mubr.msk.bf16.gmra.mxu0 %vm6853_vm4, %v11262_v58  ;;  %v11288_v29 = vsel %vm9167_vm13, 4294967295, %v11287_v29  ;;  %vm2219_vm4 = vcmp.eq.s32.totalorder %v2106_v36, %v9016_v45 }
 0x246   :  { %3457 = vmatpush1.bf16.msra.mxu1 %v3158_v54  ;;  %6856 = vmatprep.mubr.msk.bf16.mxu0 %vm6855_vm5, %v11262_v58  ;;  %vm2224_vm5 = vcmp.eq.s32.totalorder %v2107_v21, %v8947_v34  ;;  %v9187_v55 = vadd.f32 %v2031_v62, %v8549_v59  ;;  %vm6857_vm12 = vmpackc.low %vm2219_vm4, %vm2215_vm3  ;;  %v3156_v14 = vpack.c.bf16 %v2011_v38, %v2008_v53  ;;  %v11291_v59 = vmov 0 }
 0x247   :  { %v2033_v46 = vpop.f32.mrf.mxu1  ;;  %3458 = vmatprep.subr.bf16.mxu1 %v11263_v11  ;;  %vm6859_vm0 = vmpackc.low %vm2228_vm11, %vm2224_vm5  ;;  %vm2225_vm4 = vcmp.eq.s32.totalorder %v2107_v21, %v9054_v20  ;;  %vm2229_vm5 = vcmp.eq.s32.totalorder %v2108_v23, %v9054_v20  ;;  %vm2223_vm11 = vcmp.eq.s32.totalorder %v2107_v21, %v9016_v45  ;;  %v11293_v62 = vmov 0 }
 0x248   :  { %vm9201_vm3 = vmpackc.low %vm2230_vm1, %vm2226_vm2  ;;  %vm2232_vm1 = vcmp.eq.s32.totalorder %v2109_v5, %v8947_v34  ;;  %v11295_v21 = vpack.c.bf16 %v9079_v25, %v9076_v51  ;;  %v2111_v46 = vadd.s32 128, %v8933_v28  ;;  %v11297_v51 = vmov 0 }
 0x249   :  { %v2034_v50 = vpop.f32.mrf.mxu1  ;;  %v11292_v59 = vsel %vm9201_vm3, 4294967295, %v11291_v59  ;;  %vm9210_vm13 = vmpackc.low %vm2229_vm5, %vm2225_vm4  ;;  %vm2234_vm5 = vcmp.eq.s32.totalorder %v2109_v5, %v9051_v24  ;;  %v2113_v53 = vadd.s32 144, %v8933_v28 }
 0x24a   :  { %v9190_v35 = vadd.f32 %v2034_v50, %v8561_v61  ;;  %3459 = vmatpush1.bf16.msra.mxu1 %v3157_v37  ;;  %v11294_v62 = vsel %vm9210_vm13, 4294967295, %v11293_v62  ;;  %vm2238_vm13 = vcmp.eq.s32.totalorder %v2110_v10, %v9051_v24  ;;  %v11301_v37 = vpack.c.bf16 %v9009_v42, %v8999_v0 }
 0x24b   :  { %v2036_v36 = vpop.f32.mrf.mxu1  ;;  %3460 = vmatprep.subr.bf16.mxu1 %v11263_v11  ;;  %v11302_v0 = vpack.c.bf16 %v8988_v33, %v8982_v13  ;;  %v11303_v42 = vmov 0  ;;  %v11305_v13 = vmov 0 }
 0x24c   :  { %v2114_v36 = vadd.s32 152, %v8933_v28 }
 0x24d   :  { %v2039_v30 = vpop.f32.mrf.mxu1  ;;  %6858 = vmatmul.mubr.msk.bf16.gmra.mxu0 %vm6857_vm12, %v11262_v58  ;;  %vm2227_vm12 = vcmp.eq.s32.totalorder %v2108_v23, %v9016_v45 }
 0x24e   :  { %3461 = vmatpush1.bf16.msra.mxu1 %v3156_v14  ;;  %6860 = vmatprep.mubr.msk.bf16.mxu0 %vm6859_vm0, %v11262_v58  ;;  %vm2236_vm0 = vcmp.eq.s32.totalorder %v2110_v10, %v8947_v34  ;;  %v9217_v49 = vadd.f32 %v2039_v30, %v8577_v3  ;;  %vm6861_vm2 = vmpackc.low %vm2227_vm12, %vm2223_vm11  ;;  %v2112_v3 = vadd.s32 136, %v8933_v28  ;;  %vm2233_vm12 = vcmp.eq.s32.totalorder %v2109_v5, %v9054_v20 }
 0x24f   :  { %v2041_v61 = vpop.f32.mrf.mxu1  ;;  %3462 = vmatprep.subr.bf16.mxu1 %v11263_v11  ;;  %vm6863_vm4 = vmpackc.low %vm2236_vm0, %vm2232_vm1  ;;  %vm2237_vm1 = vcmp.eq.s32.totalorder %v2110_v10, %v9054_v20  ;;  %vm2231_vm0 = vcmp.eq.s32.totalorder %v2109_v5, %v9016_v45 }
 0x250   :  { %vm9239_vm11 = vmpackc.low %vm2238_vm13, %vm2234_vm5  ;;  %vm2240_vm13 = vcmp.eq.s32.totalorder %v2111_v46, %v8947_v34  ;;  %v2115_v61 = vadd.s32 160, %v8933_v28 }
 0x251   :  { %v2042_v39 = vpop.f32.mrf.mxu1  ;;  %v11298_v51 = vsel %vm9239_vm11, 4294967295, %v11297_v51  ;;  %vm9248_vm3 = vmpackc.low %vm2237_vm1, %vm2233_vm12  ;;  %vm2242_vm12 = vcmp.eq.s32.totalorder %v2111_v46, %v9051_v24  ;;  %vm2246_vm1 = vcmp.eq.s32.totalorder %v2112_v3, %v9051_v24 }
 0x252   :  { %v9220_v54 = vadd.f32 %v2042_v39, %v8589_v6  ;;  %3463 = vmatpush1.bf16.msra.mxu1 %v11295_v21  ;;  %v11296_v6 = vpack.c.bf16 %v9040_v41, %v9037_v4  ;;  %v11299_v4 = vmov 0  ;;  %v2116_v39 = vadd.s32 168, %v8933_v28 }
 0x253   :  { %v2044_v23 = vpop.f32.mrf.mxu1  ;;  %3464 = vmatprep.subr.bf16.mxu1 %v11263_v11  ;;  %v11300_v4 = vsel %vm9248_vm3, 4294967295, %v11299_v4  ;;  %vm2256_vm9 = vcmp.eq.s32.totalorder %v2115_v61, %v8947_v34 }
 0x254   :  { %v11310_v23 = vmov 0 }
 0x255   :  { %v9230_v38 = vpop.f32.mrf.mxu1  ;;  %6862 = vmatmul.mubr.msk.bf16.gmra.mxu0 %vm6861_vm2, %v11262_v58  ;;  %vm2235_vm2 = vcmp.eq.s32.totalorder %v2110_v10, %v9016_v45  ;;  %v11307_v10 = vpack.c.bf16 %v8974_v19, %v8967_v2  ;;  %v11308_v2 = vmov 0 }
 0x256   :  { %3465 = vmatpush1.bf16.msra.mxu1 %v11296_v6  ;;  %6864 = vmatprep.mubr.msk.bf16.mxu0 %vm6863_vm4, %v11262_v58  ;;  %vm2244_vm4 = vcmp.eq.s32.totalorder %v2112_v3, %v8947_v34  ;;  %vm6865_vm5 = vmpackc.low %vm2235_vm2, %vm2231_vm0  ;;  %vm2241_vm2 = vcmp.eq.s32.totalorder %v2111_v46, %v9054_v20  ;;  %v2117_v6 = vadd.s32 176, %v8933_v28 }
 0x257   :  { %v2049_v25 = vpop.f32.mrf.mxu1  ;;  %3466 = vmatprep.subr.bf16.mxu1 %v11263_v11  ;;  %vm6867_vm11 = vmpackc.low %vm2244_vm4, %vm2240_vm13  ;;  %vm2245_vm13 = vcmp.eq.s32.totalorder %v2112_v3, %v9054_v20  ;;  %vm2239_vm4 = vcmp.eq.s32.totalorder %v2111_v46, %v9016_v45 }
 0x258   :  { %vm9271_vm0 = vmpackc.low %vm2246_vm1, %vm2242_vm12  ;;  %vm2252_vm12 = vcmp.eq.s32.totalorder %v2114_v36, %v8947_v34  ;;  %v2118_v25 = vadd.s32 184, %v8933_v28 }
 0x259   :  { %v9254_v41 = vpop.f32.mrf.mxu1  ;;  %v11304_v42 = vsel %vm9271_vm0, 4294967295, %v11303_v42  ;;  %vm9280_vm3 = vmpackc.low %vm2245_vm13, %vm2241_vm2  ;;  %vm2250_vm2 = vcmp.eq.s32.totalorder %v2113_v53, %v9051_v24  ;;  %vm2254_vm13 = vcmp.eq.s32.totalorder %v2114_v36, %v9051_v24 }
 0x25a   :  { %3467 = vmatpush1.bf16.msra.mxu1 %v11301_v37  ;;  %v11306_v13 = vsel %vm9280_vm3, 4294967295, %v11305_v13  ;;  %vm9300_vm3 = vmpackc.low %vm2254_vm13, %vm2250_vm2 }
 0x25b   :  { %v2052_v50 = vpop.f32.mrf.mxu1  ;;  %3468 = vmatprep.subr.bf16.mxu1 %v11263_v11  ;;  %v11309_v2 = vsel %vm9300_vm3, 4294967295, %v11308_v2  ;;  %vm2264_vm3 = vcmp.eq.s32.totalorder %v2117_v6, %v8947_v34 }
 0x25c   :  { %v11312_v50 = vmov 0 }
 0x25d   :  { %v9262_v14 = vpop.f32.mrf.mxu1  ;;  %6866 = vmatmul.mubr.msk.bf16.gmra.mxu0 %vm6865_vm5, %v11262_v58  ;;  %vm2243_vm5 = vcmp.eq.s32.totalorder %v2112_v3, %v9016_v45 }
 0x25e   :  { %3469 = vmatpush1.bf16.msra.mxu1 %v11302_v0  ;;  %6868 = vmatprep.mubr.msk.bf16.mxu0 %vm6867_vm11, %v11262_v58  ;;  %vm2248_vm11 = vcmp.eq.s32.totalorder %v2113_v53, %v8947_v34  ;;  %vm6869_vm1 = vmpackc.low %vm2243_vm5, %vm2239_vm4  ;;  %vm2249_vm4 = vcmp.eq.s32.totalorder %v2113_v53, %v9054_v20  ;;  %vm2253_vm5 = vcmp.eq.s32.totalorder %v2114_v36, %v9054_v20 }
 0x25f   :  { %v2057_v5 = vpop.f32.mrf.mxu1  ;;  %3470 = vmatprep.subr.bf16.mxu1 %v11263_v11  ;;  %vm6871_vm0 = vmpackc.low %vm2252_vm12, %vm2248_vm11  ;;  %vm2247_vm11 = vcmp.eq.s32.totalorder %v2113_v53, %v9016_v45  ;;  %vm2251_vm12 = vcmp.eq.s32.totalorder %v2114_v36, %v9016_v45  ;;  %v11315_v36 = vmov 0 }
 0x260   :  { %vm6873_vm2 = vmpackc.low %vm2251_vm12, %vm2247_vm11  ;;  %vm2261_vm11 = vcmp.eq.s32.totalorder %v2116_v39, %v9054_v20  ;;  %vm2255_vm12 = vcmp.eq.s32.totalorder %v2115_v61, %v9016_v45 }
 0x261   :  { %v9286_v33 = vpop.f32.mrf.mxu1 }
 0x262   :  { %3471 = vmatpush1.bf16.msra.mxu1 %v11307_v10  ;;  %v2119_v10 = vadd.s32 192, %v8933_v28 }
 0x263   :  { %v2060_v30 = vpop.f32.mrf.mxu1  ;;  %3472 = vmatprep.subr.bf16.mxu1 %v11263_v11 }
 0x264   :  { %v2120_v30 = vadd.s32 200, %v8933_v28 }
 0x265   :  { %v9294_v21 = vpop.f32.mrf.mxu1  ;;  %6870 = vmatmul.mubr.msk.bf16.gmra.mxu0 %vm6869_vm1, %v11262_v58  ;;  %vm9308_vm1 = vmpackc.low %vm2253_vm5, %vm2249_vm4  ;;  %vm2258_vm4 = vcmp.eq.s32.totalorder %v2115_v61, %v9051_v24  ;;  %vm2262_vm5 = vcmp.eq.s32.totalorder %v2116_v39, %v9051_v24 }
 0x266   :  { %6872 = vmatprep.mubr.msk.bf16.mxu0 %vm6871_vm0, %v11262_v58  ;;  %v11311_v23 = vsel %vm9308_vm1, 4294967295, %v11310_v23  ;;  %vm2260_vm0 = vcmp.eq.s32.totalorder %v2116_v39, %v8947_v34  ;;  %vm9324_vm1 = vmpackc.low %vm2262_vm5, %vm2258_vm4 }
 0x267   :  { %v2065_v19 = vpop.f32.mrf.mxu1  ;;  %vm6875_vm13 = vmpackc.low %vm2260_vm0, %vm2256_vm9  ;;  %v11313_v50 = vsel %vm9324_vm1, 4294967295, %v11312_v50  ;;  %vm2257_vm9 = vcmp.eq.s32.totalorder %v2115_v61, %v9054_v20  ;;  %vm2259_vm0 = vcmp.eq.s32.totalorder %v2116_v39, %v9016_v45  ;;  %v11318_v39 = vmov 0 }
 0x268   :  { %11314 = vst [vmem:[#allocation6_spill] sm:$0xff] %v11313_v50  ;;  %vm6877_vm4 = vmpackc.low %vm2259_vm0, %vm2255_vm12  ;;  %vm2265_vm12 = vcmp.eq.s32.totalorder %v2117_v6, %v9054_v20  ;;  %vm2263_vm0 = vcmp.eq.s32.totalorder %v2117_v6, %v9016_v45  ;;  %vm2272_vm1 = vcmp.eq.s32.totalorder %v2119_v10, %v8947_v34  ;;  %v2124_v50 = vadd.s32 232, %v8933_v28 }
 0x269   :  { %v9314_v46 = vpop.f32.mrf.mxu1 }
 0x26b   :  { %v2068_v3 = vpop.f32.mrf.mxu1 }
 0x26c   :  { %v11321_v3 = vmov 0 }
 0x26d   :  { %v9318_v37 = vpop.f32.mrf.mxu1  ;;  %6874 = vmatmul.mubr.msk.bf16.gmra.mxu0 %vm6873_vm2, %v11262_v58  ;;  %vm9332_vm2 = vmpackc.low %vm2261_vm11, %vm2257_vm9  ;;  %vm2266_vm9 = vcmp.eq.s32.totalorder %v2117_v6, %v9051_v24  ;;  %vm2270_vm11 = vcmp.eq.s32.totalorder %v2118_v25, %v9051_v24  ;;  %v11324_v6 = vmov 0 }
 0x26e   :  { %6876 = vmatprep.mubr.msk.bf16.mxu0 %vm6875_vm13, %v11262_v58  ;;  %v11316_v36 = vsel %vm9332_vm2, 4294967295, %v11315_v36  ;;  %vm2268_vm13 = vcmp.eq.s32.totalorder %v2118_v25, %v8947_v34  ;;  %vm9346_vm2 = vmpackc.low %vm2270_vm11, %vm2266_vm9 }
 0x26f   :  { %v2073_v53 = vpop.f32.mrf.mxu1  ;;  %11317 = vst [vmem:[#allocation7_spill] sm:$0xff] %v11316_v36  ;;  %vm6879_vm5 = vmpackc.low %vm2268_vm13, %vm2264_vm3  ;;  %v11319_v39 = vsel %vm9346_vm2, 4294967295, %v11318_v39  ;;  %vm2269_vm3 = vcmp.eq.s32.totalorder %v2118_v25, %v9054_v20  ;;  %vm2267_vm13 = vcmp.eq.s32.totalorder %v2118_v25, %v9016_v45  ;;  %vm2280_vm2 = vcmp.eq.s32.totalorder %v2121_v43, %v8947_v34 }
 0x270   :  { %11320 = vst [vmem:[#allocation8_spill] sm:$0xff] %v11319_v39  ;;  %vm6881_vm9 = vmpackc.low %vm2267_vm13, %vm2263_vm0  ;;  %vm2273_vm0 = vcmp.eq.s32.totalorder %v2119_v10, %v9054_v20  ;;  %vm2271_vm13 = vcmp.eq.s32.totalorder %v2119_v10, %v9016_v45 }
 0x271   :  { %v9338_v0 = vpop.f32.mrf.mxu1 }
 0x273   :  { %v2076_v5 = vpop.f32.mrf.mxu1 }
 0x275   :  { %v2079_v61 = vpop.f32.mrf.mxu1  ;;  %6878 = vmatmul.mubr.msk.bf16.gmra.mxu0 %vm6877_vm4, %v11262_v58  ;;  %vm9354_vm4 = vmpackc.low %vm2269_vm3, %vm2265_vm12  ;;  %vm2274_vm12 = vcmp.eq.s32.totalorder %v2119_v10, %v9051_v24  ;;  %vm2278_vm3 = vcmp.eq.s32.totalorder %v2120_v30, %v9051_v24 }
 0x276   :  { %6880 = vmatprep.mubr.msk.bf16.mxu0 %vm6879_vm5, %v11262_v58  ;;  %v11322_v3 = vsel %vm9354_vm4, 4294967295, %v11321_v3  ;;  %vm2276_vm5 = vcmp.eq.s32.totalorder %v2120_v30, %v8947_v34  ;;  %vm9366_vm4 = vmpackc.low %vm2278_vm3, %vm2274_vm12 }
 0x277   :  { %v2081_v19 = vpop.f32.mrf.mxu1  ;;  %11323 = vst [vmem:[#allocation9_spill] sm:$0xff] %v11322_v3  ;;  %vm6883_vm11 = vmpackc.low %vm2276_vm5, %vm2272_vm1  ;;  %v11325_v6 = vsel %vm9366_vm4, 4294967295, %v11324_v6  ;;  %vm2277_vm1 = vcmp.eq.s32.totalorder %v2120_v30, %v9054_v20  ;;  %vm2275_vm5 = vcmp.eq.s32.totalorder %v2120_v30, %v9016_v45  ;;  %v2123_v30 = vadd.s32 224, %v8933_v28 }
 0x278   :  { %v2122_v19 = vadd.s32 216, %v8933_v28  ;;  %11326 = vst [vmem:[#allocation10_spill] sm:$0xff] %v11325_v6  ;;  %vm6885_vm12 = vmpackc.low %vm2275_vm5, %vm2271_vm13 }
 0x279   :  { %v2082_v53 = vpop.f32.mrf.mxu1 }
 0x27a   :  { %v2083_v10 = vadd.f32 %v2082_v53, %v8678_v56  ;;  %vm2285_vm5 = vcmp.eq.s32.totalorder %v2122_v19, %v9054_v20  ;;  %v11331_v56 = vmov 0  ;;  %v7343_v53 = vld [vmem:[%s11227_s3 + $0x30] sm:$0xff]  }
 0x27b   :  { %v2084_v5 = vpop.f32.mrf.mxu1 }
 0x27c   :  { %v11327_v5 = vmov 0 }
 0x27d   :  { %v2087_v31 = vpop.f32.mrf.mxu1  ;;  %6882 = vmatmul.mubr.msk.bf16.gmra.mxu0 %vm6881_vm9, %v11262_v58  ;;  %vm9374_vm9 = vmpackc.low %vm2277_vm1, %vm2273_vm0  ;;  %vm2282_vm0 = vcmp.eq.s32.totalorder %v2121_v43, %v9051_v24  ;;  %vm2286_vm1 = vcmp.eq.s32.totalorder %v2122_v19, %v9051_v24 }
 0x27e   :  { %6884 = vmatprep.mubr.msk.bf16.mxu0 %vm6883_vm11, %v11262_v58  ;;  %v11328_v5 = vsel %vm9374_vm9, 4294967295, %v11327_v5  ;;  %vm2284_vm11 = vcmp.eq.s32.totalorder %v2122_v19, %v8947_v34  ;;  %v2088_v6 = vadd.f32 %v2087_v31, %v8690_v63  ;;  %v2080_v63 = vadd.f32 %v2079_v61, %v8672_v52  ;;  %vm9390_vm13 = vmpackc.low %vm2286_vm1, %vm2282_vm0 }
 0x27f   :  { %v2089_v25 = vpop.f32.mrf.mxu1  ;;  %vm6887_vm3 = vmpackc.low %vm2284_vm11, %vm2280_vm2  ;;  %vm2281_vm2 = vcmp.eq.s32.totalorder %v2121_v43, %v9054_v20  ;;  %vm2279_vm11 = vcmp.eq.s32.totalorder %v2121_v43, %v9016_v45  ;;  %v2075_v52 = vadd.f32 %v9338_v0, %v8660_v48  ;;  %vm2292_vm0 = vcmp.eq.s32.totalorder %v2124_v50, %v8947_v34  ;;  %v7342_v0 = vld [vmem:[%s11227_s3 + $0x38] sm:$0xff]  }
 0x280   :  { %vm9399_vm9 = vmpackc.low %vm2285_vm5, %vm2281_vm2  ;;  %v3165_v31 = vpack.c.bf16 %v2083_v10, %v2080_v63  ;;  %v2067_v43 = vadd.f32 %v9314_v46, %v8642_v32  ;;  %v2126_v48 = vadd.s32 248, %v8933_v28  ;;  %vm2290_vm2 = vcmp.eq.s32.totalorder %v2123_v30, %v9051_v24  ;;  %4364 = vmatpush1.bf16.msra.mxu0 %v7342_v0 }
 0x281   :  { %v2090_v3 = vpop.f32.mrf.mxu1  ;;  %v11332_v56 = vsel %vm9399_vm9, 4294967295, %v11331_v56  ;;  %vm2294_vm5 = vcmp.eq.s32.totalorder %v2124_v50, %v9051_v24  ;;  %v11333_v32 = vmov 0  ;;  %v11335_v46 = vmov 0  ;;  %4365 = vmatprep.subr.bf16.mxu0 %v11263_v11 }
 0x282   :  { %v2091_v39 = vadd.f32 %v2090_v3, %v8696_v22  ;;  %v11329_v22 = vmov 0  ;;  %v2128_v3 = vadd.s32 264, %v8933_v28  ;;  %v2132_v10 = vadd.s32 296, %v8933_v28 }
 0x283   :  { %v2092_v36 = vpop.f32.mrf.mxu1  ;;  %v11330_v22 = vsel %vm9390_vm13, 4294967295, %v11329_v22  ;;  %v2140_v0 = vadd.s32 360, %v8933_v28 }
 0x284   :  { %v3166_v25 = vpack.c.bf16 %v2091_v39, %v2088_v6  ;;  %v2072_v36 = vadd.f32 %v9318_v37, %v8654_v44  ;;  %v2125_v39 = vadd.s32 240, %v8933_v28  ;;  %v2064_v44 = vadd.f32 %v9294_v21, %v8636_v18  ;;  %4366 = vmatpush1.bf16.msra.mxu0 %v7343_v53  ;;  %v7354_v53 = vld [vmem:[%s11227_s3 + $0x58] sm:$0xff]  }
 0x285   :  { %6886 = vmatmul.mubr.msk.bf16.gmra.mxu0 %vm6885_vm12, %v11262_v58  ;;  %vm2283_vm12 = vcmp.eq.s32.totalorder %v2122_v19, %v9016_v45  ;;  %v2059_v18 = vadd.f32 %v9286_v33, %v8624_v12  ;;  %v2056_v37 = vadd.f32 %v9262_v14, %v8620_v17  ;;  %v2127_v33 = vadd.s32 256, %v8933_v28  ;;  %4367 = vmatprep.subr.bf16.mxu0 %v11263_v11 }
 0x286   :  { %3473 = vmatpush2.bf16.msra.mxu1 %v3166_v25  ;;  %6888 = vmatprep.mubr.msk.bf16.mxu0 %vm6887_vm3, %v11262_v58  ;;  %vm2288_vm3 = vcmp.eq.s32.totalorder %v2123_v30, %v8947_v34  ;;  %vm6889_vm1 = vmpackc.low %vm2283_vm12, %vm2279_vm11  ;;  %v3164_v61 = vpack.c.bf16 %v2075_v52, %v2072_v36  ;;  %vm2289_vm12 = vcmp.eq.s32.totalorder %v2123_v30, %v9054_v20  ;;  %v11337_v14 = vmov 0 }
 0x287   :  { %3474 = vmatprep.subr.bf16.mxu1 %v11263_v11  ;;  %vm6891_vm13 = vmpackc.low %vm2292_vm0, %vm2288_vm3  ;;  %vm2293_vm3 = vcmp.eq.s32.totalorder %v2124_v50, %v9054_v20  ;;  %vm2287_vm0 = vcmp.eq.s32.totalorder %v2123_v30, %v9016_v45  ;;  %v3163_v21 = vpack.c.bf16 %v2067_v43, %v2064_v44  ;;  %v3162_v12 = vpack.c.bf16 %v2059_v18, %v2056_v37  ;;  %v7344_v30 = vld [vmem:[%s11227_s3 + $0x28] sm:$0xff]  }
 0x288   :  { %vm9423_vm11 = vmpackc.low %vm2294_vm5, %vm2290_vm2  ;;  %vm2300_vm2 = vcmp.eq.s32.totalorder %v2126_v48, %v8947_v34  ;;  %v2048_v17 = vadd.f32 %v9230_v38, %v8601_v7  ;;  %v2129_v38 = vadd.s32 272, %v8933_v28  ;;  %v11341_v19 = vpack.c.bf16 %v9220_v54, %v9217_v49  ;;  %4368 = vmatpush1.bf16.msra.mxu0 %v7344_v30  ;;  %v7348_v44 = vld [vmem:[%s11227_s3 + $0x8] sm:$0xff]  }
 0x289   :  { %v11334_v32 = vsel %vm9423_vm11, 4294967295, %v11333_v32  ;;  %vm9432_vm9 = vmpackc.low %vm2293_vm3, %vm2289_vm12  ;;  %vm2298_vm3 = vcmp.eq.s32.totalorder %v2125_v39, %v9051_v24  ;;  %v11342_v6 = vmov 0  ;;  %v2131_v54 = vadd.s32 288, %v8933_v28  ;;  %4369 = vmatprep.subr.bf16.mxu0 %v11263_v11 }
 0x28a   :  { %3475 = vmatpush2.bf16.msra.mxu1 %v3165_v31  ;;  %v11336_v46 = vsel %vm9432_vm9, 4294967295, %v11335_v46  ;;  %vm2302_vm9 = vcmp.eq.s32.totalorder %v2126_v48, %v9051_v24  ;;  %v2134_v25 = vadd.s32 312, %v8933_v28  ;;  %v2136_v52 = vadd.s32 328, %v8933_v28 }
 0x28b   :  { %3476 = vmatprep.subr.bf16.mxu1 %v11263_v11  ;;  %v11356_v31 = vmov 0  ;;  %v2137_v36 = vadd.s32 336, %v8933_v28  ;;  %v2138_v43 = vadd.s32 344, %v8933_v28  ;;  %v11368_v18 = vmov 0 }
 0x28c   :  { %4370 = vmatpush1.bf16.msra.mxu0 %v7345_v60  ;;  %v2142_v37 = vadd.s32 376, %v8933_v28  ;;  %v2149_v30 = vadd.s32 432, %v8933_v28 }
 0x28d   :  { %6890 = vmatmul.mubr.msk.bf16.gmra.mxu0 %vm6889_vm1, %v11262_v58  ;;  %vm2291_vm1 = vcmp.eq.s32.totalorder %v2124_v50, %v9016_v45  ;;  %v2051_v50 = vadd.f32 %v9254_v41, %v8609_v9  ;;  %v11339_v9 = vmov 0  ;;  %v2130_v41 = vadd.s32 280, %v8933_v28  ;;  %4371 = vmatprep.subr.bf16.mxu0 %v11263_v11 }
 0x28e   :  { %3477 = vmatpush2.bf16.msra.mxu1 %v3164_v61  ;;  %6892 = vmatprep.mubr.msk.bf16.mxu0 %vm6891_vm13, %v11262_v58  ;;  %vm2296_vm13 = vcmp.eq.s32.totalorder %v2125_v39, %v8947_v34  ;;  %vm6893_vm5 = vmpackc.low %vm2291_vm1, %vm2287_vm0  ;;  %vm2297_vm1 = vcmp.eq.s32.totalorder %v2125_v39, %v9054_v20  ;;  %v7346_v61 = vld [vmem:[%s11227_s3 + $0x18] sm:$0xff]  }
 0x28f   :  { %3478 = vmatprep.subr.bf16.mxu1 %v11263_v11  ;;  %vm6895_vm12 = vmpackc.low %vm2300_vm2, %vm2296_vm13  ;;  %vm2301_vm13 = vcmp.eq.s32.totalorder %v2126_v48, %v9054_v20  ;;  %vm2295_vm2 = vcmp.eq.s32.totalorder %v2125_v39, %v9016_v45  ;;  %v3161_v7 = vpack.c.bf16 %v2051_v50, %v2048_v17  ;;  %v11362_v39 = vmov 0  ;;  %v7350_v50 = vld [vmem:[%s11227_s3 + $0x78] sm:$0xff]   ;;  %v7352_v17 = vld [vmem:[%s11227_s3 + $0x68] sm:$0xff]  }
 0x290   :  { %vm9454_vm0 = vmpackc.low %vm2302_vm9, %vm2298_vm3  ;;  %vm2304_vm9 = vcmp.eq.s32.totalorder %v2127_v33, %v8947_v34  ;;  %4372 = vmatpush1.bf16.msra.mxu0 %v7346_v61 }
 0x291   :  { %v11338_v14 = vsel %vm9454_vm0, 4294967295, %v11337_v14  ;;  %vm9463_vm11 = vmpackc.low %vm2301_vm13, %vm2297_vm1  ;;  %vm2306_vm13 = vcmp.eq.s32.totalorder %v2127_v33, %v9051_v24  ;;  %vm2303_vm1 = vcmp.eq.s32.totalorder %v2127_v33, %v9016_v45  ;;  %4373 = vmatprep.subr.bf16.mxu0 %v11263_v11 }
 0x292   :  { %3479 = vmatpush2.bf16.msra.mxu1 %v3163_v21  ;;  %v11340_v9 = vsel %vm9463_vm11, 4294967295, %v11339_v9  ;;  %vm2307_vm11 = vcmp.eq.s32.totalorder %v2128_v3, %v9016_v45  ;;  %v2141_v21 = vadd.s32 368, %v8933_v28 }
 0x293   :  { %3480 = vmatprep.subr.bf16.mxu1 %v11263_v11  ;;  %vm6901_vm14 = vmpackc.low %vm2307_vm11, %vm2303_vm1  ;;  %vm2313_vm1 = vcmp.eq.s32.totalorder %v2129_v38, %v9054_v20 }
 0x295   :  { %6894 = vmatmul.mubr.msk.bf16.gmra.mxu0 %vm6893_vm5, %v11262_v58  ;;  %vm2299_vm5 = vcmp.eq.s32.totalorder %v2126_v48, %v9016_v45  ;;  %v2139_v48 = vadd.s32 352, %v8933_v28 }
 0x296   :  { %3481 = vmatpush2.bf16.msra.mxu1 %v3162_v12  ;;  %6896 = vmatprep.mubr.msk.bf16.mxu0 %vm6895_vm12, %v11262_v58  ;;  %vm2308_vm12 = vcmp.eq.s32.totalorder %v2128_v3, %v8947_v34  ;;  %vm6897_vm3 = vmpackc.low %vm2299_vm5, %vm2295_vm2  ;;  %vm2310_vm2 = vcmp.eq.s32.totalorder %v2128_v3, %v9051_v24  ;;  %vm2181_vm5 = vcmp.eq.s32.totalorder %v8941_v26, %v9054_v20  ;;  %v11374_v12 = vmov 0 }
 0x297   :  { %3482 = vmatprep.subr.bf16.mxu1 %v11263_v11  ;;  %vm6899_vm0 = vmpackc.low %vm2308_vm12, %vm2304_vm9  ;;  %vm2305_vm12 = vcmp.eq.s32.totalorder %v2127_v33, %v9054_v20  ;;  %v11347_v26 = vpack.c.bf16 %v9190_v35, %v9187_v55  ;;  %v2143_v33 = vadd.s32 384, %v8933_v28 }
 0x298   :  { %vm9486_vm9 = vmpackc.low %vm2310_vm2, %vm2306_vm13  ;;  %vm2316_vm13 = vcmp.eq.s32.totalorder %v2130_v41, %v8947_v34  ;;  %vm11346_vm2 = vcmp.eq.s32.totalorder %v8933_v28, %v9054_v20 }
 0x299   :  { %v11343_v6 = vsel %vm9486_vm9, 4294967295, %v11342_v6  ;;  %vm6965_vm9 = vmpackc.low %vm2181_vm5, %vm11346_vm2  ;;  %vm2318_vm5 = vcmp.eq.s32.totalorder %v2130_v41, %v9051_v24  ;;  %vm2324_vm2 = vcmp.eq.s32.totalorder %v2132_v10, %v8947_v34 }
 0x29a   :  { %3483 = vmatpush2.bf16.msra.mxu1 %v3161_v7  ;;  %v11380_v7 = vmov 0 }
 0x29b   :  { %3484 = vmatprep.subr.bf16.mxu1 %v11263_v11 }
 0x29d   :  { %6898 = vmatmul.mubr.msk.bf16.gmra.mxu0 %vm6897_vm3, %v11262_v58  ;;  %vm2309_vm3 = vcmp.eq.s32.totalorder %v2128_v3, %v9054_v20  ;;  %v2144_v3 = vadd.s32 392, %v8933_v28 }
 0x29e   :  { %3485 = vmatpush2.bf16.msra.mxu1 %v11341_v19  ;;  %6900 = vmatprep.mubr.msk.bf16.mxu0 %vm6899_vm0, %v11262_v58  ;;  %vm9495_vm4 = vmpackc.low %vm2309_vm3, %vm2305_vm12  ;;  %vm2312_vm0 = vcmp.eq.s32.totalorder %v2129_v38, %v8947_v34  ;;  %vm2314_vm3 = vcmp.eq.s32.totalorder %v2129_v38, %v9051_v24  ;;  %v11386_v19 = vmov 0 }
 0x29f   :  { %3486 = vmatprep.subr.bf16.mxu1 %v11263_v11  ;;  %vm6903_vm12 = vmpackc.low %vm2316_vm13, %vm2312_vm0  ;;  %vm2315_vm0 = vcmp.eq.s32.totalorder %v2130_v41, %v9016_v45 }
 0x2a0   :  { %vm9518_vm11 = vmpackc.low %vm2318_vm5, %vm2314_vm3  ;;  %vm2322_vm5 = vcmp.eq.s32.totalorder %v2131_v54, %v9051_v24 }
 0x2a2   :  { %3487 = vmatpush2.bf16.msra.mxu1 %v11347_v26  ;;  %v2148_v26 = vadd.s32 424, %v8933_v28 }
 0x2a5   :  { %6966 = vmatmul.mubr.msk.bf16.vlgmr.msra.gmra.mxu1 %vm6965_vm9, %v11262_v58  ;;  %6902 = vmatmul.mubr.msk.bf16.gmra.mxu0 %vm6901_vm14, %v11262_v58  ;;  %vm2317_vm9 = vcmp.eq.s32.totalorder %v2130_v41, %v9054_v20  ;;  %vm2311_vm14 = vcmp.eq.s32.totalorder %v2129_v38, %v9016_v45  ;;  %v2145_v38 = vadd.s32 400, %v8933_v28  ;;  %v2146_v41 = vadd.s32 408, %v8933_v28 }
 0x2a6   :  { %6968 = vmatprep.mubr.msk.bf16.mxu1 %vm9081_vm6, %v11262_v58  ;;  %6904 = vmatprep.mubr.msk.bf16.mxu0 %vm6903_vm12, %v11262_v58  ;;  %vm9526_vm13 = vmpackc.low %vm2317_vm9, %vm2313_vm1  ;;  %vm2320_vm6 = vcmp.eq.s32.totalorder %v2131_v54, %v8947_v34  ;;  %vm2326_vm1 = vcmp.eq.s32.totalorder %v2132_v10, %v9051_v24 }
 0x2a7   :  { %vm6905_vm12 = vmpackc.low %vm2315_vm0, %vm2311_vm14  ;;  %vm2325_vm14 = vcmp.eq.s32.totalorder %v2132_v10, %v9054_v20  ;;  %vm2319_vm0 = vcmp.eq.s32.totalorder %v2131_v54, %v9016_v45 }
 0x2a8   :  { %vm6907_vm3 = vmpackc.low %vm2324_vm2, %vm2320_vm6  ;;  %vm2323_vm6 = vcmp.eq.s32.totalorder %v2132_v10, %v9016_v45 }
 0x2a9   :  { %vm9547_vm9 = vmpackc.low %vm2326_vm1, %vm2322_vm5  ;;  %vm2330_vm1 = vcmp.eq.s32.totalorder %v2133_v27, %v9051_v24 }
 0x2ad   :  { %6970 = vmatmul.mubr.msk.bf16.gmra.mxu1 %vm9085_vm7, %v11262_v58  ;;  %6906 = vmatmul.mubr.msk.bf16.gmra.mxu0 %vm6905_vm12, %v11262_v58  ;;  %vm2321_vm7 = vcmp.eq.s32.totalorder %v2131_v54, %v9054_v20  ;;  %vm2332_vm12 = vcmp.eq.s32.totalorder %v2134_v25, %v8947_v34 }
 0x2ae   :  { %6972 = vmatprep.mubr.msk.bf16.mxu1 %vm9101_vm10, %v11262_v58  ;;  %6908 = vmatprep.mubr.msk.bf16.mxu0 %vm6907_vm3, %v11262_v58  ;;  %vm9555_vm2 = vmpackc.low %vm2325_vm14, %vm2321_vm7  ;;  %vm2328_vm10 = vcmp.eq.s32.totalorder %v2133_v27, %v8947_v34  ;;  %vm2334_vm7 = vcmp.eq.s32.totalorder %v2134_v25, %v9051_v24 }
 0x2af   :  { %v11355_v15 = vsel %vm9555_vm2, 4294967295, %v11354_v15  ;;  %vm6909_vm3 = vmpackc.low %vm2323_vm6, %vm2319_vm0  ;;  %vm2333_vm0 = vcmp.eq.s32.totalorder %v2134_v25, %v9054_v20  ;;  %vm2327_vm6 = vcmp.eq.s32.totalorder %v2133_v27, %v9016_v45  ;;  %vm11427_vm2 = vnez %v11336_v46  ;;  %v7364_v46 = vld [vmem:[%s11226_s2 + $0x30] sm:$0xff]  }
 0x2b0   :  { %vm6911_vm5 = vmpackc.low %vm2332_vm12, %vm2328_vm10  ;;  %vm2331_vm10 = vcmp.eq.s32.totalorder %v2134_v25, %v9016_v45 }
 0x2b1   :  { %vm9574_vm14 = vmpackc.low %vm2334_vm7, %vm2330_vm1  ;;  %vm11360_vm7 = vnez %v11282_v16  ;;  %v7347_v16 = vld [vmem:[%s11227_s3 + $0x10] sm:$0xff]  }
 0x2b2   :  { %v11357_v31 = vsel %vm9574_vm14, 4294967295, %v11356_v31  ;;  %4374 = vmatpush1.bf16.msra.mxu0 %v7347_v16 }
 0x2b3   :  { %4375 = vmatprep.subr.bf16.mxu0 %v11263_v11 }
 0x2b5   :  { %6974 = vmatmul.mubr.msk.bf16.gmra.mxu1 %vm9109_vm15, %v11262_v58  ;;  %6910 = vmatmul.mubr.msk.bf16.gmra.mxu0 %vm6909_vm3, %v11262_v58  ;;  %vm2329_vm15 = vcmp.eq.s32.totalorder %v2133_v27, %v9054_v20  ;;  %vm2340_vm3 = vcmp.eq.s32.totalorder %v2136_v52, %v8947_v34 }
 0x2b6   :  { %6976 = vmatprep.mubr.msk.bf16.mxu1 %vm9123_vm8, %v11262_v58  ;;  %6912 = vmatprep.mubr.msk.bf16.mxu0 %vm6911_vm5, %v11262_v58  ;;  %vm9585_vm12 = vmpackc.low %vm2333_vm0, %vm2329_vm15  ;;  %vm2336_vm8 = vcmp.eq.s32.totalorder %v2135_v57, %v8947_v34  ;;  %vm2338_vm15 = vcmp.eq.s32.totalorder %v2135_v57, %v9051_v24  ;;  %vm2342_vm0 = vcmp.eq.s32.totalorder %v2136_v52, %v9051_v24 }
 0x2b7   :  { %v11359_v40 = vsel %vm9585_vm12, 4294967295, %v11358_v40  ;;  %vm6913_vm5 = vmpackc.low %vm2331_vm10, %vm2327_vm6  ;;  %vm11361_vm6 = vnez %v11284_v1  ;;  %v11364_v1 = vmov 0  ;;  %4376 = vmatpush1.bf16.msra.mxu0 %v7348_v44  ;;  %vm2387_vm12 = vcmp.eq.s32.totalorder %v2148_v26, %v9016_v45  ;;  %v11399_v44 = vld [vmem:[#allocation7_spill] sm:$0xff] }
 0x2b8   :  { %vm6915_vm1 = vmpackc.low %vm2340_vm3, %vm2336_vm8  ;;  %vm2337_vm8 = vcmp.eq.s32.totalorder %v2135_v57, %v9054_v20  ;;  %vm2341_vm3 = vcmp.eq.s32.totalorder %v2136_v52, %v9054_v20  ;;  %4377 = vmatprep.subr.bf16.mxu0 %v11263_v11 }
 0x2b9   :  { %vm9607_vm10 = vmpackc.low %vm2342_vm0, %vm2338_vm15  ;;  %vm2348_vm15 = vcmp.eq.s32.totalorder %v2138_v43, %v8947_v34 }
 0x2ba   :  { %v11363_v39 = vsel %vm9607_vm10, 4294967295, %v11362_v39 }
 0x2bd   :  { %6978 = vmatmul.mubr.msk.bf16.gmra.mxu1 %vm11360_vm7, %v11262_v58  ;;  %6914 = vmatmul.mubr.msk.bf16.gmra.mxu0 %vm6913_vm5, %v11262_v58  ;;  %vm2335_vm5 = vcmp.eq.s32.totalorder %v2135_v57, %v9016_v45  ;;  %vm2339_vm7 = vcmp.eq.s32.totalorder %v2136_v52, %v9016_v45  ;;  %v2150_v57 = vadd.s32 440, %v8933_v28  ;;  %v7357_v52 = vld [vmem:[%s11227_s3 + $0x40] sm:$0xff]  }
 0x2be   :  { %6980 = vmatprep.mubr.msk.bf16.mxu1 %vm11361_vm6, %v11262_v58  ;;  %6916 = vmatprep.mubr.msk.bf16.mxu0 %vm6915_vm1, %v11262_v58  ;;  %vm9618_vm6 = vmpackc.low %vm2341_vm3, %vm2337_vm8  ;;  %vm2344_vm1 = vcmp.eq.s32.totalorder %v2137_v36, %v8947_v34  ;;  %vm11366_vm8 = vnez %v11286_v8  ;;  %vm2346_vm3 = vcmp.eq.s32.totalorder %v2137_v36, %v9051_v24  ;;  %v7349_v8 = vld [vmem:[%s11227_s3] sm:$0xff]  }
 0x2bf   :  { %v11365_v1 = vsel %vm9618_vm6, 4294967295, %v11364_v1  ;;  %vm6917_vm0 = vmpackc.low %vm2339_vm7, %vm2335_vm5  ;;  %vm2350_vm5 = vcmp.eq.s32.totalorder %v2138_v43, %v9051_v24  ;;  %vm11367_vm7 = vnez %v11288_v29  ;;  %vm2347_vm6 = vcmp.eq.s32.totalorder %v2138_v43, %v9016_v45  ;;  %4378 = vmatpush1.bf16.msra.mxu0 %v7349_v8 }
 0x2c0   :  { %vm6919_vm10 = vmpackc.low %vm2348_vm15, %vm2344_vm1  ;;  %vm2345_vm15 = vcmp.eq.s32.totalorder %v2137_v36, %v9054_v20  ;;  %v11370_v29 = vmov 0  ;;  %4379 = vmatprep.subr.bf16.mxu0 %v11263_v11 }
 0x2c1   :  { %vm9641_vm1 = vmpackc.low %vm2350_vm5, %vm2346_vm3  ;;  %vm2356_vm3 = vcmp.eq.s32.totalorder %v2140_v0, %v8947_v34 }
 0x2c2   :  { %v11369_v18 = vsel %vm9641_vm1, 4294967295, %v11368_v18 }
 0x2c3   :  { %4380 = vmatpush2.bf16.msra.mxu0 %v7350_v50 }
 0x2c4   :  { %4381 = vmatprep.subr.bf16.mxu0 %v11263_v11 }
 0x2c5   :  { %6982 = vmatmul.mubr.msk.bf16.gmra.mxu1 %vm11366_vm8, %v11262_v58  ;;  %6918 = vmatmul.mubr.msk.bf16.gmra.mxu0 %vm6917_vm0, %v11262_v58  ;;  %vm2349_vm0 = vcmp.eq.s32.totalorder %v2138_v43, %v9054_v20  ;;  %vm2343_vm8 = vcmp.eq.s32.totalorder %v2137_v36, %v9016_v45  ;;  %v11395_v36 = vld [vmem:[#allocation6_spill] sm:$0xff]  ;;  %v11397_v43 = vmov 0 }
 0x2c6   :  { %6984 = vmatprep.mubr.msk.bf16.mxu1 %vm11367_vm7, %v11262_v58  ;;  %6920 = vmatprep.mubr.msk.bf16.mxu0 %vm6919_vm10, %v11262_v58  ;;  %vm9652_vm7 = vmpackc.low %vm2349_vm0, %vm2345_vm15  ;;  %vm2352_vm10 = vcmp.eq.s32.totalorder %v2139_v48, %v8947_v34  ;;  %vm11372_vm15 = vnez %v11290_v47  ;;  %vm2358_vm0 = vcmp.eq.s32.totalorder %v2140_v0, %v9051_v24  ;;  %v7351_v47 = vld [vmem:[%s11227_s3 + $0x70] sm:$0xff]  }
 0x2c7   :  { %v11371_v29 = vsel %vm9652_vm7, 4294967295, %v11370_v29  ;;  %vm6921_vm5 = vmpackc.low %vm2347_vm6, %vm2343_vm8  ;;  %vm2354_vm6 = vcmp.eq.s32.totalorder %v2139_v48, %v9051_v24  ;;  %vm11373_vm8 = vnez %v11292_v59  ;;  %vm2355_vm7 = vcmp.eq.s32.totalorder %v2140_v0, %v9016_v45  ;;  %4382 = vmatpush2.bf16.msra.mxu0 %v7351_v47 }
 0x2c8   :  { %vm6923_vm1 = vmpackc.low %vm2356_vm3, %vm2352_vm10  ;;  %vm2353_vm3 = vcmp.eq.s32.totalorder %v2139_v48, %v9054_v20  ;;  %v11376_v59 = vmov 0  ;;  %4383 = vmatprep.subr.bf16.mxu0 %v11263_v11  ;;  %v11405_v47 = vmov 0 }
 0x2c9   :  { %vm9675_vm10 = vmpackc.low %vm2358_vm0, %vm2354_vm6  ;;  %vm2364_vm6 = vcmp.eq.s32.totalorder %v2142_v37, %v8947_v34 }
 0x2ca   :  { %v11375_v12 = vsel %vm9675_vm10, 4294967295, %v11374_v12 }
 0x2cb   :  { %4384 = vmatpush2.bf16.msra.mxu0 %v7352_v17  ;;  %v2153_v17 = vadd.s32 464, %v8933_v28 }
 0x2cc   :  { %4385 = vmatprep.subr.bf16.mxu0 %v11263_v11 }
 0x2cd   :  { %6986 = vmatmul.mubr.msk.bf16.gmra.mxu1 %vm11372_vm15, %v11262_v58  ;;  %6922 = vmatmul.mubr.msk.bf16.gmra.mxu0 %vm6921_vm5, %v11262_v58  ;;  %vm2357_vm5 = vcmp.eq.s32.totalorder %v2140_v0, %v9054_v20  ;;  %vm2351_vm15 = vcmp.eq.s32.totalorder %v2139_v48, %v9016_v45  ;;  %v2151_v48 = vadd.s32 448, %v8933_v28  ;;  %v2152_v0 = vadd.s32 456, %v8933_v28 }
 0x2ce   :  { %6988 = vmatprep.mubr.msk.bf16.mxu1 %vm11373_vm8, %v11262_v58  ;;  %6924 = vmatprep.mubr.msk.bf16.mxu0 %vm6923_vm1, %v11262_v58  ;;  %vm9686_vm8 = vmpackc.low %vm2357_vm5, %vm2353_vm3  ;;  %vm2360_vm1 = vcmp.eq.s32.totalorder %v2141_v21, %v8947_v34  ;;  %vm11378_vm3 = vnez %v11294_v62  ;;  %vm2366_vm5 = vcmp.eq.s32.totalorder %v2142_v37, %v9051_v24  ;;  %v7353_v62 = vld [vmem:[%s11227_s3 + $0x60] sm:$0xff]  }
 0x2cf   :  { %v11377_v59 = vsel %vm9686_vm8, 4294967295, %v11376_v59  ;;  %vm6925_vm0 = vmpackc.low %vm2355_vm7, %vm2351_vm15  ;;  %vm2362_vm7 = vcmp.eq.s32.totalorder %v2141_v21, %v9051_v24  ;;  %vm11379_vm15 = vnez %v11298_v51  ;;  %vm2363_vm8 = vcmp.eq.s32.totalorder %v2142_v37, %v9016_v45  ;;  %4386 = vmatpush2.bf16.msra.mxu0 %v7353_v62 }
 0x2d0   :  { %vm6927_vm10 = vmpackc.low %vm2364_vm6, %vm2360_vm1  ;;  %vm2361_vm6 = vcmp.eq.s32.totalorder %v2141_v21, %v9054_v20  ;;  %v11382_v51 = vmov 0  ;;  %4387 = vmatprep.subr.bf16.mxu0 %v11263_v11  ;;  %v2154_v62 = vadd.s32 472, %v8933_v28 }
 0x2d1   :  { %vm9709_vm1 = vmpackc.low %vm2366_vm5, %vm2362_vm7  ;;  %vm2372_vm7 = vcmp.eq.s32.totalorder %v2144_v3, %v8947_v34 }
 0x2d2   :  { %v11381_v7 = vsel %vm9709_vm1, 4294967295, %v11380_v7 }
 0x2d3   :  { %4388 = vmatpush2.bf16.msra.mxu0 %v7354_v53  ;;  %v11409_v53 = vmov 0 }
 0x2d4   :  { %4389 = vmatprep.subr.bf16.mxu0 %v11263_v11 }
 0x2d5   :  { %6990 = vmatmul.mubr.msk.bf16.gmra.mxu1 %vm11378_vm3, %v11262_v58  ;;  %6926 = vmatmul.mubr.msk.bf16.gmra.mxu0 %vm6925_vm0, %v11262_v58  ;;  %vm2365_vm0 = vcmp.eq.s32.totalorder %v2142_v37, %v9054_v20  ;;  %vm2359_vm3 = vcmp.eq.s32.totalorder %v2141_v21, %v9016_v45  ;;  %v11401_v21 = vmov 0  ;;  %v11403_v37 = vld [vmem:[#allocation8_spill] sm:$0xff] }
 0x2d6   :  { %6992 = vmatprep.mubr.msk.bf16.mxu1 %vm11379_vm15, %v11262_v58  ;;  %6928 = vmatprep.mubr.msk.bf16.mxu0 %vm6927_vm10, %v11262_v58  ;;  %vm9720_vm15 = vmpackc.low %vm2365_vm0, %vm2361_vm6  ;;  %vm2368_vm10 = vcmp.eq.s32.totalorder %v2143_v33, %v8947_v34  ;;  %vm11384_vm6 = vnez %v11300_v4  ;;  %vm2374_vm0 = vcmp.eq.s32.totalorder %v2144_v3, %v9051_v24  ;;  %v7355_v4 = vld [vmem:[%s11227_s3 + $0x50] sm:$0xff]  }
 0x2d7   :  { %v11383_v51 = vsel %vm9720_vm15, 4294967295, %v11382_v51  ;;  %vm6929_vm5 = vmpackc.low %vm2363_vm8, %vm2359_vm3  ;;  %vm2370_vm8 = vcmp.eq.s32.totalorder %v2143_v33, %v9051_v24  ;;  %vm11385_vm3 = vnez %v11304_v42  ;;  %vm2380_vm15 = vcmp.eq.s32.totalorder %v2146_v41, %v8947_v34  ;;  %4390 = vmatpush2.bf16.msra.mxu0 %v7355_v4  ;;  %v11411_v4 = vld [vmem:[#allocation10_spill] sm:$0xff] }
 0x2d8   :  { %vm6931_vm1 = vmpackc.low %vm2372_vm7, %vm2368_vm10  ;;  %vm2367_vm7 = vcmp.eq.s32.totalorder %v2143_v33, %v9016_v45  ;;  %v2147_v42 = vadd.s32 416, %v8933_v28  ;;  %4391 = vmatprep.subr.bf16.mxu0 %v11263_v11 }
 0x2d9   :  { %vm9743_vm10 = vmpackc.low %vm2374_vm0, %vm2370_vm8  ;;  %vm11388_vm0 = vnez %v11306_v13  ;;  %v11390_v13 = vmov 0 }
 0x2da   :  { %v11387_v19 = vsel %vm9743_vm10, 4294967295, %v11386_v19 }
 0x2dd   :  { %6994 = vmatmul.mubr.msk.bf16.gmra.mxu1 %vm11384_vm6, %v11262_v58  ;;  %6930 = vmatmul.mubr.msk.bf16.gmra.mxu0 %vm6929_vm5, %v11262_v58  ;;  %vm2371_vm5 = vcmp.eq.s32.totalorder %v2144_v3, %v9016_v45  ;;  %vm2376_vm6 = vcmp.eq.s32.totalorder %v2145_v38, %v8947_v34 }
 0x2de   :  { %6996 = vmatprep.mubr.msk.bf16.mxu1 %vm11385_vm3, %v11262_v58  ;;  %6932 = vmatprep.mubr.msk.bf16.mxu0 %vm6931_vm1, %v11262_v58  ;;  %vm6933_vm1 = vmpackc.low %vm2371_vm5, %vm2367_vm7  ;;  %vm11389_vm3 = vnez %v11309_v2  ;;  %vm2373_vm7 = vcmp.eq.s32.totalorder %v2144_v3, %v9054_v20  ;;  %vm2375_vm5 = vcmp.eq.s32.totalorder %v2145_v38, %v9016_v45  ;;  %v7356_v2 = vld [vmem:[%s11227_s3 + $0x48] sm:$0xff]  }
 0x2df   :  { %vm6935_vm8 = vmpackc.low %vm2380_vm15, %vm2376_vm6  ;;  %vm2369_vm15 = vcmp.eq.s32.totalorder %v2143_v33, %v9054_v20  ;;  %vm2379_vm6 = vcmp.eq.s32.totalorder %v2146_v41, %v9016_v45  ;;  %4392 = vmatpush2.bf16.msra.mxu0 %v7356_v2 }
 0x2e0   :  { %4393 = vmatprep.subr.bf16.mxu0 %v11263_v11  ;;  %v11393_v11 = vmov 0 }
 0x2e3   :  { %4394 = vmatpush2.bf16.msra.mxu0 %v7357_v52  ;;  %v11416_v52 = vmov 0 }
 0x2e5   :  { %6998 = vmatmul.mubr.msk.bf16.gmra.mxu1 %vm11388_vm0, %v11262_v58  ;;  %v9761_v54 = vpop.f32.mrf.mxu0  ;;  %6934 = vmatmul.mubr.msk.bf16.gmra.mxu0 %vm6933_vm1, %v11262_v58  ;;  %vm9772_vm0 = vmpackc.low %vm2373_vm7, %vm2369_vm15  ;;  %vm2384_vm1 = vcmp.eq.s32.totalorder %v2147_v42, %v8947_v34  ;;  %vm2378_vm15 = vcmp.eq.s32.totalorder %v2145_v38, %v9051_v24  ;;  %vm2382_vm7 = vcmp.eq.s32.totalorder %v2146_v41, %v9051_v24 }
 0x2e6   :  { %7000 = vmatprep.mubr.msk.bf16.mxu1 %vm11389_vm3, %v11262_v58  ;;  %6936 = vmatprep.mubr.msk.bf16.mxu0 %vm6935_vm8, %v11262_v58  ;;  %v11391_v13 = vsel %vm9772_vm0, 4294967295, %v11390_v13  ;;  %vm2388_vm8 = vcmp.eq.s32.totalorder %v2148_v26, %v8947_v34  ;;  %vm6937_vm3 = vmpackc.low %vm2379_vm6, %vm2375_vm5  ;;  %vm11392_vm0 = vnez %v11311_v23  ;;  %vm11396_vm6 = vnez %v11395_v36 }
 0x2e7   :  { %v3203_v10 = vpop.f32.mrf.mxu0  ;;  %vm6939_vm10 = vmpackc.low %vm2388_vm8, %vm2384_vm1  ;;  %vm2377_vm1 = vcmp.eq.s32.totalorder %v2145_v38, %v9054_v20  ;;  %vm2381_vm8 = vcmp.eq.s32.totalorder %v2146_v41, %v9054_v20  ;;  %v11407_v38 = vld [vmem:[#allocation9_spill] sm:$0xff]  ;;  %v11419_v36 = vmov 0 }
 0x2e8   :  { %vm9797_vm5 = vmpackc.low %vm2382_vm7, %vm2378_vm15  ;;  %vm2392_vm15 = vcmp.eq.s32.totalorder %v2149_v30, %v8947_v34  ;;  %vm2396_vm7 = vcmp.eq.s32.totalorder %v2150_v57, %v8947_v34 }
 0x2e9   :  { %v9781_v27 = vpop.f32.mrf.mxu0  ;;  %v11394_v11 = vsel %vm9797_vm5, 4294967295, %v11393_v11  ;;  %vm2386_vm5 = vcmp.eq.s32.totalorder %v2147_v42, %v9051_v24 }
 0x2eb   :  { %v3206_v25 = vpop.f32.mrf.mxu0 }
 0x2ec   :  { %v2155_v25 = vadd.s32 480, %v8933_v28 }
 0x2ed   :  { %7002 = vmatmul.mubr.msk.bf16.gmra.mxu1 %vm11392_vm0, %v11262_v58  ;;  %v9794_v60 = vpop.f32.mrf.mxu0  ;;  %6938 = vmatmul.mubr.msk.bf16.gmra.mxu0 %vm6937_vm3, %v11262_v58  ;;  %vm2383_vm0 = vcmp.eq.s32.totalorder %v2147_v42, %v9016_v45  ;;  %vm9809_vm3 = vmpackc.low %vm2381_vm8, %vm2377_vm1  ;;  %vm2390_vm1 = vcmp.eq.s32.totalorder %v2148_v26, %v9051_v24  ;;  %vm11400_vm8 = vnez %v11399_v44  ;;  %v11422_v44 = vmov 0 }
 0x2ee   :  { %7004 = vmatprep.mubr.msk.bf16.mxu1 %vm11396_vm6, %v11262_v58  ;;  %6940 = vmatprep.mubr.msk.bf16.mxu0 %vm6939_vm10, %v11262_v58  ;;  %v11398_v43 = vsel %vm9809_vm3, 4294967295, %v11397_v43  ;;  %vm6941_vm10 = vmpackc.low %vm2387_vm12, %vm2383_vm0  ;;  %vm11404_vm12 = vnez %v11403_v37  ;;  %vm2385_vm0 = vcmp.eq.s32.totalorder %v2147_v42, %v9054_v20 }
 0x2ef   :  { %v3211_v23 = vpop.f32.mrf.mxu0  ;;  %vm6943_vm6 = vmpackc.low %vm2396_vm7, %vm2392_vm15  ;;  %vm2389_vm15 = vcmp.eq.s32.totalorder %v2148_v26, %v9054_v20  ;;  %vm2391_vm7 = vcmp.eq.s32.totalorder %v2149_v30, %v9016_v45  ;;  %v11413_v26 = vmov 0 }
 0x2f0   :  { %vm9827_vm3 = vmpackc.low %vm2390_vm1, %vm2386_vm5  ;;  %vm2400_vm5 = vcmp.eq.s32.totalorder %v2151_v48, %v8947_v34  ;;  %vm2404_vm1 = vcmp.eq.s32.totalorder %v2152_v0, %v8947_v34 }
 0x2f1   :  { %v9815_v61 = vpop.f32.mrf.mxu0  ;;  %v11402_v21 = vsel %vm9827_vm3, 4294967295, %v11401_v21  ;;  %vm2394_vm3 = vcmp.eq.s32.totalorder %v2149_v30, %v9051_v24 }
 0x2f3   :  { %v3214_v16 = vpop.f32.mrf.mxu0 }
 0x2f4   :  { %v2157_v16 = vadd.s32 496, %v8933_v28 }
 0x2f5   :  { %7006 = vmatmul.mubr.msk.bf16.gmra.mxu1 %vm11400_vm8, %v11262_v58  ;;  %v9824_v8 = vpop.f32.mrf.mxu0  ;;  %6942 = vmatmul.mubr.msk.bf16.gmra.mxu0 %vm6941_vm10, %v11262_v58  ;;  %vm2395_vm8 = vcmp.eq.s32.totalorder %v2150_v57, %v9016_v45  ;;  %vm9839_vm10 = vmpackc.low %vm2389_vm15, %vm2385_vm0  ;;  %vm2398_vm0 = vcmp.eq.s32.totalorder %v2150_v57, %v9051_v24  ;;  %vm11408_vm15 = vnez %v11407_v38 }
 0x2f6   :  { %7008 = vmatprep.mubr.msk.bf16.mxu1 %vm11404_vm12, %v11262_v58  ;;  %6944 = vmatprep.mubr.msk.bf16.mxu0 %vm6943_vm6, %v11262_v58  ;;  %v11406_v47 = vsel %vm9839_vm10, 4294967295, %v11405_v47  ;;  %vm6945_vm6 = vmpackc.low %vm2395_vm8, %vm2391_vm7  ;;  %vm11412_vm7 = vnez %v11411_v4  ;;  %vm2393_vm8 = vcmp.eq.s32.totalorder %v2149_v30, %v9054_v20  ;;  %v2156_v30 = vadd.s32 488, %v8933_v28 }
 0x2f7   :  { %v3219_v50 = vpop.f32.mrf.mxu0  ;;  %vm6947_vm12 = vmpackc.low %vm2404_vm1, %vm2400_vm5  ;;  %vm2397_vm5 = vcmp.eq.s32.totalorder %v2150_v57, %v9054_v20  ;;  %vm2399_vm1 = vcmp.eq.s32.totalorder %v2151_v48, %v9016_v45 }
 0x2f8   :  { %vm9857_vm10 = vmpackc.low %vm2398_vm0, %vm2394_vm3  ;;  %vm2408_vm3 = vcmp.eq.s32.totalorder %v2153_v17, %v8947_v34  ;;  %vm2412_vm0 = vcmp.eq.s32.totalorder %v2154_v62, %v8947_v34  ;;  %vm2422_vm14 = vcmp.eq.s32.totalorder %v2156_v30, %v9051_v24 }
 0x2f9   :  { %v9845_v33 = vpop.f32.mrf.mxu0  ;;  %v11410_v53 = vsel %vm9857_vm10, 4294967295, %v11409_v53  ;;  %vm2402_vm10 = vcmp.eq.s32.totalorder %v2151_v48, %v9051_v24 }
 0x2fb   :  { %v3222_v3 = vpop.f32.mrf.mxu0 }
 0x2fd   :  { %7010 = vmatmul.mubr.msk.bf16.gmra.mxu1 %vm11408_vm15, %v11262_v58  ;;  %v9854_v41 = vpop.f32.mrf.mxu0  ;;  %6946 = vmatmul.mubr.msk.bf16.gmra.mxu0 %vm6945_vm6, %v11262_v58  ;;  %vm2403_vm15 = vcmp.eq.s32.totalorder %v2152_v0, %v9016_v45  ;;  %vm9869_vm6 = vmpackc.low %vm2397_vm5, %vm2393_vm8  ;;  %vm2406_vm8 = vcmp.eq.s32.totalorder %v2152_v0, %v9051_v24  ;;  %vm11415_vm5 = vnez %v11328_v5 }
 0x2fe   :  { %7012 = vmatprep.mubr.msk.bf16.mxu1 %vm11412_vm7, %v11262_v58  ;;  %6948 = vmatprep.mubr.msk.bf16.mxu0 %vm6947_vm12, %v11262_v58  ;;  %v11414_v26 = vsel %vm9869_vm6, 4294967295, %v11413_v26  ;;  %vm6949_vm12 = vmpackc.low %vm2403_vm15, %vm2399_vm1  ;;  %vm11418_vm1 = vnez %v11330_v22  ;;  %vm2401_vm15 = vcmp.eq.s32.totalorder %v2151_v48, %v9054_v20  ;;  %v2158_v48 = vadd.s32 504, %v8933_v28 }
 0x2ff   :  { %v3227_v42 = vpop.f32.mrf.mxu0  ;;  %vm6951_vm7 = vmpackc.low %vm2412_vm0, %vm2408_vm3  ;;  %vm2405_vm3 = vcmp.eq.s32.totalorder %v2152_v0, %v9054_v20  ;;  %vm2407_vm0 = vcmp.eq.s32.totalorder %v2153_v17, %v9016_v45 }
 0x300   :  { %vm9887_vm6 = vmpackc.low %vm2406_vm8, %vm2402_vm10  ;;  %vm2416_vm10 = vcmp.eq.s32.totalorder %v2155_v25, %v8947_v34  ;;  %vm2420_vm8 = vcmp.eq.s32.totalorder %v2156_v30, %v8947_v34 }
 0x301   :  { %v9875_v10 = vpop.f32.mrf.mxu0  ;;  %v11417_v52 = vsel %vm9887_vm6, 4294967295, %v11416_v52  ;;  %vm2410_vm6 = vcmp.eq.s32.totalorder %v2153_v17, %v9051_v24 }
 0x303   :  { %v3230_v2 = vpop.f32.mrf.mxu0 }
 0x305   :  { %7014 = vmatmul.mubr.msk.bf16.gmra.mxu1 %vm11415_vm5, %v11262_v58  ;;  %v9884_v57 = vpop.f32.mrf.mxu0  ;;  %6950 = vmatmul.mubr.msk.bf16.gmra.mxu0 %vm6949_vm12, %v11262_v58  ;;  %vm2411_vm5 = vcmp.eq.s32.totalorder %v2154_v62, %v9016_v45  ;;  %vm9899_vm12 = vmpackc.low %vm2405_vm3, %vm2401_vm15  ;;  %vm2414_vm15 = vcmp.eq.s32.totalorder %v2154_v62, %v9051_v24  ;;  %vm11421_vm3 = vnez %v11332_v56  ;;  %v7363_v56 = vld [vmem:[%s11226_s2 + $0x28] sm:$0xff]  }
 0x306   :  { %7016 = vmatprep.mubr.msk.bf16.mxu1 %vm11418_vm1, %v11262_v58  ;;  %6952 = vmatprep.mubr.msk.bf16.mxu0 %vm6951_vm7, %v11262_v58  ;;  %v11420_v36 = vsel %vm9899_vm12, 4294967295, %v11419_v36  ;;  %vm6953_vm7 = vmpackc.low %vm2411_vm5, %vm2407_vm0  ;;  %vm11424_vm0 = vnez %v11334_v32  ;;  %vm2409_vm5 = vcmp.eq.s32.totalorder %v2153_v17, %v9054_v20 }
 0x307   :  { %v3235_v5 = vpop.f32.mrf.mxu0  ;;  %vm6955_vm1 = vmpackc.low %vm2420_vm8, %vm2416_vm10  ;;  %vm2413_vm10 = vcmp.eq.s32.totalorder %v2154_v62, %v9054_v20  ;;  %vm2415_vm8 = vcmp.eq.s32.totalorder %v2155_v25, %v9016_v45 }
 0x308   :  { %vm9917_vm12 = vmpackc.low %vm2414_vm15, %vm2410_vm6  ;;  %vm2424_vm6 = vcmp.eq.s32.totalorder %v2157_v16, %v8947_v34  ;;  %vm2428_vm15 = vcmp.eq.s32.totalorder %v2158_v48, %v8947_v34 }
 0x309   :  { %v9905_v22 = vpop.f32.mrf.mxu0  ;;  %v11423_v44 = vsel %vm9917_vm12, 4294967295, %v11422_v44  ;;  %vm2418_vm12 = vcmp.eq.s32.totalorder %v2155_v25, %v9051_v24 }
 0x30b   :  { %v3238_v23 = vpop.f32.mrf.mxu0 }
 0x30d   :  { %7018 = vmatmul.mubr.msk.bf16.gmra.mxu1 %vm11421_vm3, %v11262_v58  ;;  %v9914_v0 = vpop.f32.mrf.mxu0  ;;  %6954 = vmatmul.mubr.msk.bf16.gmra.mxu0 %vm6953_vm7, %v11262_v58  ;;  %vm2419_vm3 = vcmp.eq.s32.totalorder %v2156_v30, %v9016_v45  ;;  %vm9929_vm7 = vmpackc.low %vm2413_vm10, %vm2409_vm5  ;;  %vm11430_vm10 = vnez %v11338_v14 }
 0x30e   :  { %7020 = vmatprep.mubr.msk.bf16.mxu1 %vm11424_vm0, %v11262_v58  ;;  %6956 = vmatprep.mubr.msk.bf16.mxu0 %vm6955_vm1, %v11262_v58  ;;  %vm6957_vm1 = vmpackc.low %vm2419_vm3, %vm2415_vm8  ;;  %vm2417_vm8 = vcmp.eq.s32.totalorder %v2155_v25, %v9054_v20  ;;  %vm2421_vm3 = vcmp.eq.s32.totalorder %v2156_v30, %v9054_v20 }
 0x30f   :  { %v3243_v28 = vpop.f32.mrf.mxu0  ;;  %vm6959_vm0 = vmpackc.low %vm2428_vm15, %vm2424_vm6  ;;  %vm2427_vm6 = vcmp.eq.s32.totalorder %v2158_v48, %v9016_v45 }
 0x310   :  { %vm9945_vm5 = vmpackc.low %vm2422_vm14, %vm2418_vm12  ;;  %vm2426_vm12 = vcmp.eq.s32.totalorder %v2157_v16, %v9051_v24 }
 0x311   :  { %v9935_v32 = vpop.f32.mrf.mxu0  ;;  %vm9957_vm15 = vmpackc.low %vm2421_vm3, %vm2417_vm8  ;;  %vm11436_vm8 = vnez %v11343_v6  ;;  %vm2425_vm3 = vcmp.eq.s32.totalorder %v2157_v16, %v9054_v20 }
 0x313   :  { %v3246_v37 = vpop.f32.mrf.mxu0 }
 0x315   :  { %7022 = vmatmul.mubr.msk.bf16.gmra.mxu1 %vm11427_vm2, %v11262_v58  ;;  %v9942_v50 = vpop.f32.mrf.mxu0  ;;  %6958 = vmatmul.mubr.msk.bf16.gmra.mxu0 %vm6957_vm1, %v11262_v58  ;;  %vm2423_vm2 = vcmp.eq.s32.totalorder %v2157_v16, %v9016_v45  ;;  %vm2430_vm1 = vcmp.eq.s32.totalorder %v2158_v48, %v9051_v24 }
 0x316   :  { %7024 = vmatprep.mubr.msk.bf16.mxu1 %vm11430_vm10, %v11262_v58  ;;  %6960 = vmatprep.mubr.msk.bf16.mxu0 %vm6959_vm0, %v11262_v58  ;;  %vm6961_vm14 = vmpackc.low %vm2427_vm6, %vm2423_vm2  ;;  %vm11433_vm0 = vnez %v11340_v9  ;;  %vm2429_vm2 = vcmp.eq.s32.totalorder %v2158_v48, %v9054_v20 }
 0x317   :  { %v3251_v34 = vpop.f32.mrf.mxu0  ;;  %vm9971_vm10 = vmpackc.low %vm2430_vm1, %vm2426_vm12  ;;  %vm11444_vm12 = vnez %v11369_v18  ;;  %vm11445_vm1 = vnez %v11371_v29 }
 0x318   :  { %vm9980_vm6 = vmpackc.low %vm2429_vm2, %vm2425_vm3  ;;  %vm11448_vm3 = vnez %v11381_v7  ;;  %vm11449_vm2 = vnez %v11383_v51  ;;  %v7373_v7 = vld [vmem:[%s11229_s5 + $0x38] sm:$0xff]  }
 0x319   :  { %v9961_v17 = vpop.f32.mrf.mxu0  ;;  %7191 = vmatprep.subr.bf16.mxu1 %v7373_v7 }
 0x31a   :  { %7192 = vmatpush3.bf16.msra.mxu1 %v7373_v7 }
 0x31b   :  { %v3254_v14 = vpop.f32.mrf.mxu0 }
 0x31d   :  { %7026 = vmatmul.mubr.msk.bf16.gmra.mxu1 %vm11433_vm0, %v11262_v58  ;;  %v9968_v62 = vpop.f32.mrf.mxu0  ;;  %6962 = vmatmul.mubr.msk.bf16.gmra.mxu0 %vm6961_vm14, %v11262_v58  ;;  %vm11443_vm14 = vnez %v11365_v1  ;;  %vm11446_vm0 = vnez %v11375_v12 }
 0x31e   :  { %7028 = vmatprep.mubr.msk.bf16.mxu1 %vm11436_vm8, %v11262_v58  ;;  %vm11447_vm8 = vnez %v11377_v59 }
 0x31f   :  { %v3259_v24 = vpop.f32.mrf.mxu0 }
 0x321   :  { %v9984_v38 = vpop.f32.mrf.mxu0 }
 0x323   :  { %v3262_v4 = vpop.f32.mrf.mxu0 }
 0x325   :  { %7030 = vmatmul.mubr.msk.bf16.gmra.mxu1 %vm9495_vm4, %v11262_v58  ;;  %v9989_v42 = vpop.f32.mrf.mxu0  ;;  %vm11439_vm4 = vnez %v11355_v15 }
 0x326   :  { %7032 = vmatprep.mubr.msk.bf16.mxu1 %vm9518_vm11, %v11262_v58  ;;  %vm11440_vm11 = vnez %v11357_v31 }
 0x327   :  { %v3267_v6 = vpop.f32.mrf.mxu0 }
 0x329   :  { %v9994_v20 = vpop.f32.mrf.mxu0 }
 0x32b   :  { %v3270_v2 = vpop.f32.mrf.mxu0 }
 0x32d   :  { %7034 = vmatmul.mubr.msk.bf16.gmra.mxu1 %vm9526_vm13, %v11262_v58  ;;  %v9999_v25 = vpop.f32.mrf.mxu0  ;;  %vm11441_vm13 = vnez %v11359_v40 }
 0x32e   :  { %7036 = vmatprep.mubr.msk.bf16.mxu1 %vm9547_vm9, %v11262_v58  ;;  %vm11442_vm9 = vnez %v11363_v39 }
 0x32f   :  { %v3275_v49 = vpop.f32.mrf.mxu0 }
 0x331   :  { %v10004_v30 = vpop.f32.mrf.mxu0 }
 0x333   :  { %v3278_v5 = vpop.f32.mrf.mxu0 }
 0x335   :  { %7038 = vmatmul.mubr.msk.bf16.gmra.mxu1 %vm11439_vm4, %v11262_v58  ;;  %v10009_v55 = vpop.f32.mrf.mxu0  ;;  %vm11450_vm4 = vnez %v11387_v19 }
 0x336   :  { %7040 = vmatprep.mubr.msk.bf16.mxu1 %vm11440_vm11, %v11262_v58  ;;  %vm11451_vm11 = vnez %v11391_v13  ;;  %v7358_v13 = vld [vmem:[%s11226_s2] sm:$0xff]  }
 0x337   :  { %v3283_v35 = vpop.f32.mrf.mxu0 }
 0x339   :  { %v10014_v23 = vpop.f32.mrf.mxu0 }
 0x33b   :  { %v3286_v16 = vpop.f32.mrf.mxu0 }
 0x33d   :  { %7042 = vmatmul.mubr.msk.bf16.gmra.mxu1 %vm11441_vm13, %v11262_v58  ;;  %v10019_v63 = vpop.f32.mrf.mxu0  ;;  %vm11452_vm13 = vnez %v11394_v11 }
 0x33e   :  { %7044 = vmatprep.mubr.msk.bf16.mxu1 %vm11442_vm9, %v11262_v58  ;;  %vm11453_vm9 = vnez %v11398_v43  ;;  %v7359_v43 = vld [vmem:[%s11226_s2 + $0x8] sm:$0xff]  }
 0x33f   :  { %v3291_v15 = vpop.f32.mrf.mxu0 }
 0x341   :  { %v10024_v48 = vpop.f32.mrf.mxu0 }
 0x343   :  { %v3294_v28 = vpop.f32.mrf.mxu0 }
 0x345   :  { %7046 = vmatmul.mubr.msk.bf16.gmra.mxu1 %vm11443_vm14, %v11262_v58  ;;  %v10029_v31 = vpop.f32.mrf.mxu0  ;;  %vm11454_vm14 = vnez %v11402_v21 }
 0x346   :  { %7048 = vmatprep.mubr.msk.bf16.mxu1 %vm11444_vm12, %v11262_v58  ;;  %vm11455_vm12 = vnez %v11406_v47  ;;  %v7360_v47 = vld [vmem:[%s11226_s2 + $0x10] sm:$0xff]  }
 0x347   :  { %v3299_v40 = vpop.f32.mrf.mxu0 }
 0x349   :  { %v10034_v37 = vpop.f32.mrf.mxu0 }
 0x34b   :  { %v3302_v34 = vpop.f32.mrf.mxu0 }
 0x34d   :  { %7050 = vmatmul.mubr.msk.bf16.gmra.mxu1 %vm11445_vm1, %v11262_v58  ;;  %v10039_v39 = vpop.f32.mrf.mxu0  ;;  %vm11456_vm1 = vnez %v11410_v53 }
 0x34e   :  { %7052 = vmatprep.mubr.msk.bf16.mxu1 %vm11446_vm0, %v11262_v58  ;;  %vm11457_vm0 = vnez %v11414_v26  ;;  %v7361_v26 = vld [vmem:[%s11226_s2 + $0x18] sm:$0xff]  }
 0x34f   :  { %v3307_v1 = vpop.f32.mrf.mxu0 }
 0x351   :  { %v10044_v14 = vpop.f32.mrf.mxu0 }
 0x353   :  { %v3310_v24 = vpop.f32.mrf.mxu0 }
 0x355   :  { %7054 = vmatmul.mubr.msk.bf16.gmra.mxu1 %vm11447_vm8, %v11262_v58  ;;  %v10049_v18 = vpop.f32.mrf.mxu0  ;;  %vm11458_vm8 = vnez %v11417_v52  ;;  %v7378_v52 = vld [vmem:[%s11229_s5 + $0x30] sm:$0xff]  }
 0x356   :  { %7056 = vmatprep.mubr.msk.bf16.mxu1 %vm11448_vm3, %v11262_v58  ;;  %vm11459_vm3 = vnez %v11420_v36  ;;  %7193 = vmatprep.subr.bf16.mxu1 %v7378_v52 }
 0x357   :  { %v3315_v29 = vpop.f32.mrf.mxu0  ;;  %7194 = vmatpush3.bf16.msra.mxu1 %v7378_v52 }
 0x359   :  { %v10054_v4 = vpop.f32.mrf.mxu0 }
 0x35b   :  { %v3318_v6 = vpop.f32.mrf.mxu0 }
 0x35d   :  { %7058 = vmatmul.mubr.msk.bf16.gmra.mxu1 %vm11449_vm2, %v11262_v58  ;;  %v10059_v12 = vpop.f32.mrf.mxu0  ;;  %vm11460_vm2 = vnez %v11423_v44 }
 0x35e   :  { %7060 = vmatprep.mubr.msk.bf16.mxu1 %vm11450_vm4, %v11262_v58 }
 0x35f   :  { %v3323_v59 = vpop.f32.mrf.mxu0 }
 0x361   :  { %v10064_v2 = vpop.f32.mrf.mxu0 }
 0x363   :  { %v3326_v49 = vpop.f32.mrf.mxu0 }
 0x365   :  { %v3490_v5 = vpop.f32.mrf.mxu1  ;;  %7062 = vmatmul.mubr.msk.bf16.gmra.mxu1 %vm11451_vm11, %v11262_v58  ;;  %v10072_v51 = vpop.f32.mrf.mxu0 }
 0x366   :  { %7064 = vmatprep.mubr.msk.bf16.mxu1 %vm11452_vm13, %v11262_v58  ;;  %v3491_v28 = vadd.f32 %v3490_v5, %v9761_v54 }
 0x367   :  { %v3492_v19 = vpop.f32.mrf.mxu1  ;;  %v3331_v35 = vpop.f32.mrf.mxu0 }
 0x369   :  { %v3493_v16 = vpop.f32.mrf.mxu1  ;;  %v10077_v15 = vpop.f32.mrf.mxu0 }
 0x36a   :  { %v3494_v40 = vadd.f32 %v3493_v16, %v9781_v27 }
 0x36b   :  { %v3495_v34 = vpop.f32.mrf.mxu1  ;;  %v3334_v1 = vpop.f32.mrf.mxu0 }
 0x36c   :  { %v4004_v24 = vpack.c.bf16 %v3494_v40, %v3491_v28 }
 0x36d   :  { %v3498_v11 = vpop.f32.mrf.mxu1  ;;  %7066 = vmatmul.mubr.msk.bf16.gmra.mxu1 %vm11453_vm9, %v11262_v58  ;;  %v10087_v29 = vpop.f32.mrf.mxu0 }
 0x36e   :  { %4395 = vmatprep.mubr.bf16.mxu0 %v4004_v24  ;;  %7068 = vmatprep.mubr.msk.bf16.mxu1 %vm11454_vm14, %v11262_v58  ;;  %v3499_v49 = vadd.f32 %v3498_v11, %v9794_v60 }
 0x36f   :  { %v3500_v54 = vpop.f32.mrf.mxu1  ;;  %4396 = vmatmul.mubr.bf16.vlgmr.msra.gmra.mxu0 %v7358_v13  ;;  %v3339_v27 = vpop.f32.mrf.mxu0 }
 0x371   :  { %v3501_v6 = vpop.f32.mrf.mxu1  ;;  %v10092_v59 = vpop.f32.mrf.mxu0 }
 0x372   :  { %v3502_v7 = vadd.f32 %v3501_v6, %v9815_v61 }
 0x373   :  { %v3503_v5 = vpop.f32.mrf.mxu1  ;;  %v3342_v19 = vpop.f32.mrf.mxu0 }
 0x374   :  { %v4005_v35 = vpack.c.bf16 %v3502_v7, %v3499_v49 }
 0x375   :  { %v3506_v16 = vpop.f32.mrf.mxu1  ;;  %7070 = vmatmul.mubr.msk.bf16.gmra.mxu1 %vm11455_vm12, %v11262_v58  ;;  %v10102_v21 = vpop.f32.mrf.mxu0 }
 0x376   :  { %4403 = vmatprep.mubr.bf16.mxu0 %v4005_v35  ;;  %7072 = vmatprep.mubr.msk.bf16.mxu1 %vm11456_vm1, %v11262_v58  ;;  %v3507_v34 = vadd.f32 %v3506_v16, %v9824_v8 }
 0x377   :  { %v3508_v60 = vpop.f32.mrf.mxu1  ;;  %4404 = vmatmul.mubr.bf16.gmra.mxu0 %v7359_v43  ;;  %v3347_v61 = vpop.f32.mrf.mxu0 }
 0x379   :  { %v3509_v28 = vpop.f32.mrf.mxu1  ;;  %v10107_v40 = vpop.f32.mrf.mxu0 }
 0x37a   :  { %v3510_v13 = vadd.f32 %v3509_v28, %v9845_v33 }
 0x37b   :  { %v3511_v1 = vpop.f32.mrf.mxu1  ;;  %v3350_v24 = vpop.f32.mrf.mxu0 }
 0x37c   :  { %v4006_v11 = vpack.c.bf16 %v3510_v13, %v3507_v34  ;;  %v7362_v13 = vld [vmem:[%s11226_s2 + $0x20] sm:$0xff]  }
 0x37d   :  { %v3514_v54 = vpop.f32.mrf.mxu1  ;;  %7074 = vmatmul.mubr.msk.bf16.gmra.mxu1 %vm11457_vm0, %v11262_v58  ;;  %v10117_v53 = vpop.f32.mrf.mxu0 }
 0x37e   :  { %4411 = vmatprep.mubr.bf16.mxu0 %v4006_v11  ;;  %7076 = vmatprep.mubr.msk.bf16.mxu1 %vm11458_vm8, %v11262_v58  ;;  %v3515_v49 = vadd.f32 %v3514_v54, %v9854_v41 }
 0x37f   :  { %v3516_v8 = vpop.f32.mrf.mxu1  ;;  %4412 = vmatmul.mubr.bf16.gmra.mxu0 %v7360_v47  ;;  %v3355_v33 = vpop.f32.mrf.mxu0 }
 0x381   :  { %v3517_v27 = vpop.f32.mrf.mxu1  ;;  %v10122_v6 = vpop.f32.mrf.mxu0 }
 0x382   :  { %v3518_v7 = vadd.f32 %v3517_v27, %v9875_v10 }
 0x383   :  { %v3519_v5 = vpop.f32.mrf.mxu1  ;;  %v3358_v43 = vpop.f32.mrf.mxu0 }
 0x384   :  { %v4007_v19 = vpack.c.bf16 %v3518_v7, %v3515_v49 }
 0x385   :  { %v3522_v35 = vpop.f32.mrf.mxu1  ;;  %7078 = vmatmul.mubr.msk.bf16.gmra.mxu1 %vm11459_vm3, %v11262_v58  ;;  %v10135_v16 = vpop.f32.mrf.mxu0 }
 0x386   :  { %4419 = vmatprep.mubr.bf16.mxu0 %v4007_v19  ;;  %7080 = vmatprep.mubr.msk.bf16.mxu1 %vm11460_vm2, %v11262_v58  ;;  %v3523_v28 = vadd.f32 %v3522_v35, %v9884_v57 }
 0x387   :  { %v3524_v41 = vpop.f32.mrf.mxu1  ;;  %4420 = vmatmul.mubr.bf16.gmra.mxu0 %v7361_v26  ;;  %v3363_v10 = vpop.f32.mrf.mxu0 }
 0x389   :  { %v3525_v60 = vpop.f32.mrf.mxu1  ;;  %v10140_v61 = vpop.f32.mrf.mxu0 }
 0x38a   :  { %v3526_v36 = vadd.f32 %v3525_v60, %v9905_v22 }
 0x38b   :  { %v3527_v34 = vpop.f32.mrf.mxu1  ;;  %v3366_v1 = vpop.f32.mrf.mxu0 }
 0x38c   :  { %v4008_v44 = vpack.c.bf16 %v3526_v36, %v3523_v28 }
 0x38d   :  { %v3530_v47 = vpop.f32.mrf.mxu1  ;;  %7082 = vmatmul.mubr.msk.bf16.gmra.mxu1 %vm9929_vm7, %v11262_v58  ;;  %v10150_v24 = vpop.f32.mrf.mxu0 }
 0x38e   :  { %4427 = vmatprep.mubr.bf16.mxu0 %v4008_v44  ;;  %7084 = vmatprep.mubr.msk.bf16.mxu1 %vm9945_vm5, %v11262_v58  ;;  %v3531_v8 = vadd.f32 %v3530_v47, %v9914_v0  ;;  %v7365_v44 = vld [vmem:[%s11226_s2 + $0x38] sm:$0xff]   ;;  %v7383_v47 = vld [vmem:[%s11229_s5 + $0x28] sm:$0xff]  }
 0x38f   :  { %v3532_v57 = vpop.f32.mrf.mxu1  ;;  %4428 = vmatmul.mubr.bf16.gmra.mxu0 %v7362_v13  ;;  %v3371_v22 = vpop.f32.mrf.mxu0  ;;  %7195 = vmatprep.subr.bf16.mxu1 %v7383_v47 }
 0x390   :  { %7196 = vmatpush3.bf16.msra.mxu1 %v7383_v47 }
 0x391   :  { %v3533_v11 = vpop.f32.mrf.mxu1  ;;  %v10155_v54 = vpop.f32.mrf.mxu0 }
 0x392   :  { %v3534_v33 = vadd.f32 %v3533_v11, %v9935_v32 }
 0x393   :  { %v3535_v27 = vpop.f32.mrf.mxu1  ;;  %v3374_v49 = vpop.f32.mrf.mxu0 }
 0x394   :  { %v4009_v7 = vpack.c.bf16 %v3534_v33, %v3531_v8  ;;  %v7366_v49 = vld [vmem:[%s11226_s2 + $0x40] sm:$0xff]  }
 0x395   :  { %v3538_v5 = vpop.f32.mrf.mxu1  ;;  %7086 = vmatmul.mubr.msk.bf16.gmra.mxu1 %vm9957_vm15, %v11262_v58  ;;  %v10165_v3 = vpop.f32.mrf.mxu0 }
 0x396   :  { %4435 = vmatprep.mubr.bf16.mxu0 %v4009_v7  ;;  %7088 = vmatprep.mubr.msk.bf16.mxu1 %vm9971_vm10, %v11262_v58  ;;  %v3539_v19 = vadd.f32 %v3538_v5, %v9942_v50 }
 0x397   :  { %v3540_v0 = vpop.f32.mrf.mxu1  ;;  %4436 = vmatmul.mubr.bf16.gmra.mxu0 %v7363_v56  ;;  %v3379_v32 = vpop.f32.mrf.mxu0 }
 0x399   :  { %v3541_v26 = vpop.f32.mrf.mxu1  ;;  %v10170_v43 = vpop.f32.mrf.mxu0 }
 0x39a   :  { %v3542_v52 = vadd.f32 %v3541_v26, %v9961_v17  ;;  %v7385_v26 = vld [vmem:[%s11229_s5 + $0x20] sm:$0xff]  }
 0x39b   :  { %v3543_v35 = vpop.f32.mrf.mxu1  ;;  %v3382_v41 = vpop.f32.mrf.mxu0  ;;  %7197 = vmatprep.subr.bf16.mxu1 %v7385_v26 }
 0x39c   :  { %v4010_v10 = vpack.c.bf16 %v3542_v52, %v3539_v19  ;;  %7198 = vmatpush3.bf16.msra.mxu1 %v7385_v26 }
 0x39d   :  { %v3546_v60 = vpop.f32.mrf.mxu1  ;;  %7090 = vmatmul.mubr.msk.bf16.gmra.mxu1 %vm9980_vm6, %v11262_v58  ;;  %v10180_v45 = vpop.f32.mrf.mxu0 }
 0x39e   :  { %4443 = vmatprep.mubr.bf16.mxu0 %v4010_v10  ;;  %v3547_v34 = vadd.f32 %v3546_v60, %v9968_v62  ;;  %v7367_v10 = vld [vmem:[%s11226_s2 + $0x48] sm:$0xff]  }
 0x39f   :  { %v3548_v28 = vpop.f32.mrf.mxu1  ;;  %4444 = vmatmul.mubr.bf16.gmra.mxu0 %v7364_v46  ;;  %v3387_v50 = vpop.f32.mrf.mxu0 }
 0x3a0   :  { %v7387_v50 = vld [vmem:[%s11229_s5 + $0x18] sm:$0xff]  }
 0x3a1   :  { %v3549_v36 = vpop.f32.mrf.mxu1  ;;  %v10182_v17 = vpop.f32.mrf.mxu0  ;;  %7199 = vmatprep.subr.bf16.mxu1 %v7387_v50 }
 0x3a2   :  { %v3550_v13 = vadd.f32 %v3549_v36, %v9984_v38  ;;  %7200 = vmatpush3.bf16.msra.mxu1 %v7387_v50 }
 0x3a3   :  { %v3551_v1 = vpop.f32.mrf.mxu1  ;;  %v3390_v9 = vpop.f32.mrf.mxu0 }
 0x3a4   :  { %v4011_v58 = vpack.c.bf16 %v3550_v13, %v3547_v34 }
 0x3a5   :  { %v3554_v57 = vpop.f32.mrf.mxu1  ;;  %v10192_v22 = vpop.f32.mrf.mxu0 }
 0x3a6   :  { %4451 = vmatprep.mubr.bf16.mxu0 %v4011_v58  ;;  %v3555_v33 = vadd.f32 %v3554_v57, %v9989_v42  ;;  %v7368_v57 = vld [vmem:[%s11226_s2 + $0x50] sm:$0xff]  }
 0x3a7   :  { %v3556_v11 = vpop.f32.mrf.mxu1  ;;  %4452 = vmatmul.mubr.bf16.gmra.mxu0 %v7365_v44  ;;  %v3395_v62 = vpop.f32.mrf.mxu0 }
 0x3a9   :  { %v3557_v38 = vpop.f32.mrf.mxu1  ;;  %v10194_v8 = vpop.f32.mrf.mxu0 }
 0x3aa   :  { %v3558_v27 = vadd.f32 %v3557_v38, %v9994_v20  ;;  %v7390_v38 = vld [vmem:[%s11229_s5 + $0x8] sm:$0xff]  }
 0x3ab   :  { %v3559_v56 = vpop.f32.mrf.mxu1  ;;  %v3398_v7 = vpop.f32.mrf.mxu0 }
 0x3ac   :  { %v4012_v5 = vpack.c.bf16 %v3558_v27, %v3555_v33  ;;  %v7391_v56 = vld [vmem:[%s11229_s5] sm:$0xff]  }
 0x3ad   :  { %v3562_v0 = vpop.f32.mrf.mxu1  ;;  %v10201_v32 = vpop.f32.mrf.mxu0 }
 0x3ae   :  { %4459 = vmatprep.mubr.bf16.mxu0 %v4012_v5  ;;  %v3563_v35 = vadd.f32 %v3562_v0, %v9999_v25 }
 0x3af   :  { %v3564_v19 = vpop.f32.mrf.mxu1  ;;  %4460 = vmatmul.mubr.bf16.gmra.mxu0 %v7366_v49  ;;  %v3403_v42 = vpop.f32.mrf.mxu0 }
 0x3b0   :  { %v7369_v19 = vld [vmem:[%s11226_s2 + $0x58] sm:$0xff]  }
 0x3b1   :  { %v3565_v20 = vpop.f32.mrf.mxu1  ;;  %v10206_v52 = vpop.f32.mrf.mxu0 }
 0x3b2   :  { %v3566_v46 = vadd.f32 %v3565_v20, %v10004_v30  ;;  %v7388_v30 = vld [vmem:[%s11229_s5 + $0x10] sm:$0xff]  }
 0x3b3   :  { %v3567_v41 = vpop.f32.mrf.mxu1  ;;  %v3406_v60 = vpop.f32.mrf.mxu0  ;;  %7201 = vmatprep.subr.bf16.mxu1 %v7388_v30 }
 0x3b4   :  { %v4013_v28 = vpack.c.bf16 %v3566_v46, %v3563_v35  ;;  %7202 = vmatpush3.bf16.msra.mxu1 %v7388_v30 }
 0x3b5   :  { %v3570_v36 = vpop.f32.mrf.mxu1  ;;  %v10216_v34 = vpop.f32.mrf.mxu0  ;;  %7203 = vmatprep.subr.bf16.mxu1 %v7390_v38 }
 0x3b6   :  { %4467 = vmatprep.mubr.bf16.mxu0 %v4013_v28  ;;  %v3571_v9 = vadd.f32 %v3570_v36, %v10009_v55  ;;  %v7370_v36 = vld [vmem:[%s11226_s2 + $0x60] sm:$0xff]  }
 0x3b7   :  { %v3572_v13 = vpop.f32.mrf.mxu1  ;;  %4468 = vmatmul.mubr.bf16.gmra.mxu0 %v7367_v10  ;;  %v3411_v25 = vpop.f32.mrf.mxu0 }
 0x3b8   :  { %7204 = vmatpush3.bf16.msra.mxu1 %v7390_v38 }
 0x3b9   :  { %v3573_v1 = vpop.f32.mrf.mxu1  ;;  %v10221_v44 = vpop.f32.mrf.mxu0  ;;  %7205 = vmatprep.subr.bf16.mxu1 %v7391_v56 }
 0x3ba   :  { %v3574_v58 = vadd.f32 %v3573_v1, %v10014_v23 }
 0x3bb   :  { %v3575_v47 = vpop.f32.mrf.mxu1  ;;  %v3414_v11 = vpop.f32.mrf.mxu0 }
 0x3bc   :  { %v4014_v62 = vpack.c.bf16 %v3574_v58, %v3571_v9  ;;  %7206 = vmatpush3.bf16.msra.mxu1 %v7391_v56 }
 0x3bd   :  { %v3578_v33 = vpop.f32.mrf.mxu1  ;;  %v10231_v27 = vpop.f32.mrf.mxu0 }
 0x3be   :  { %4475 = vmatprep.mubr.bf16.mxu0 %v4014_v62  ;;  %v3579_v5 = vadd.f32 %v3578_v33, %v10019_v63  ;;  %v7371_v62 = vld [vmem:[%s11226_s2 + $0x68] sm:$0xff]  }
 0x3bf   :  { %v3580_v55 = vpop.f32.mrf.mxu1  ;;  %4476 = vmatmul.mubr.bf16.gmra.mxu0 %v7368_v57  ;;  %v3419_v23 = vpop.f32.mrf.mxu0 }
 0x3c1   :  { %v3581_v49 = vpop.f32.mrf.mxu1  ;;  %v10236_v7 = vpop.f32.mrf.mxu0 }
 0x3c2   :  { %v3582_v0 = vadd.f32 %v3581_v49, %v10024_v48 }
 0x3c3   :  { %v3583_v26 = vpop.f32.mrf.mxu1  ;;  %v3422_v42 = vpop.f32.mrf.mxu0 }
 0x3c4   :  { %v4015_v20 = vpack.c.bf16 %v3582_v0, %v3579_v5 }
 0x3c5   :  { %v3586_v35 = vpop.f32.mrf.mxu1  ;;  %v10243_v46 = vpop.f32.mrf.mxu0 }
 0x3c6   :  { %4483 = vmatprep.mubr.bf16.mxu0 %v4015_v20  ;;  %v3587_v48 = vadd.f32 %v3586_v35, %v10029_v31 }
 0x3c7   :  { %v3588_v41 = vpop.f32.mrf.mxu1  ;;  %4484 = vmatmul.mubr.bf16.gmra.mxu0 %v7369_v19  ;;  %v3427_v10 = vpop.f32.mrf.mxu0  ;;  %v7372_v19 = vld [vmem:[%s11226_s2 + $0x70] sm:$0xff]  }
 0x3c9   :  { %v3589_v60 = vpop.f32.mrf.mxu1  ;;  %v10245_v63 = vpop.f32.mrf.mxu0 }
 0x3ca   :  { %v3590_v28 = vadd.f32 %v3589_v60, %v10034_v37 }
 0x3cb   :  { %v3591_v50 = vpop.f32.mrf.mxu1  ;;  %v3430_v13 = vpop.f32.mrf.mxu0 }
 0x3cc   :  { %v4016_v25 = vpack.c.bf16 %v3590_v28, %v3587_v48 }
 0x3cd   :  { %v3594_v30 = vpop.f32.mrf.mxu1  ;;  %v10252_v1 = vpop.f32.mrf.mxu0 }
 0x3ce   :  { %4491 = vmatprep.mubr.bf16.mxu0 %v4016_v25  ;;  %v3595_v31 = vadd.f32 %v3594_v30, %v10039_v39 }
 0x3cf   :  { %v3596_v9 = vpop.f32.mrf.mxu1  ;;  %4492 = vmatmul.mubr.bf16.gmra.mxu0 %v7370_v36  ;;  %v3435_v58 = vpop.f32.mrf.mxu0  ;;  %v7374_v36 = vld [vmem:[%s11226_s2 + $0x78] sm:$0xff]  }
 0x3d1   :  { %v3597_v47 = vpop.f32.mrf.mxu1  ;;  %v10254_v57 = vpop.f32.mrf.mxu0 }
 0x3d2   :  { %v3598_v37 = vadd.f32 %v3597_v47, %v10044_v14 }
 0x3d3   :  { %v3599_v11 = vpop.f32.mrf.mxu1  ;;  %v3438_v38 = vpop.f32.mrf.mxu0 }
 0x3d4   :  { %v4017_v33 = vpack.c.bf16 %v3598_v37, %v3595_v31 }
 0x3d5   :  { %v3602_v55 = vpop.f32.mrf.mxu1  ;;  %v10261_v23 = vpop.f32.mrf.mxu0 }
 0x3d6   :  { %4499 = vmatprep.mubr.bf16.mxu0 %v4017_v33  ;;  %v3603_v39 = vadd.f32 %v3602_v55, %v10049_v18 }
 0x3d7   :  { %v3604_v56 = vpop.f32.mrf.mxu1  ;;  %4500 = vmatmul.mubr.bf16.gmra.mxu0 %v7371_v62  ;;  %v3443_v49 = vpop.f32.mrf.mxu0 }
 0x3d9   :  { %v3605_v5 = vpop.f32.mrf.mxu1  ;;  %v10263_v0 = vpop.f32.mrf.mxu0 }
 0x3da   :  { %v3606_v14 = vadd.f32 %v3605_v5, %v10054_v4 }
 0x3db   :  { %v3607_v26 = vpop.f32.mrf.mxu1  ;;  %v3446_v42 = vpop.f32.mrf.mxu0 }
 0x3dc   :  { %v4018_v20 = vpack.c.bf16 %v3606_v14, %v3603_v39 }
 0x3dd   :  { %v3610_v35 = vpop.f32.mrf.mxu1  ;;  %v10270_v41 = vpop.f32.mrf.mxu0 }
 0x3de   :  { %4507 = vmatprep.mubr.bf16.mxu0 %v4018_v20  ;;  %v3611_v18 = vadd.f32 %v3610_v35, %v10059_v12  ;;  %v7375_v12 = vld [vmem:[%s11226_s2 + $0x80] sm:$0xff]  }
 0x3df   :  { %v3612_v10 = vpop.f32.mrf.mxu1  ;;  %4508 = vmatmul.mubr.bf16.gmra.mxu0 %v7372_v19  ;;  %v3451_v60 = vpop.f32.mrf.mxu0 }
 0x3e1   :  { %v3613_v48 = vpop.f32.mrf.mxu1  ;;  %v10272_v28 = vpop.f32.mrf.mxu0 }
 0x3e2   :  { %v3614_v4 = vadd.f32 %v3613_v48, %v10064_v2 }
 0x3e3   :  { %v3615_v50 = vpop.f32.mrf.mxu1  ;;  %v3454_v13 = vpop.f32.mrf.mxu0 }
 0x3e4   :  { %v4019_v25 = vpack.c.bf16 %v3614_v4, %v3611_v18 }
 0x3e5   :  { %v3618_v30 = vpop.f32.mrf.mxu1 }
 0x3e6   :  { %4515 = vmatprep.mubr.bf16.mxu0 %v4019_v25  ;;  %v3619_v47 = vadd.f32 %v3618_v30, %v10072_v51  ;;  %v7376_v51 = vld [vmem:[%s11226_s2 + $0x88] sm:$0xff]  }
 0x3e7   :  { %v3620_v9 = vpop.f32.mrf.mxu1  ;;  %4516 = vmatmul.mubr.bf16.gmra.mxu0 %v7374_v36 }
 0x3e9   :  { %v3621_v58 = vpop.f32.mrf.mxu1 }
 0x3ea   :  { %v3622_v31 = vadd.f32 %v3621_v58, %v10077_v15 }
 0x3eb   :  { %v3623_v37 = vpop.f32.mrf.mxu1 }
 0x3ec   :  { %v4020_v2 = vpack.c.bf16 %v3622_v31, %v3619_v47 }
 0x3ed   :  { %v3626_v11 = vpop.f32.mrf.mxu1 }
 0x3ee   :  { %4523 = vmatprep.mubr.bf16.mxu0 %v4020_v2  ;;  %v3627_v33 = vadd.f32 %v3626_v11, %v10087_v29  ;;  %v7377_v29 = vld [vmem:[%s11226_s2 + $0x90] sm:$0xff]  }
 0x3ef   :  { %v3628_v62 = vpop.f32.mrf.mxu1  ;;  %4524 = vmatmul.mubr.bf16.gmra.mxu0 %v7375_v12 }
 0x3f1   :  { %v3629_v38 = vpop.f32.mrf.mxu1 }
 0x3f2   :  { %v3630_v55 = vadd.f32 %v3629_v38, %v10092_v59 }
 0x3f3   :  { %v3631_v56 = vpop.f32.mrf.mxu1 }
 0x3f4   :  { %v4021_v15 = vpack.c.bf16 %v3630_v55, %v3627_v33 }
 0x3f5   :  { %v3634_v49 = vpop.f32.mrf.mxu1 }
 0x3f6   :  { %4531 = vmatprep.mubr.bf16.mxu0 %v4021_v15  ;;  %v3635_v14 = vadd.f32 %v3634_v49, %v10102_v21  ;;  %v7379_v21 = vld [vmem:[%s11226_s2 + $0x98] sm:$0xff]  }
 0x3f7   :  { %v3636_v5 = vpop.f32.mrf.mxu1  ;;  %4532 = vmatmul.mubr.bf16.gmra.mxu0 %v7376_v51 }
 0x3f9   :  { %v3637_v39 = vpop.f32.mrf.mxu1 }
 0x3fa   :  { %v3638_v26 = vadd.f32 %v3637_v39, %v10107_v40 }
 0x3fb   :  { %v3639_v19 = vpop.f32.mrf.mxu1 }
 0x3fc   :  { %v4022_v59 = vpack.c.bf16 %v3638_v26, %v3635_v14 }
 0x3fd   :  { %v3642_v42 = vpop.f32.mrf.mxu1 }
 0x3fe   :  { %4539 = vmatprep.mubr.bf16.mxu0 %v4022_v59  ;;  %v3643_v10 = vadd.f32 %v3642_v42, %v10117_v53  ;;  %v7380_v53 = vld [vmem:[%s11226_s2 + $0xa0] sm:$0xff]  }
 0x3ff   :  { %v3644_v20 = vpop.f32.mrf.mxu1  ;;  %4540 = vmatmul.mubr.bf16.gmra.mxu0 %v7377_v29 }
 0x401   :  { %v3645_v35 = vpop.f32.mrf.mxu1 }
 0x402   :  { %v3646_v60 = vadd.f32 %v3645_v35, %v10122_v6  ;;  %v10327_v35 = vld [vmem:[%s11228_s4] ss:$0 sm:$0xff] }
 0x403   :  { %v3647_v48 = vpop.f32.mrf.mxu1 }
 0x404   :  { %v4023_v40 = vpack.c.bf16 %v3646_v60, %v3643_v10 }
 0x405   :  { %v3650_v18 = vpop.f32.mrf.mxu1 }
 0x406   :  { %4547 = vmatprep.mubr.bf16.mxu0 %v4023_v40  ;;  %v3651_v36 = vadd.f32 %v3650_v18, %v10135_v16  ;;  %v7381_v16 = vld [vmem:[%s11226_s2 + $0xa8] sm:$0xff]  }
 0x407   :  { %v3652_v4 = vpop.f32.mrf.mxu1  ;;  %4548 = vmatmul.mubr.bf16.gmra.mxu0 %v7379_v21 }
 0x408   :  { %v7389_v4 = vld [vmem:[%s11226_s2 + $0xc8] sm:$0xff]  }
 0x409   :  { %v3653_v50 = vpop.f32.mrf.mxu1 }
 0x40a   :  { %v3654_v13 = vadd.f32 %v3653_v50, %v10140_v61 }
 0x40b   :  { %v3655_v25 = vpop.f32.mrf.mxu1 }
 0x40c   :  { %v4024_v6 = vpack.c.bf16 %v3654_v13, %v3651_v36 }
 0x40d   :  { %v3658_v30 = vpop.f32.mrf.mxu1 }
 0x40e   :  { %4555 = vmatprep.mubr.bf16.mxu0 %v4024_v6  ;;  %v3659_v47 = vadd.f32 %v3658_v30, %v10150_v24  ;;  %v7382_v24 = vld [vmem:[%s11226_s2 + $0xb0] sm:$0xff]  }
 0x40f   :  { %v3660_v9 = vpop.f32.mrf.mxu1  ;;  %4556 = vmatmul.mubr.bf16.gmra.mxu0 %v7380_v53 }
 0x411   :  { %v3661_v58 = vpop.f32.mrf.mxu1 }
 0x412   :  { %v3662_v31 = vadd.f32 %v3661_v58, %v10155_v54 }
 0x413   :  { %v3663_v37 = vpop.f32.mrf.mxu1 }
 0x414   :  { %v4025_v61 = vpack.c.bf16 %v3662_v31, %v3659_v47 }
 0x415   :  { %v3666_v12 = vpop.f32.mrf.mxu1 }
 0x416   :  { %4563 = vmatprep.mubr.bf16.mxu0 %v4025_v61  ;;  %v3667_v62 = vadd.f32 %v3666_v12, %v10165_v3  ;;  %v7384_v3 = vld [vmem:[%s11226_s2 + $0xb8] sm:$0xff]   ;;  %v7392_v12 = vld [vmem:[%s11226_s2 + $0xd0] sm:$0xff]  }
 0x417   :  { %v3668_v2 = vpop.f32.mrf.mxu1  ;;  %4564 = vmatmul.mubr.bf16.gmra.mxu0 %v7381_v16 }
 0x419   :  { %v3669_v11 = vpop.f32.mrf.mxu1 }
 0x41a   :  { %v3670_v38 = vadd.f32 %v3669_v11, %v10170_v43 }
 0x41b   :  { %v3671_v33 = vpop.f32.mrf.mxu1 }
 0x41c   :  { %v4026_v54 = vpack.c.bf16 %v3670_v38, %v3667_v62 }
 0x41d   :  { %v3674_v55 = vpop.f32.mrf.mxu1 }
 0x41e   :  { %4571 = vmatprep.mubr.bf16.mxu0 %v4026_v54  ;;  %v3675_v15 = vadd.f32 %v3674_v55, %v10180_v45  ;;  %v7386_v45 = vld [vmem:[%s11226_s2 + $0xc0] sm:$0xff]  }
 0x41f   :  { %v3676_v56 = vpop.f32.mrf.mxu1  ;;  %4572 = vmatmul.mubr.bf16.gmra.mxu0 %v7382_v24 }
 0x421   :  { %v3677_v51 = vpop.f32.mrf.mxu1 }
 0x422   :  { %v3678_v49 = vadd.f32 %v3677_v51, %v10182_v17 }
 0x423   :  { %v3679_v5 = vpop.f32.mrf.mxu1 }
 0x424   :  { %v4027_v43 = vpack.c.bf16 %v3678_v49, %v3675_v15 }
 0x425   :  { %v3682_v39 = vpop.f32.mrf.mxu1 }
 0x426   :  { %4579 = vmatprep.mubr.bf16.mxu0 %v4027_v43  ;;  %v3683_v19 = vadd.f32 %v3682_v39, %v10192_v22  ;;  %v7393_v43 = vld [vmem:[%s11226_s2 + $0xd8] sm:$0xff]  }
 0x427   :  { %v3684_v14 = vpop.f32.mrf.mxu1  ;;  %4580 = vmatmul.mubr.bf16.gmra.mxu0 %v7384_v3 }
 0x429   :  { %v3685_v26 = vpop.f32.mrf.mxu1 }
 0x42a   :  { %v3686_v29 = vadd.f32 %v3685_v26, %v10194_v8 }
 0x42b   :  { %v3687_v59 = vpop.f32.mrf.mxu1 }
 0x42c   :  { %v4028_v17 = vpack.c.bf16 %v3686_v29, %v3683_v19 }
 0x42d   :  { %v3690_v42 = vpop.f32.mrf.mxu1 }
 0x42e   :  { %4587 = vmatprep.mubr.bf16.mxu0 %v4028_v17  ;;  %v3691_v8 = vadd.f32 %v3690_v42, %v10201_v32 }
 0x42f   :  { %v3692_v20 = vpop.f32.mrf.mxu1  ;;  %v4397_v10 = vpop.f32.mrf.mxu0  ;;  %4588 = vmatmul.mubr.bf16.gmra.mxu0 %v7386_v45 }
 0x430   :  { %v4398_v48 = vadd.f32 %v10327_v35, %v4397_v10 }
 0x431   :  { %v3693_v60 = vpop.f32.mrf.mxu1  ;;  %v4399_v22 = vpop.f32.mrf.mxu0 }
 0x432   :  { %v3694_v21 = vadd.f32 %v3693_v60, %v10206_v52  ;;  %v4652_v53 = vmax.f32 %v4398_v48, 0.0  ;;  %v7394_v48 = vld [vmem:[%s11226_s2 + $0xe0] sm:$0xff]  }
 0x433   :  { %v3695_v40 = vpop.f32.mrf.mxu1  ;;  %v4400_v18 = vpop.f32.mrf.mxu0 }
 0x434   :  { %v4029_v50 = vpack.c.bf16 %v3694_v21, %v3691_v8  ;;  %v4401_v36 = vadd.f32 %v10327_v35, %v4400_v18 }
 0x435   :  { %v3698_v13 = vpop.f32.mrf.mxu1  ;;  %v4402_v25 = vpop.f32.mrf.mxu0 }
 0x436   :  { %v4653_v6 = vmax.f32 %v4401_v36, 0.0  ;;  %4595 = vmatprep.mubr.bf16.mxu0 %v4029_v50  ;;  %v3699_v47 = vadd.f32 %v3698_v13, %v10216_v34 }
 0x437   :  { %v3700_v30 = vpop.f32.mrf.mxu1  ;;  %v4405_v32 = vpop.f32.mrf.mxu0  ;;  %4596 = vmatmul.mubr.bf16.gmra.mxu0 %v7389_v4 }
 0x438   :  { %v4716_v9 = vpack.c.bf16 %v4653_v6, %v4652_v53  ;;  %v4406_v31 = vadd.f32 %v10327_v35, %v4405_v32 }
 0x439   :  { %v3701_v58 = vpop.f32.mrf.mxu1  ;;  %v4407_v52 = vpop.f32.mrf.mxu0 }
 0x43a   :  { %v3702_v37 = vadd.f32 %v3701_v58, %v10221_v44  ;;  %7207 = vmatprep.mubr.bf16.mxu1 %v4716_v9  ;;  %v4654_v33 = vmax.f32 %v4406_v31, 0.0  ;;  %v7395_v52 = vld [vmem:[%s11226_s2 + $0xe8] sm:$0xff]  }
 0x43b   :  { %v3703_v16 = vpop.f32.mrf.mxu1  ;;  %v4408_v61 = vpop.f32.mrf.mxu0 }
 0x43c   :  { %v4030_v2 = vpack.c.bf16 %v3702_v37, %v3699_v47  ;;  %v4409_v11 = vadd.f32 %v10327_v35, %v4408_v61 }
 0x43d   :  { %v3706_v62 = vpop.f32.mrf.mxu1  ;;  %v4410_v38 = vpop.f32.mrf.mxu0 }
 0x43e   :  { %v4655_v24 = vmax.f32 %v4409_v11, 0.0  ;;  %4603 = vmatprep.mubr.bf16.mxu0 %v4030_v2  ;;  %v3707_v51 = vadd.f32 %v3706_v62, %v10231_v27 }
 0x43f   :  { %v3708_v34 = vpop.f32.mrf.mxu1  ;;  %v4413_v54 = vpop.f32.mrf.mxu0  ;;  %4604 = vmatmul.mubr.bf16.gmra.mxu0 %v7392_v12 }
 0x440   :  { %v4717_v55 = vpack.c.bf16 %v4655_v24, %v4654_v33  ;;  %v4414_v15 = vadd.f32 %v10327_v35, %v4413_v54 }
 0x441   :  { %v3709_v44 = vpop.f32.mrf.mxu1  ;;  %v4415_v56 = vpop.f32.mrf.mxu0 }
 0x442   :  { %v3710_v49 = vadd.f32 %v3709_v44, %v10236_v7  ;;  %7208 = vmatmul.mubr.bf16.vlgmr.msra.gmra.mxu1 %v4717_v55  ;;  %v4656_v29 = vmax.f32 %v4414_v15, 0.0  ;;  %v7396_v55 = vld [vmem:[%s11226_s2 + $0xf0] sm:$0xff]  }
 0x443   :  { %v3711_v5 = vpop.f32.mrf.mxu1  ;;  %v4416_v3 = vpop.f32.mrf.mxu0 }
 0x444   :  { %v4031_v39 = vpack.c.bf16 %v3710_v49, %v3707_v51  ;;  %v4417_v14 = vadd.f32 %v10327_v35, %v4416_v3 }
 0x445   :  { %v3714_v26 = vpop.f32.mrf.mxu1  ;;  %v4418_v19 = vpop.f32.mrf.mxu0 }
 0x446   :  { %v4657_v59 = vmax.f32 %v4417_v14, 0.0  ;;  %4611 = vmatprep.mubr.bf16.mxu0 %v4031_v39  ;;  %v3715_v20 = vadd.f32 %v3714_v26, %v10243_v46 }
 0x447   :  { %v3716_v27 = vpop.f32.mrf.mxu1  ;;  %v4421_v45 = vpop.f32.mrf.mxu0  ;;  %4612 = vmatmul.mubr.bf16.gmra.mxu0 %v7393_v43 }
 0x448   :  { %v4718_v17 = vpack.c.bf16 %v4657_v59, %v4656_v29  ;;  %v4422_v10 = vadd.f32 %v10327_v35, %v4421_v45  ;;  %v7397_v59 = vld [vmem:[%s11226_s2 + $0xf8] sm:$0xff]  }
 0x449   :  { %v3717_v7 = vpop.f32.mrf.mxu1  ;;  %v4423_v42 = vpop.f32.mrf.mxu0 }
 0x44a   :  { %v3718_v60 = vadd.f32 %v3717_v7, %v10245_v63  ;;  %7211 = vmatprep.mubr.bf16.mxu1 %v4718_v17  ;;  %v4658_v50 = vmax.f32 %v4422_v10, 0.0 }
 0x44b   :  { %v3719_v22 = vpop.f32.mrf.mxu1  ;;  %v4424_v8 = vpop.f32.mrf.mxu0 }
 0x44c   :  { %v4032_v21 = vpack.c.bf16 %v3718_v60, %v3715_v20  ;;  %v4425_v40 = vadd.f32 %v10327_v35, %v4424_v8 }
 0x44d   :  { %v3722_v18 = vpop.f32.mrf.mxu1  ;;  %v4426_v4 = vpop.f32.mrf.mxu0 }
 0x44e   :  { %v4659_v36 = vmax.f32 %v4425_v40, 0.0  ;;  %4619 = vmatprep.mubr.bf16.mxu0 %v4032_v21  ;;  %v3723_v6 = vadd.f32 %v3722_v18, %v10252_v1 }
 0x44f   :  { %v3724_v46 = vpop.f32.mrf.mxu1  ;;  %v4429_v13 = vpop.f32.mrf.mxu0  ;;  %4620 = vmatmul.mubr.bf16.gmra.mxu0 %v7394_v48 }
 0x450   :  { %v4719_v25 = vpack.c.bf16 %v4659_v36, %v4658_v50  ;;  %v4430_v30 = vadd.f32 %v10327_v35, %v4429_v13 }
 0x451   :  { %v3725_v63 = vpop.f32.mrf.mxu1  ;;  %v4431_v53 = vpop.f32.mrf.mxu0 }
 0x452   :  { %v3726_v32 = vadd.f32 %v3725_v63, %v10254_v57  ;;  %7212 = vmatmul.mubr.bf16.gmra.mxu1 %v4719_v25  ;;  %v4660_v61 = vmax.f32 %v4430_v30, 0.0 }
 0x453   :  { %v3727_v9 = vpop.f32.mrf.mxu1  ;;  %v4432_v58 = vpop.f32.mrf.mxu0 }
 0x454   :  { %v4033_v47 = vpack.c.bf16 %v3726_v32, %v3723_v6  ;;  %v4433_v31 = vadd.f32 %v10327_v35, %v4432_v58 }
 0x455   :  { %v3730_v37 = vpop.f32.mrf.mxu1  ;;  %v4434_v16 = vpop.f32.mrf.mxu0 }
 0x456   :  { %v4661_v12 = vmax.f32 %v4433_v31, 0.0  ;;  %4627 = vmatprep.mubr.bf16.mxu0 %v4033_v47  ;;  %v3731_v38 = vadd.f32 %v3730_v37, %v10261_v23 }
 0x457   :  { %v3732_v1 = vpop.f32.mrf.mxu1  ;;  %v4437_v2 = vpop.f32.mrf.mxu0  ;;  %4628 = vmatmul.mubr.bf16.gmra.mxu0 %v7395_v52 }
 0x458   :  { %v4720_v11 = vpack.c.bf16 %v4661_v12, %v4660_v61  ;;  %v4438_v33 = vadd.f32 %v10327_v35, %v4437_v2 }
 0x459   :  { %v3733_v57 = vpop.f32.mrf.mxu1  ;;  %v4439_v62 = vpop.f32.mrf.mxu0 }
 0x45a   :  { %v3734_v24 = vadd.f32 %v3733_v57, %v10263_v0  ;;  %7215 = vmatprep.mubr.bf16.mxu1 %v4720_v11  ;;  %v4662_v49 = vmax.f32 %v4438_v33, 0.0 }
 0x45b   :  { %v3735_v34 = vpop.f32.mrf.mxu1  ;;  %v4440_v54 = vpop.f32.mrf.mxu0 }
 0x45c   :  { %v4034_v44 = vpack.c.bf16 %v3734_v24, %v3731_v38  ;;  %v4441_v56 = vadd.f32 %v10327_v35, %v4440_v54 }
 0x45d   :  { %v3738_v51 = vpop.f32.mrf.mxu1  ;;  %v4442_v15 = vpop.f32.mrf.mxu0 }
 0x45e   :  { %v4663_v5 = vmax.f32 %v4441_v56, 0.0  ;;  %4635 = vmatprep.mubr.bf16.mxu0 %v4034_v44  ;;  %v3739_v14 = vadd.f32 %v3738_v51, %v10270_v41 }
 0x45f   :  { %v3740_v23 = vpop.f32.mrf.mxu1  ;;  %v4445_v3 = vpop.f32.mrf.mxu0  ;;  %4636 = vmatmul.mubr.bf16.gmra.mxu0 %v7396_v55 }
 0x460   :  { %v4721_v43 = vpack.c.bf16 %v4663_v5, %v4662_v49  ;;  %v4446_v26 = vadd.f32 %v10327_v35, %v4445_v3 }
 0x461   :  { %v3741_v0 = vpop.f32.mrf.mxu1  ;;  %v4447_v39 = vpop.f32.mrf.mxu0 }
 0x462   :  { %v3742_v19 = vadd.f32 %v3741_v0, %v10272_v28  ;;  %7216 = vmatmul.mubr.bf16.gmra.mxu1 %v4721_v43  ;;  %v4664_v42 = vmax.f32 %v4446_v26, 0.0 }
 0x463   :  { %v4448_v29 = vpop.f32.mrf.mxu0  ;;  %v3743_v27 = vpop.f32.mrf.mxu1 }
 0x464   :  { %v4035_v45 = vpack.c.bf16 %v3742_v19, %v3739_v14  ;;  %v4449_v17 = vadd.f32 %v10327_v35, %v4448_v29 }
 0x465   :  { %v4450_v7 = vpop.f32.mrf.mxu0 }
 0x466   :  { %v4665_v20 = vmax.f32 %v4449_v17, 0.0  ;;  %4643 = vmatprep.mubr.bf16.mxu0 %v4035_v45 }
 0x467   :  { %v4453_v10 = vpop.f32.mrf.mxu0  ;;  %4644 = vmatmul.mubr.bf16.gmra.mxu0 %v7397_v59 }
 0x468   :  { %v4722_v41 = vpack.c.bf16 %v4665_v20, %v4664_v42  ;;  %v4454_v28 = vadd.f32 %v10327_v35, %v4453_v10 }
 0x469   :  { %v4455_v60 = vpop.f32.mrf.mxu0 }
 0x46a   :  { %7219 = vmatprep.mubr.bf16.mxu1 %v4722_v41  ;;  %v4666_v21 = vmax.f32 %v4454_v28, 0.0 }
 0x46b   :  { %v4456_v22 = vpop.f32.mrf.mxu0 }
 0x46c   :  { %v4457_v8 = vadd.f32 %v10327_v35, %v4456_v22 }
 0x46d   :  { %v4458_v48 = vpop.f32.mrf.mxu0 }
 0x46e   :  { %v4667_v40 = vmax.f32 %v4457_v8, 0.0 }
 0x46f   :  { %v4461_v18 = vpop.f32.mrf.mxu0 }
 0x470   :  { %v4723_v4 = vpack.c.bf16 %v4667_v40, %v4666_v21  ;;  %v4462_v36 = vadd.f32 %v10327_v35, %v4461_v18 }
 0x471   :  { %v4463_v50 = vpop.f32.mrf.mxu0 }
 0x472   :  { %7220 = vmatmul.mubr.bf16.gmra.mxu1 %v4723_v4  ;;  %v4668_v63 = vmax.f32 %v4462_v36, 0.0 }
 0x473   :  { %v4464_v46 = vpop.f32.mrf.mxu0 }
 0x474   :  { %v4465_v13 = vadd.f32 %v10327_v35, %v4464_v46 }
 0x475   :  { %v4466_v25 = vpop.f32.mrf.mxu0 }
 0x476   :  { %v4669_v53 = vmax.f32 %v4465_v13, 0.0 }
 0x477   :  { %v4469_v6 = vpop.f32.mrf.mxu0 }
 0x478   :  { %v4724_v30 = vpack.c.bf16 %v4669_v53, %v4668_v63  ;;  %v4470_v9 = vadd.f32 %v10327_v35, %v4469_v6 }
 0x479   :  { %v4471_v32 = vpop.f32.mrf.mxu0 }
 0x47a   :  { %7223 = vmatprep.mubr.bf16.mxu1 %v4724_v30  ;;  %v4670_v31 = vmax.f32 %v4470_v9, 0.0 }
 0x47b   :  { %v4472_v58 = vpop.f32.mrf.mxu0 }
 0x47c   :  { %v4473_v52 = vadd.f32 %v10327_v35, %v4472_v58 }
 0x47d   :  { %v4474_v47 = vpop.f32.mrf.mxu0 }
 0x47e   :  { %v4671_v37 = vmax.f32 %v4473_v52, 0.0 }
 0x47f   :  { %v4477_v16 = vpop.f32.mrf.mxu0 }
 0x480   :  { %v4725_v61 = vpack.c.bf16 %v4671_v37, %v4670_v31  ;;  %v4478_v1 = vadd.f32 %v10327_v35, %v4477_v16 }
 0x481   :  { %v4479_v12 = vpop.f32.mrf.mxu0 }
 0x482   :  { %7224 = vmatmul.mubr.bf16.gmra.mxu1 %v4725_v61  ;;  %v4672_v62 = vmax.f32 %v4478_v1, 0.0 }
 0x483   :  { %v4480_v2 = vpop.f32.mrf.mxu0 }
 0x484   :  { %v4481_v11 = vadd.f32 %v10327_v35, %v4480_v2 }
 0x485   :  { %v4482_v57 = vpop.f32.mrf.mxu0 }
 0x486   :  { %v4673_v38 = vmax.f32 %v4481_v11, 0.0 }
 0x487   :  { %v4485_v33 = vpop.f32.mrf.mxu0 }
 0x488   :  { %v4726_v24 = vpack.c.bf16 %v4673_v38, %v4672_v62  ;;  %v4486_v54 = vadd.f32 %v10327_v35, %v4485_v33 }
 0x489   :  { %v4487_v34 = vpop.f32.mrf.mxu0 }
 0x48a   :  { %7227 = vmatprep.mubr.bf16.mxu1 %v4726_v24  ;;  %v4674_v51 = vmax.f32 %v4486_v54, 0.0 }
 0x48b   :  { %v4488_v55 = vpop.f32.mrf.mxu0 }
 0x48c   :  { %v4489_v44 = vadd.f32 %v10327_v35, %v4488_v55 }
 0x48d   :  { %v4490_v56 = vpop.f32.mrf.mxu0 }
 0x48e   :  { %v4675_v15 = vmax.f32 %v4489_v44, 0.0 }
 0x48f   :  { %v4493_v49 = vpop.f32.mrf.mxu0 }
 0x490   :  { %v4727_v5 = vpack.c.bf16 %v4675_v15, %v4674_v51  ;;  %v4494_v3 = vadd.f32 %v10327_v35, %v4493_v49 }
 0x491   :  { %v4495_v23 = vpop.f32.mrf.mxu0 }
 0x492   :  { %7228 = vmatmul.mubr.bf16.gmra.mxu1 %v4727_v5  ;;  %v4676_v14 = vmax.f32 %v4494_v3, 0.0 }
 0x493   :  { %v4496_v43 = vpop.f32.mrf.mxu0 }
 0x494   :  { %v4497_v0 = vadd.f32 %v10327_v35, %v4496_v43 }
 0x495   :  { %v4498_v39 = vpop.f32.mrf.mxu0 }
 0x496   :  { %v4677_v26 = vmax.f32 %v4497_v0, 0.0 }
 0x497   :  { %v4501_v19 = vpop.f32.mrf.mxu0 }
 0x498   :  { %v4728_v29 = vpack.c.bf16 %v4677_v26, %v4676_v14  ;;  %v4502_v27 = vadd.f32 %v10327_v35, %v4501_v19 }
 0x499   :  { %v4503_v59 = vpop.f32.mrf.mxu0 }
 0x49a   :  { %7231 = vmatprep.mubr.bf16.mxu1 %v4728_v29  ;;  %v4678_v42 = vmax.f32 %v4502_v27, 0.0 }
 0x49b   :  { %v4504_v45 = vpop.f32.mrf.mxu0 }
 0x49c   :  { %v4505_v17 = vadd.f32 %v10327_v35, %v4504_v45 }
 0x49d   :  { %v4506_v7 = vpop.f32.mrf.mxu0 }
 0x49e   :  { %v4679_v20 = vmax.f32 %v4505_v17, 0.0 }
 0x49f   :  { %v4509_v10 = vpop.f32.mrf.mxu0 }
 0x4a0   :  { %v4729_v41 = vpack.c.bf16 %v4679_v20, %v4678_v42  ;;  %v4510_v28 = vadd.f32 %v10327_v35, %v4509_v10 }
 0x4a1   :  { %v4511_v60 = vpop.f32.mrf.mxu0 }
 0x4a2   :  { %7232 = vmatmul.mubr.bf16.gmra.mxu1 %v4729_v41  ;;  %v4680_v21 = vmax.f32 %v4510_v28, 0.0 }
 0x4a3   :  { %v4512_v22 = vpop.f32.mrf.mxu0 }
 0x4a4   :  { %v4513_v8 = vadd.f32 %v10327_v35, %v4512_v22 }
 0x4a5   :  { %v4514_v48 = vpop.f32.mrf.mxu0 }
 0x4a6   :  { %v4681_v40 = vmax.f32 %v4513_v8, 0.0 }
 0x4a7   :  { %v4517_v18 = vpop.f32.mrf.mxu0 }
 0x4a8   :  { %v4730_v4 = vpack.c.bf16 %v4681_v40, %v4680_v21  ;;  %v4518_v36 = vadd.f32 %v10327_v35, %v4517_v18 }
 0x4a9   :  { %v4519_v50 = vpop.f32.mrf.mxu0 }
 0x4aa   :  { %7235 = vmatprep.mubr.bf16.mxu1 %v4730_v4  ;;  %v4682_v63 = vmax.f32 %v4518_v36, 0.0 }
 0x4ab   :  { %v4520_v46 = vpop.f32.mrf.mxu0 }
 0x4ac   :  { %v4521_v13 = vadd.f32 %v10327_v35, %v4520_v46 }
 0x4ad   :  { %v4522_v25 = vpop.f32.mrf.mxu0 }
 0x4ae   :  { %v4683_v53 = vmax.f32 %v4521_v13, 0.0 }
 0x4af   :  { %v4525_v6 = vpop.f32.mrf.mxu0 }
 0x4b0   :  { %v4731_v30 = vpack.c.bf16 %v4683_v53, %v4682_v63  ;;  %v4526_v9 = vadd.f32 %v10327_v35, %v4525_v6 }
 0x4b1   :  { %v4527_v32 = vpop.f32.mrf.mxu0 }
 0x4b2   :  { %7236 = vmatmul.mubr.bf16.gmra.mxu1 %v4731_v30  ;;  %v4684_v31 = vmax.f32 %v4526_v9, 0.0 }
 0x4b3   :  { %v4528_v58 = vpop.f32.mrf.mxu0 }
 0x4b4   :  { %v4529_v52 = vadd.f32 %v10327_v35, %v4528_v58 }
 0x4b5   :  { %v4530_v47 = vpop.f32.mrf.mxu0 }
 0x4b6   :  { %v4685_v37 = vmax.f32 %v4529_v52, 0.0 }
 0x4b7   :  { %v4533_v16 = vpop.f32.mrf.mxu0 }
 0x4b8   :  { %v4732_v61 = vpack.c.bf16 %v4685_v37, %v4684_v31  ;;  %v4534_v1 = vadd.f32 %v10327_v35, %v4533_v16 }
 0x4b9   :  { %v4535_v12 = vpop.f32.mrf.mxu0 }
 0x4ba   :  { %7239 = vmatprep.mubr.bf16.mxu1 %v4732_v61  ;;  %v4686_v62 = vmax.f32 %v4534_v1, 0.0 }
 0x4bb   :  { %v4536_v2 = vpop.f32.mrf.mxu0 }
 0x4bc   :  { %v4537_v11 = vadd.f32 %v10327_v35, %v4536_v2 }
 0x4bd   :  { %v4538_v57 = vpop.f32.mrf.mxu0 }
 0x4be   :  { %v4687_v38 = vmax.f32 %v4537_v11, 0.0 }
 0x4bf   :  { %v4541_v33 = vpop.f32.mrf.mxu0 }
 0x4c0   :  { %v4733_v24 = vpack.c.bf16 %v4687_v38, %v4686_v62  ;;  %v4542_v54 = vadd.f32 %v10327_v35, %v4541_v33 }
 0x4c1   :  { %v4543_v34 = vpop.f32.mrf.mxu0 }
 0x4c2   :  { %7240 = vmatmul.mubr.bf16.gmra.mxu1 %v4733_v24  ;;  %v4688_v51 = vmax.f32 %v4542_v54, 0.0 }
 0x4c3   :  { %v4544_v55 = vpop.f32.mrf.mxu0 }
 0x4c4   :  { %v4545_v44 = vadd.f32 %v10327_v35, %v4544_v55 }
 0x4c5   :  { %v4546_v56 = vpop.f32.mrf.mxu0 }
 0x4c6   :  { %v4689_v15 = vmax.f32 %v4545_v44, 0.0 }
 0x4c7   :  { %v4549_v49 = vpop.f32.mrf.mxu0 }
 0x4c8   :  { %v4734_v5 = vpack.c.bf16 %v4689_v15, %v4688_v51  ;;  %v4550_v3 = vadd.f32 %v10327_v35, %v4549_v49 }
 0x4c9   :  { %v4551_v23 = vpop.f32.mrf.mxu0 }
 0x4ca   :  { %7243 = vmatprep.mubr.bf16.mxu1 %v4734_v5  ;;  %v4690_v14 = vmax.f32 %v4550_v3, 0.0  ;;  %v10419_v23 = vld [vmem:[%s11230_s6] ss:$0 sm:$0xff] }
 0x4cb   :  { %v4552_v43 = vpop.f32.mrf.mxu0 }
 0x4cc   :  { %v4553_v0 = vadd.f32 %v10327_v35, %v4552_v43 }
 0x4cd   :  { %v4554_v39 = vpop.f32.mrf.mxu0 }
 0x4ce   :  { %v4691_v26 = vmax.f32 %v4553_v0, 0.0 }
 0x4cf   :  { %v4557_v19 = vpop.f32.mrf.mxu0 }
 0x4d0   :  { %v4735_v29 = vpack.c.bf16 %v4691_v26, %v4690_v14  ;;  %v4558_v27 = vadd.f32 %v10327_v35, %v4557_v19 }
 0x4d1   :  { %v4559_v59 = vpop.f32.mrf.mxu0 }
 0x4d2   :  { %7244 = vmatmul.mubr.bf16.gmra.mxu1 %v4735_v29  ;;  %v4692_v42 = vmax.f32 %v4558_v27, 0.0 }
 0x4d3   :  { %v4560_v45 = vpop.f32.mrf.mxu0 }
 0x4d4   :  { %v4561_v17 = vadd.f32 %v10327_v35, %v4560_v45 }
 0x4d5   :  { %v4562_v7 = vpop.f32.mrf.mxu0 }
 0x4d6   :  { %v4693_v20 = vmax.f32 %v4561_v17, 0.0 }
 0x4d7   :  { %v4565_v10 = vpop.f32.mrf.mxu0 }
 0x4d8   :  { %v4736_v41 = vpack.c.bf16 %v4693_v20, %v4692_v42  ;;  %v4566_v28 = vadd.f32 %v10327_v35, %v4565_v10 }
 0x4d9   :  { %v4567_v60 = vpop.f32.mrf.mxu0 }
 0x4da   :  { %7247 = vmatprep.mubr.bf16.mxu1 %v4736_v41  ;;  %v4694_v21 = vmax.f32 %v4566_v28, 0.0 }
 0x4db   :  { %v4568_v22 = vpop.f32.mrf.mxu0 }
 0x4dc   :  { %v4569_v8 = vadd.f32 %v10327_v35, %v4568_v22 }
 0x4dd   :  { %v4570_v48 = vpop.f32.mrf.mxu0 }
 0x4de   :  { %v4695_v40 = vmax.f32 %v4569_v8, 0.0 }
 0x4df   :  { %v4573_v18 = vpop.f32.mrf.mxu0 }
 0x4e0   :  { %v4737_v4 = vpack.c.bf16 %v4695_v40, %v4694_v21  ;;  %v4574_v36 = vadd.f32 %v10327_v35, %v4573_v18 }
 0x4e1   :  { %v4575_v50 = vpop.f32.mrf.mxu0 }
 0x4e2   :  { %7248 = vmatmul.mubr.bf16.gmra.mxu1 %v4737_v4  ;;  %v4696_v63 = vmax.f32 %v4574_v36, 0.0 }
 0x4e3   :  { %v4576_v46 = vpop.f32.mrf.mxu0 }
 0x4e4   :  { %v4577_v13 = vadd.f32 %v10327_v35, %v4576_v46 }
 0x4e5   :  { %v4578_v25 = vpop.f32.mrf.mxu0 }
 0x4e6   :  { %v4697_v53 = vmax.f32 %v4577_v13, 0.0 }
 0x4e7   :  { %v4581_v6 = vpop.f32.mrf.mxu0 }
 0x4e8   :  { %v4738_v30 = vpack.c.bf16 %v4697_v53, %v4696_v63  ;;  %v4582_v9 = vadd.f32 %v10327_v35, %v4581_v6 }
 0x4e9   :  { %v4583_v32 = vpop.f32.mrf.mxu0 }
 0x4ea   :  { %7251 = vmatprep.mubr.bf16.mxu1 %v4738_v30  ;;  %v4698_v31 = vmax.f32 %v4582_v9, 0.0 }
 0x4eb   :  { %v4584_v58 = vpop.f32.mrf.mxu0 }
 0x4ec   :  { %v4585_v52 = vadd.f32 %v10327_v35, %v4584_v58 }
 0x4ed   :  { %v4586_v47 = vpop.f32.mrf.mxu0 }
 0x4ee   :  { %v4699_v37 = vmax.f32 %v4585_v52, 0.0 }
 0x4ef   :  { %v4589_v16 = vpop.f32.mrf.mxu0 }
 0x4f0   :  { %v4739_v61 = vpack.c.bf16 %v4699_v37, %v4698_v31  ;;  %v4590_v1 = vadd.f32 %v10327_v35, %v4589_v16 }
 0x4f1   :  { %v4591_v12 = vpop.f32.mrf.mxu0 }
 0x4f2   :  { %7252 = vmatmul.mubr.bf16.gmra.mxu1 %v4739_v61  ;;  %v4700_v62 = vmax.f32 %v4590_v1, 0.0 }
 0x4f3   :  { %v4592_v2 = vpop.f32.mrf.mxu0 }
 0x4f4   :  { %v4593_v11 = vadd.f32 %v10327_v35, %v4592_v2 }
 0x4f5   :  { %v4594_v57 = vpop.f32.mrf.mxu0 }
 0x4f6   :  { %v4701_v38 = vmax.f32 %v4593_v11, 0.0 }
 0x4f7   :  { %v4597_v33 = vpop.f32.mrf.mxu0 }
 0x4f8   :  { %v4740_v24 = vpack.c.bf16 %v4701_v38, %v4700_v62  ;;  %v4598_v54 = vadd.f32 %v10327_v35, %v4597_v33 }
 0x4f9   :  { %v4599_v34 = vpop.f32.mrf.mxu0 }
 0x4fa   :  { %7255 = vmatprep.mubr.bf16.mxu1 %v4740_v24  ;;  %v4702_v51 = vmax.f32 %v4598_v54, 0.0 }
 0x4fb   :  { %v4600_v55 = vpop.f32.mrf.mxu0 }
 0x4fc   :  { %v4601_v44 = vadd.f32 %v10327_v35, %v4600_v55 }
 0x4fd   :  { %v4602_v56 = vpop.f32.mrf.mxu0 }
 0x4fe   :  { %v4703_v15 = vmax.f32 %v4601_v44, 0.0 }
 0x4ff   :  { %v4605_v49 = vpop.f32.mrf.mxu0 }
 0x500   :  { %v4741_v5 = vpack.c.bf16 %v4703_v15, %v4702_v51  ;;  %v4606_v43 = vadd.f32 %v10327_v35, %v4605_v49 }
 0x501   :  { %v4607_v3 = vpop.f32.mrf.mxu0 }
 0x502   :  { %v7209_v0 = vpop.f32.mrf.mxu1  ;;  %7256 = vmatmul.mubr.bf16.gmra.mxu1 %v4741_v5  ;;  %v4704_v59 = vmax.f32 %v4606_v43, 0.0 }
 0x503   :  { %v10423_v39 = vadd.f32 %v7209_v0, %v10419_v23  ;;  %v4608_v14 = vpop.f32.mrf.mxu0 }
 0x504   :  { %v4609_v26 = vadd.f32 %v10327_v35, %v4608_v14  ;;  %v4853_v19 = vpop.f32.mrf.mxu1 }
 0x505   :  { %v4610_v29 = vpop.f32.mrf.mxu0  ;;  %5112 = vadd.xlane.f32.xlu0 %v10423_v39  ;;  %v10428_v17 = vadd.f32 %v10419_v23, %v4853_v19 }
 0x506   :  { %v4705_v27 = vmax.f32 %v4609_v26, 0.0  ;;  %v7210_v45 = vpop.f32.mrf.mxu1 }
 0x507   :  { %v4613_v7 = vpop.f32.mrf.mxu0  ;;  %v10436_v28 = vadd.f32 %v7210_v45, %v10419_v23 }
 0x508   :  { %v4742_v42 = vpack.c.bf16 %v4705_v27, %v4704_v59  ;;  %v4856_v20 = vpop.f32.mrf.mxu1  ;;  %v4614_v60 = vadd.f32 %v10327_v35, %v4613_v7 }
 0x509   :  { %v4615_v10 = vpop.f32.mrf.mxu0  ;;  %5108 = vadd.xlane.f32.xlu0 %v10428_v17  ;;  %v10432_v41 = vadd.f32 %v10419_v23, %v4856_v20 }
 0x50a   :  { %7259 = vmatprep.mubr.bf16.mxu1 %v4742_v42  ;;  %v4706_v21 = vmax.f32 %v4614_v60, 0.0 }
 0x50b   :  { %v4616_v22 = vpop.f32.mrf.mxu0  ;;  %5110 = vadd.xlane.f32.xlu1 %v10432_v41 }
 0x50c   :  { %v4617_v8 = vadd.f32 %v10327_v35, %v4616_v22 }
 0x50d   :  { %v4618_v48 = vpop.f32.mrf.mxu0  ;;  %5114 = vadd.xlane.f32.xlu0 %v10436_v28 }
 0x50e   :  { %v4707_v40 = vmax.f32 %v4617_v8, 0.0 }
 0x50f   :  { %v4621_v18 = vpop.f32.mrf.mxu0 }
 0x510   :  { %v4743_v4 = vpack.c.bf16 %v4707_v40, %v4706_v21  ;;  %v4622_v36 = vadd.f32 %v10327_v35, %v4621_v18 }
 0x511   :  { %v4623_v50 = vpop.f32.mrf.mxu0 }
 0x512   :  { %7260 = vmatmul.mubr.bf16.gmra.mxu1 %v4743_v4  ;;  %v7213_v46 = vpop.f32.mrf.mxu1  ;;  %v4708_v30 = vmax.f32 %v4622_v36, 0.0 }
 0x513   :  { %v4624_v13 = vpop.f32.mrf.mxu0  ;;  %v10443_v25 = vadd.f32 %v7213_v46, %v10419_v23 }
 0x514   :  { %v4625_v63 = vadd.f32 %v10327_v35, %v4624_v13  ;;  %v4869_v53 = vpop.f32.mrf.mxu1 }
 0x515   :  { %v4626_v6 = vpop.f32.mrf.mxu0  ;;  %5120 = vadd.xlane.f32.xlu1 %v10443_v25  ;;  %v10448_v52 = vadd.f32 %v10419_v23, %v4869_v53 }
 0x516   :  { %v4709_v32 = vmax.f32 %v4625_v63, 0.0  ;;  %v7214_v9 = vpop.f32.mrf.mxu1 }
 0x517   :  { %v4629_v58 = vpop.f32.mrf.mxu0  ;;  %v10451_v47 = vadd.f32 %v7214_v9, %v10419_v23 }
 0x518   :  { %v4744_v31 = vpack.c.bf16 %v4709_v32, %v4708_v30  ;;  %v4872_v37 = vpop.f32.mrf.mxu1  ;;  %v4630_v61 = vadd.f32 %v10327_v35, %v4629_v58 }
 0x519   :  { %v4631_v16 = vpop.f32.mrf.mxu0  ;;  %5122 = vadd.xlane.f32.xlu0 %v10451_v47  ;;  %5116 = vadd.xlane.f32.xlu1 %v10448_v52  ;;  %v10457_v1 = vadd.f32 %v10419_v23, %v4872_v37 }
 0x51a   :  { %7263 = vmatprep.mubr.bf16.mxu1 %v4744_v31  ;;  %v4710_v57 = vmax.f32 %v4630_v61, 0.0 }
 0x51b   :  { %v4632_v12 = vpop.f32.mrf.mxu0 }
 0x51c   :  { %v4633_v2 = vadd.f32 %v10327_v35, %v4632_v12 }
 0x51d   :  { %v4634_v11 = vpop.f32.mrf.mxu0  ;;  %5118 = vadd.xlane.f32.xlu0 %v10457_v1 }
 0x51e   :  { %v4711_v62 = vmax.f32 %v4633_v2, 0.0 }
 0x51f   :  { %v4637_v38 = vpop.f32.mrf.mxu0 }
 0x520   :  { %v4745_v33 = vpack.c.bf16 %v4711_v62, %v4710_v57  ;;  %v4638_v34 = vadd.f32 %v10327_v35, %v4637_v38 }
 0x521   :  { %v4639_v24 = vpop.f32.mrf.mxu0 }
 0x522   :  { %7264 = vmatmul.mubr.bf16.gmra.mxu1 %v4745_v33  ;;  %v7217_v54 = vpop.f32.mrf.mxu1  ;;  %v4712_v49 = vmax.f32 %v4638_v34, 0.0 }
 0x523   :  { %v4640_v55 = vpop.f32.mrf.mxu0  ;;  %v10463_v44 = vadd.f32 %v7217_v54, %v10419_v23 }
 0x524   :  { %v4641_v56 = vadd.f32 %v10327_v35, %v4640_v55  ;;  %v4885_v51 = vpop.f32.mrf.mxu1 }
 0x525   :  { %v4642_v15 = vpop.f32.mrf.mxu0  ;;  %5128 = vadd.xlane.f32.xlu1 %v10463_v44  ;;  %v10468_v0 = vadd.f32 %v10419_v23, %v4885_v51 }
 0x526   :  { %v4713_v5 = vmax.f32 %v4641_v56, 0.0  ;;  %v7218_v3 = vpop.f32.mrf.mxu1 }
 0x527   :  { %v4645_v43 = vpop.f32.mrf.mxu0  ;;  %v10471_v14 = vadd.f32 %v7218_v3, %v10419_v23 }
 0x528   :  { %v4746_v26 = vpack.c.bf16 %v4713_v5, %v4712_v49  ;;  %v4888_v19 = vpop.f32.mrf.mxu1  ;;  %v4646_v59 = vadd.f32 %v10327_v35, %v4645_v43 }
 0x529   :  { %v4647_v29 = vpop.f32.mrf.mxu0  ;;  %5130 = vadd.xlane.f32.xlu0 %v10471_v14  ;;  %5124 = vadd.xlane.f32.xlu1 %v10468_v0  ;;  %v10477_v45 = vadd.f32 %v10419_v23, %v4888_v19 }
 0x52a   :  { %7267 = vmatprep.mubr.bf16.mxu1 %v4746_v26  ;;  %v4714_v20 = vmax.f32 %v4646_v59, 0.0 }
 0x52b   :  { %v4648_v27 = vpop.f32.mrf.mxu0 }
 0x52c   :  { %v4649_v7 = vadd.f32 %v10327_v35, %v4648_v27 }
 0x52d   :  { %5126 = vadd.xlane.f32.xlu0 %v10477_v45  ;;  %v4650_v42 = vpop.f32.mrf.mxu0 }
 0x52e   :  { %v4715_v10 = vmax.f32 %v4649_v7, 0.0 }
 0x530   :  { %v4747_v60 = vpack.c.bf16 %v4715_v10, %v4714_v20 }
 0x532   :  { %7268 = vmatmul.mubr.bf16.gmra.mxu1 %v4747_v60  ;;  %v7221_v22 = vpop.f32.mrf.mxu1 }
 0x533   :  { %v10482_v8 = vadd.f32 %v7221_v22, %v10419_v23 }
 0x534   :  { %v4901_v48 = vpop.f32.mrf.mxu1 }
 0x535   :  { %5136 = vadd.xlane.f32.xlu1 %v10482_v8  ;;  %v10486_v40 = vadd.f32 %v10419_v23, %v4901_v48 }
 0x536   :  { %v7222_v21 = vpop.f32.mrf.mxu1 }
 0x537   :  { %v10489_v35 = vadd.f32 %v7222_v21, %v10419_v23 }
 0x538   :  { %v4904_v18 = vpop.f32.mrf.mxu1 }
 0x539   :  { %5138 = vadd.xlane.f32.xlu0 %v10489_v35  ;;  %5132 = vadd.xlane.f32.xlu1 %v10486_v40  ;;  %v10494_v4 = vadd.f32 %v10419_v23, %v4904_v18 }
 0x53d   :  { %5134 = vadd.xlane.f32.xlu0 %v10494_v4 }
 0x542   :  { %v7225_v50 = vpop.f32.mrf.mxu1 }
 0x543   :  { %v10498_v36 = vadd.f32 %v7225_v50, %v10419_v23 }
 0x544   :  { %v4917_v46 = vpop.f32.mrf.mxu1 }
 0x545   :  { %5144 = vadd.xlane.f32.xlu1 %v10498_v36  ;;  %v10502_v63 = vadd.f32 %v10419_v23, %v4917_v46 }
 0x546   :  { %v7226_v13 = vpop.f32.mrf.mxu1 }
 0x547   :  { %v10505_v53 = vadd.f32 %v7226_v13, %v10419_v23 }
 0x548   :  { %v4920_v6 = vpop.f32.mrf.mxu1 }
 0x549   :  { %5146 = vadd.xlane.f32.xlu0 %v10505_v53  ;;  %5140 = vadd.xlane.f32.xlu1 %v10502_v63  ;;  %v10510_v30 = vadd.f32 %v10419_v23, %v4920_v6 }
 0x54d   :  { %5142 = vadd.xlane.f32.xlu0 %v10510_v30 }
 0x552   :  { %v7229_v32 = vpop.f32.mrf.mxu1 }
 0x553   :  { %v10514_v9 = vadd.f32 %v7229_v32, %v10419_v23 }
 0x554   :  { %v4933_v58 = vpop.f32.mrf.mxu1 }
 0x555   :  { %5152 = vadd.xlane.f32.xlu1 %v10514_v9  ;;  %v10518_v37 = vadd.f32 %v10419_v23, %v4933_v58 }
 0x556   :  { %v7230_v31 = vpop.f32.mrf.mxu1 }
 0x557   :  { %v10521_v16 = vadd.f32 %v7230_v31, %v10419_v23 }
 0x558   :  { %v4936_v61 = vpop.f32.mrf.mxu1 }
 0x559   :  { %5154 = vadd.xlane.f32.xlu0 %v10521_v16  ;;  %5148 = vadd.xlane.f32.xlu1 %v10518_v37  ;;  %v10526_v12 = vadd.f32 %v10419_v23, %v4936_v61 }
 0x55d   :  { %5150 = vadd.xlane.f32.xlu0 %v10526_v12 }
 0x562   :  { %v7233_v2 = vpop.f32.mrf.mxu1 }
 0x563   :  { %v10530_v11 = vadd.f32 %v7233_v2, %v10419_v23 }
 0x564   :  { %v4949_v57 = vpop.f32.mrf.mxu1 }
 0x565   :  { %5160 = vadd.xlane.f32.xlu1 %v10530_v11  ;;  %v10534_v38 = vadd.f32 %v10419_v23, %v4949_v57 }
 0x566   :  { %v7234_v62 = vpop.f32.mrf.mxu1 }
 0x567   :  { %v10537_v33 = vadd.f32 %v7234_v62, %v10419_v23 }
 0x568   :  { %v4952_v24 = vpop.f32.mrf.mxu1 }
 0x569   :  { %5162 = vadd.xlane.f32.xlu0 %v10537_v33  ;;  %5156 = vadd.xlane.f32.xlu1 %v10534_v38  ;;  %v10542_v34 = vadd.f32 %v10419_v23, %v4952_v24 }
 0x56d   :  { %5158 = vadd.xlane.f32.xlu0 %v10542_v34 }
 0x572   :  { %v7237_v54 = vpop.f32.mrf.mxu1 }
 0x573   :  { %v10546_v55 = vadd.f32 %v7237_v54, %v10419_v23 }
 0x574   :  { %v4965_v56 = vpop.f32.mrf.mxu1 }
 0x575   :  { %5168 = vadd.xlane.f32.xlu1 %v10546_v55  ;;  %v10550_v15 = vadd.f32 %v10419_v23, %v4965_v56 }
 0x576   :  { %v7238_v51 = vpop.f32.mrf.mxu1 }
 0x577   :  { %v10553_v49 = vadd.f32 %v7238_v51, %v10419_v23 }
 0x578   :  { %v4968_v5 = vpop.f32.mrf.mxu1 }
 0x579   :  { %5164 = vadd.xlane.f32.xlu1 %v10550_v15  ;;  %5170 = vadd.xlane.f32.xlu0 %v10553_v49  ;;  %v10558_v3 = vadd.f32 %v10419_v23, %v4968_v5 }
 0x57d   :  { %5166 = vadd.xlane.f32.xlu0 %v10558_v3 }
 0x582   :  { %v7241_v43 = vpop.f32.mrf.mxu1 }
 0x583   :  { %v10562_v26 = vadd.f32 %v7241_v43, %v10419_v23 }
 0x584   :  { %v4981_v19 = vpop.f32.mrf.mxu1 }
 0x585   :  { %5176 = vadd.xlane.f32.xlu1 %v10562_v26  ;;  %v10566_v59 = vadd.f32 %v10419_v23, %v4981_v19 }
 0x586   :  { %v7242_v29 = vpop.f32.mrf.mxu1 }
 0x587   :  { %v10569_v27 = vadd.f32 %v7242_v29, %v10419_v23 }
 0x588   :  { %v4984_v7 = vpop.f32.mrf.mxu1 }
 0x589   :  { %5172 = vadd.xlane.f32.xlu1 %v10566_v59  ;;  %5178 = vadd.xlane.f32.xlu0 %v10569_v27  ;;  %v10574_v42 = vadd.f32 %v10419_v23, %v4984_v7 }
 0x58d   :  { %5174 = vadd.xlane.f32.xlu0 %v10574_v42 }
 0x58e   :  { %v5113_v20 = vpop.xlane.xlu0 %5112 }
 0x58f   :  { %v5239_v10 = vmul.f32 0.0078125, %v5113_v20 }
 0x591   :  { %v10578_v48 = vsub.f32 %v10423_v39, %v5239_v10 }
 0x592   :  { %v7245_v60 = vpop.f32.mrf.mxu1  ;;  %v5109_v22 = vpop.xlane.xlu0 %5108 }
 0x593   :  { %v10581_v21 = vadd.f32 %v7245_v60, %v10419_v23  ;;  %v5237_v13 = vmul.f32 0.0078125, %v5109_v22  ;;  %v5367_v58 = vmul.f32 %v10578_v48, %v10578_v48 }
 0x594   :  { %v4997_v18 = vpop.f32.mrf.mxu1  ;;  %v5111_v31 = vpop.xlane.xlu1 %5110 }
 0x595   :  { %5184 = vadd.xlane.f32.xlu1 %v10581_v21  ;;  %v10594_v61 = vsub.f32 %v10428_v17, %v5237_v13  ;;  %v10597_v2 = vadd.f32 %v10419_v23, %v4997_v18  ;;  %v5238_v62 = vmul.f32 0.0078125, %v5111_v31 }
 0x596   :  { %v7246_v50 = vpop.f32.mrf.mxu1  ;;  %v5115_v46 = vpop.xlane.xlu0 %5114 }
 0x597   :  { %v10585_v6 = vadd.f32 %v7246_v50, %v10419_v23  ;;  %v5240_v32 = vmul.f32 0.0078125, %v5115_v46  ;;  %v10606_v56 = vsub.f32 %v10432_v41, %v5238_v62  ;;  %v5365_v17 = vmul.f32 %v10594_v61, %v10594_v61 }
 0x598   :  { %v5000_v24 = vpop.f32.mrf.mxu1 }
 0x599   :  { %v10590_v39 = vsub.f32 %v10436_v28, %v5240_v32  ;;  %5433 = vadd.xlane.f32.xlu1 %v5367_v58  ;;  %5186 = vadd.xlane.f32.xlu0 %v10585_v6  ;;  %v10603_v28 = vadd.f32 %v10419_v23, %v5000_v24  ;;  %v5366_v7 = vmul.f32 %v10606_v56, %v10606_v56 }
 0x59b   :  { %v5368_v57 = vmul.f32 %v10590_v39, %v10590_v39 }
 0x59d   :  { %5180 = vadd.xlane.f32.xlu1 %v10597_v2  ;;  %5435 = vadd.xlane.f32.xlu0 %v5368_v57 }
 0x59e   :  { %v5121_v54 = vpop.xlane.xlu1 %5120 }
 0x59f   :  { %v5243_v51 = vmul.f32 0.0078125, %v5121_v54 }
 0x5a1   :  { %5429 = vadd.xlane.f32.xlu1 %v5365_v17  ;;  %5182 = vadd.xlane.f32.xlu0 %v10603_v28  ;;  %v10615_v29 = vsub.f32 %v10443_v25, %v5243_v51 }
 0x5a2   :  { %v7249_v5 = vpop.f32.mrf.mxu1  ;;  %v5123_v43 = vpop.xlane.xlu0 %5122 }
 0x5a3   :  { %v10612_v19 = vadd.f32 %v7249_v5, %v10419_v23  ;;  %v5244_v41 = vmul.f32 0.0078125, %v5123_v43  ;;  %v5117_v10 = vpop.xlane.xlu1 %5116  ;;  %v5371_v25 = vmul.f32 %v10615_v29, %v10615_v29 }
 0x5a4   :  { %v5013_v20 = vpop.f32.mrf.mxu1  ;;  %v5241_v50 = vmul.f32 0.0078125, %v5117_v10 }
 0x5a5   :  { %5192 = vadd.xlane.f32.xlu1 %v10612_v19  ;;  %5431 = vadd.xlane.f32.xlu0 %v5366_v7  ;;  %v10624_v18 = vsub.f32 %v10451_v47, %v5244_v41  ;;  %v10630_v13 = vadd.f32 %v10419_v23, %v5013_v20 }
 0x5a6   :  { %v7250_v60 = vpop.f32.mrf.mxu1  ;;  %v5119_v46 = vpop.xlane.xlu0 %5118  ;;  %v10633_v32 = vsub.f32 %v10448_v52, %v5241_v50 }
 0x5a7   :  { %v10621_v22 = vadd.f32 %v7250_v60, %v10419_v23  ;;  %v5372_v58 = vmul.f32 %v10624_v18, %v10624_v18  ;;  %v5242_v31 = vmul.f32 0.0078125, %v5119_v46 }
 0x5a8   :  { %v5016_v47 = vpop.f32.mrf.mxu1  ;;  %v5369_v54 = vmul.f32 %v10633_v32, %v10633_v32 }
 0x5a9   :  { %5441 = vadd.xlane.f32.xlu1 %v5371_v25  ;;  %5194 = vadd.xlane.f32.xlu0 %v10621_v22  ;;  %v10639_v62 = vadd.f32 %v10419_v23, %v5016_v47  ;;  %v10642_v24 = vsub.f32 %v10457_v1, %v5242_v31 }
 0x5ab   :  { %v5370_v7 = vmul.f32 %v10642_v24, %v10642_v24 }
 0x5ad   :  { %5188 = vadd.xlane.f32.xlu1 %v10630_v13  ;;  %5443 = vadd.xlane.f32.xlu0 %v5372_v58 }
 0x5ae   :  { %v5129_v57 = vpop.xlane.xlu1 %5128 }
 0x5af   :  { %v5247_v52 = vmul.f32 0.0078125, %v5129_v57 }
 0x5b1   :  { %5437 = vadd.xlane.f32.xlu1 %v5369_v54  ;;  %5190 = vadd.xlane.f32.xlu0 %v10639_v62  ;;  %v10651_v43 = vsub.f32 %v10463_v44, %v5247_v52 }
 0x5b2   :  { %v7253_v17 = vpop.f32.mrf.mxu1  ;;  %v5131_v51 = vpop.xlane.xlu0 %5130 }
 0x5b3   :  { %v10648_v5 = vadd.f32 %v7253_v17, %v10419_v23  ;;  %v5248_v1 = vmul.f32 0.0078125, %v5131_v51  ;;  %v5125_v20 = vpop.xlane.xlu1 %5124  ;;  %v5375_v44 = vmul.f32 %v10651_v43, %v10651_v43 }
 0x5b4   :  { %v5029_v41 = vpop.f32.mrf.mxu1  ;;  %v5245_v50 = vmul.f32 0.0078125, %v5125_v20 }
 0x5b5   :  { %5200 = vadd.xlane.f32.xlu1 %v10648_v5  ;;  %5439 = vadd.xlane.f32.xlu0 %v5370_v7  ;;  %v10660_v25 = vsub.f32 %v10471_v14, %v5248_v1  ;;  %v10666_v58 = vadd.f32 %v10419_v23, %v5029_v41 }
 0x5b6   :  { %v7254_v10 = vpop.f32.mrf.mxu1  ;;  %v5127_v46 = vpop.xlane.xlu0 %5126  ;;  %v10669_v31 = vsub.f32 %v10468_v0, %v5245_v50 }
 0x5b7   :  { %v10657_v60 = vadd.f32 %v7254_v10, %v10419_v23  ;;  %v5376_v47 = vmul.f32 %v10660_v25, %v10660_v25  ;;  %v5246_v57 = vmul.f32 0.0078125, %v5127_v46 }
 0x5b8   :  { %v5032_v14 = vpop.f32.mrf.mxu1  ;;  %v5373_v51 = vmul.f32 %v10669_v31, %v10669_v31 }
 0x5b9   :  { %5449 = vadd.xlane.f32.xlu1 %v5375_v44  ;;  %5202 = vadd.xlane.f32.xlu0 %v10657_v60  ;;  %v10675_v52 = vadd.f32 %v10419_v23, %v5032_v14  ;;  %v10678_v17 = vsub.f32 %v10477_v45, %v5246_v57 }
 0x5bb   :  { %v5374_v10 = vmul.f32 %v10678_v17, %v10678_v17 }
 0x5bd   :  { %5196 = vadd.xlane.f32.xlu1 %v10666_v58  ;;  %5451 = vadd.xlane.f32.xlu0 %v5376_v47 }
 0x5be   :  { %v5137_v54 = vpop.xlane.xlu1 %5136 }
 0x5bf   :  { %v5251_v0 = vmul.f32 0.0078125, %v5137_v54 }
 0x5c1   :  { %5445 = vadd.xlane.f32.xlu1 %v5373_v51  ;;  %5198 = vadd.xlane.f32.xlu0 %v10675_v52  ;;  %v10687_v20 = vsub.f32 %v10482_v8, %v5251_v0 }
 0x5c2   :  { %v7257_v7 = vpop.f32.mrf.mxu1  ;;  %v5139_v1 = vpop.xlane.xlu0 %5138 }
 0x5c3   :  { %v10684_v41 = vadd.f32 %v7257_v7, %v10419_v23  ;;  %v5252_v45 = vmul.f32 0.0078125, %v5139_v1  ;;  %v5133_v50 = vpop.xlane.xlu1 %5132  ;;  %v5379_v8 = vmul.f32 %v10687_v20, %v10687_v20 }
 0x5c4   :  { %v5045_v44 = vpop.f32.mrf.mxu1  ;;  %v5249_v14 = vmul.f32 0.0078125, %v5133_v50 }
 0x5c5   :  { %5208 = vadd.xlane.f32.xlu1 %v10684_v41  ;;  %5447 = vadd.xlane.f32.xlu0 %v5374_v10  ;;  %v10696_v57 = vsub.f32 %v10489_v35, %v5252_v45  ;;  %v10702_v51 = vadd.f32 %v10419_v23, %v5045_v44 }
 0x5c6   :  { %v7258_v46 = vpop.f32.mrf.mxu1  ;;  %v5135_v54 = vpop.xlane.xlu0 %5134  ;;  %v10705_v0 = vsub.f32 %v10486_v40, %v5249_v14 }
 0x5c7   :  { %v10693_v47 = vadd.f32 %v7258_v46, %v10419_v23  ;;  %v5380_v7 = vmul.f32 %v10696_v57, %v10696_v57  ;;  %v5250_v1 = vmul.f32 0.0078125, %v5135_v54 }
 0x5c8   :  { %11461 = vst [vmem:[#allocation6_spill] sm:$0xff] %v10705_v0  ;;  %v5048_v35 = vpop.f32.mrf.mxu1  ;;  %v5377_v44 = vmul.f32 %v10705_v0, %v10705_v0 }
 0x5c9   :  { %5457 = vadd.xlane.f32.xlu1 %v5379_v8  ;;  %5210 = vadd.xlane.f32.xlu0 %v10693_v47  ;;  %v10711_v45 = vadd.f32 %v10419_v23, %v5048_v35  ;;  %v10714_v50 = vsub.f32 %v10494_v4, %v5250_v1 }
 0x5cb   :  { %11462 = vst [vmem:[#allocation7_spill] sm:$0xff] %v10714_v50 }
 0x5cd   :  { %5204 = vadd.xlane.f32.xlu1 %v10702_v51  ;;  %5459 = vadd.xlane.f32.xlu0 %v5380_v7  ;;  %v5378_v7 = vmul.f32 %v10714_v50, %v10714_v50 }
 0x5ce   :  { %v5145_v10 = vpop.xlane.xlu1 %5144 }
 0x5cf   :  { %v5255_v40 = vmul.f32 0.0078125, %v5145_v10 }
 0x5d1   :  { %5453 = vadd.xlane.f32.xlu1 %v5377_v44  ;;  %5206 = vadd.xlane.f32.xlu0 %v10711_v45  ;;  %v10723_v54 = vsub.f32 %v10498_v36, %v5255_v40 }
 0x5d2   :  { %v7261_v46 = vpop.f32.mrf.mxu1  ;;  %v5147_v8 = vpop.xlane.xlu0 %5146 }
 0x5d3   :  { %v10720_v14 = vadd.f32 %v7261_v46, %v10419_v23  ;;  %11463 = vst [vmem:[#allocation8_spill] sm:$0xff] %v10723_v54  ;;  %v5256_v4 = vmul.f32 0.0078125, %v5147_v8  ;;  %v5141_v35 = vpop.xlane.xlu1 %5140  ;;  %v5383_v36 = vmul.f32 %v10723_v54, %v10723_v54 }
 0x5d4   :  { %v5061_v1 = vpop.f32.mrf.mxu1  ;;  %v5253_v40 = vmul.f32 0.0078125, %v5141_v35 }
 0x5d5   :  { %5216 = vadd.xlane.f32.xlu1 %v10720_v14  ;;  %5455 = vadd.xlane.f32.xlu0 %v5378_v7  ;;  %v10732_v0 = vsub.f32 %v10505_v53, %v5256_v4  ;;  %v10738_v8 = vadd.f32 %v10419_v23, %v5061_v1 }
 0x5d6   :  { %v7262_v10 = vpop.f32.mrf.mxu1  ;;  %v5143_v46 = vpop.xlane.xlu0 %5142  ;;  %v10741_v7 = vsub.f32 %v10502_v63, %v5253_v40 }
 0x5d7   :  { %v10729_v44 = vadd.f32 %v7262_v10, %v10419_v23  ;;  %11464 = vst [vmem:[#allocation9_spill] sm:$0xff] %v10732_v0  ;;  %v5384_v10 = vmul.f32 %v10732_v0, %v10732_v0  ;;  %v5254_v50 = vmul.f32 0.0078125, %v5143_v46 }
 0x5d8   :  { %11465 = vst [vmem:[#allocation10_spill] sm:$0xff] %v10741_v7  ;;  %v5064_v53 = vpop.f32.mrf.mxu1  ;;  %v5381_v1 = vmul.f32 %v10741_v7, %v10741_v7 }
 0x5d9   :  { %5465 = vadd.xlane.f32.xlu1 %v5383_v36  ;;  %5218 = vadd.xlane.f32.xlu0 %v10729_v44  ;;  %v10747_v35 = vadd.f32 %v10419_v23, %v5064_v53  ;;  %v10750_v36 = vsub.f32 %v10510_v30, %v5254_v50 }
 0x5db   :  { %11466 = vst [vmem:[#allocation11_spill] sm:$0xff] %v10750_v36  ;;  %v5382_v53 = vmul.f32 %v10750_v36, %v10750_v36 }
 0x5dd   :  { %5212 = vadd.xlane.f32.xlu1 %v10738_v8  ;;  %5467 = vadd.xlane.f32.xlu0 %v5384_v10 }
 0x5de   :  { %v5153_v4 = vpop.xlane.xlu1 %5152 }
 0x5df   :  { %v5259_v63 = vmul.f32 0.0078125, %v5153_v4 }
 0x5e1   :  { %5461 = vadd.xlane.f32.xlu1 %v5381_v1  ;;  %5214 = vadd.xlane.f32.xlu0 %v10747_v35  ;;  %v10759_v10 = vsub.f32 %v10514_v9, %v5259_v63 }
 0x5e2   :  { %v7265_v40 = vpop.f32.mrf.mxu1  ;;  %v5155_v46 = vpop.xlane.xlu0 %5154 }
 0x5e3   :  { %v10756_v0 = vadd.f32 %v7265_v40, %v10419_v23  ;;  %11467 = vst [vmem:[#allocation12_spill] sm:$0xff] %v10759_v10  ;;  %v5260_v30 = vmul.f32 0.0078125, %v5155_v46  ;;  %v5149_v54 = vpop.xlane.xlu1 %5148  ;;  %v5387_v9 = vmul.f32 %v10759_v10, %v10759_v10 }
 0x5e4   :  { %v5077_v50 = vpop.f32.mrf.mxu1  ;;  %v5257_v63 = vmul.f32 0.0078125, %v5149_v54 }
 0x5e5   :  { %5224 = vadd.xlane.f32.xlu1 %v10756_v0  ;;  %5463 = vadd.xlane.f32.xlu0 %v5382_v53  ;;  %v10768_v7 = vsub.f32 %v10521_v16, %v5260_v30  ;;  %v10774_v46 = vadd.f32 %v10419_v23, %v5077_v50 }
 0x5e6   :  { %v7266_v4 = vpop.f32.mrf.mxu1  ;;  %v5151_v40 = vpop.xlane.xlu0 %5150  ;;  %v10777_v53 = vsub.f32 %v10518_v37, %v5257_v63 }
 0x5e7   :  { %v10765_v1 = vadd.f32 %v7266_v4, %v10419_v23  ;;  %11468 = vst [vmem:[#allocation13_spill] sm:$0xff] %v10768_v7  ;;  %v5388_v4 = vmul.f32 %v10768_v7, %v10768_v7  ;;  %v5258_v36 = vmul.f32 0.0078125, %v5151_v40 }
 0x5e8   :  { %11469 = vst [vmem:[#allocation14_spill] sm:$0xff] %v10777_v53  ;;  %v5080_v16 = vpop.f32.mrf.mxu1  ;;  %v5385_v50 = vmul.f32 %v10777_v53, %v10777_v53 }
 0x5e9   :  { %5473 = vadd.xlane.f32.xlu1 %v5387_v9  ;;  %5226 = vadd.xlane.f32.xlu0 %v10765_v1  ;;  %v10783_v54 = vadd.f32 %v10419_v23, %v5080_v16  ;;  %v10786_v9 = vsub.f32 %v10526_v12, %v5258_v36 }
 0x5eb   :  { %11470 = vst [vmem:[#allocation15_spill] sm:$0xff] %v10786_v9  ;;  %v5386_v16 = vmul.f32 %v10786_v9, %v10786_v9 }
 0x5ed   :  { %5220 = vadd.xlane.f32.xlu1 %v10774_v46  ;;  %5475 = vadd.xlane.f32.xlu0 %v5388_v4 }
 0x5ee   :  { %v5161_v30 = vpop.xlane.xlu1 %5160 }
 0x5ef   :  { %v5263_v37 = vmul.f32 0.0078125, %v5161_v30 }
 0x5f1   :  { %5469 = vadd.xlane.f32.xlu1 %v5385_v50  ;;  %5222 = vadd.xlane.f32.xlu0 %v10783_v54  ;;  %v10795_v4 = vsub.f32 %v10530_v11, %v5263_v37 }
 0x5f2   :  { %v7269_v63 = vpop.f32.mrf.mxu1  ;;  %v5163_v40 = vpop.xlane.xlu0 %5162 }
 0x5f3   :  { %v10792_v7 = vadd.f32 %v7269_v63, %v10419_v23  ;;  %11471 = vst [vmem:[#allocation16_spill] sm:$0xff] %v10795_v4  ;;  %v5264_v12 = vmul.f32 0.0078125, %v5163_v40  ;;  %v5157_v10 = vpop.xlane.xlu1 %5156  ;;  %v5391_v11 = vmul.f32 %v10795_v4, %v10795_v4 }
 0x5f4   :  { %v5093_v36 = vpop.f32.mrf.mxu1  ;;  %v5261_v37 = vmul.f32 0.0078125, %v5157_v10 }
 0x5f5   :  { %5232 = vadd.xlane.f32.xlu1 %v10792_v7  ;;  %5471 = vadd.xlane.f32.xlu0 %v5386_v16  ;;  %v10804_v53 = vsub.f32 %v10537_v33, %v5264_v12  ;;  %v10810_v40 = vadd.f32 %v10419_v23, %v5093_v36 }
 0x5f6   :  { %v7270_v30 = vpop.f32.mrf.mxu1  ;;  %v5159_v63 = vpop.xlane.xlu0 %5158  ;;  %v10813_v16 = vsub.f32 %v10534_v38, %v5261_v37 }
 0x5f7   :  { %v10801_v50 = vadd.f32 %v7270_v30, %v10419_v23  ;;  %11472 = vst [vmem:[#allocation17_spill] sm:$0xff] %v10804_v53  ;;  %v5392_v30 = vmul.f32 %v10804_v53, %v10804_v53  ;;  %v5262_v9 = vmul.f32 0.0078125, %v5159_v63 }
 0x5f8   :  { %v5096_v33 = vpop.f32.mrf.mxu1  ;;  %v5389_v38 = vmul.f32 %v10813_v16, %v10813_v16 }
 0x5f9   :  { %5481 = vadd.xlane.f32.xlu1 %v5391_v11  ;;  %5234 = vadd.xlane.f32.xlu0 %v10801_v50  ;;  %v10819_v10 = vadd.f32 %v10419_v23, %v5096_v33  ;;  %v10822_v4 = vsub.f32 %v10542_v34, %v5262_v9 }
 0x5fb   :  { %v5390_v34 = vmul.f32 %v10822_v4, %v10822_v4 }
 0x5fd   :  { %5228 = vadd.xlane.f32.xlu1 %v10810_v40  ;;  %5483 = vadd.xlane.f32.xlu0 %v5392_v30 }
 0x5fe   :  { %v5169_v12 = vpop.xlane.xlu1 %5168 }
 0x5ff   :  { %v5267_v11 = vmul.f32 0.0078125, %v5169_v12 }
 0x601   :  { %v10827_v36 = vsub.f32 %v10546_v55, %v5267_v11  ;;  %5477 = vadd.xlane.f32.xlu1 %v5389_v38  ;;  %5230 = vadd.xlane.f32.xlu0 %v10819_v10 }
 0x602   :  { %v5165_v37 = vpop.xlane.xlu1 %5164  ;;  %v5171_v63 = vpop.xlane.xlu0 %5170 }
 0x603   :  { %v5265_v30 = vmul.f32 0.0078125, %v5165_v37  ;;  %v5268_v53 = vmul.f32 0.0078125, %v5171_v63  ;;  %v5395_v23 = vmul.f32 %v10827_v36, %v10827_v36 }
 0x605   :  { %v10835_v9 = vsub.f32 %v10550_v15, %v5265_v30  ;;  %v10838_v33 = vsub.f32 %v10553_v49, %v5268_v53  ;;  %5489 = vadd.xlane.f32.xlu1 %v5395_v23  ;;  %5479 = vadd.xlane.f32.xlu0 %v5390_v34 }
 0x606   :  { %v5167_v55 = vpop.xlane.xlu0 %5166 }
 0x607   :  { %11473 = vst [vmem:[#allocation18_spill] sm:$0xff] %v10838_v33  ;;  %v5266_v12 = vmul.f32 0.0078125, %v5167_v55  ;;  %v5393_v11 = vmul.f32 %v10835_v9, %v10835_v9  ;;  %v5396_v38 = vmul.f32 %v10838_v33, %v10838_v33 }
 0x609   :  { %v10845_v37 = vsub.f32 %v10558_v3, %v5266_v12  ;;  %5485 = vadd.xlane.f32.xlu1 %v5393_v11  ;;  %5491 = vadd.xlane.f32.xlu0 %v5396_v38 }
 0x60b   :  { %v5394_v15 = vmul.f32 %v10845_v37, %v10845_v37 }
 0x60d   :  { %5487 = vadd.xlane.f32.xlu0 %v5394_v15 }
 0x60e   :  { %v5177_v49 = vpop.xlane.xlu1 %5176 }
 0x60f   :  { %v5271_v53 = vmul.f32 0.0078125, %v5177_v49 }
 0x611   :  { %v10850_v63 = vsub.f32 %v10562_v26, %v5271_v53 }
 0x612   :  { %v5173_v30 = vpop.xlane.xlu1 %5172  ;;  %v5179_v23 = vpop.xlane.xlu0 %5178 }
 0x613   :  { %v5269_v34 = vmul.f32 0.0078125, %v5173_v30  ;;  %v5272_v55 = vmul.f32 0.0078125, %v5179_v23  ;;  %v5399_v33 = vmul.f32 %v10850_v63, %v10850_v63 }
 0x615   :  { %v10855_v3 = vsub.f32 %v10566_v59, %v5269_v34  ;;  %v10858_v12 = vsub.f32 %v10569_v27, %v5272_v55  ;;  %5497 = vadd.xlane.f32.xlu1 %v5399_v33 }
 0x616   :  { %v5175_v11 = vpop.xlane.xlu0 %5174 }
 0x617   :  { %v5270_v38 = vmul.f32 0.0078125, %v5175_v11  ;;  %v5397_v26 = vmul.f32 %v10855_v3, %v10855_v3  ;;  %v5400_v15 = vmul.f32 %v10858_v12, %v10858_v12 }
 0x619   :  { %v10865_v49 = vsub.f32 %v10574_v42, %v5270_v38  ;;  %5493 = vadd.xlane.f32.xlu1 %v5397_v26  ;;  %5499 = vadd.xlane.f32.xlu0 %v5400_v15 }
 0x61b   :  { %v5398_v59 = vmul.f32 %v10865_v49, %v10865_v49 }
 0x61d   :  { %5495 = vadd.xlane.f32.xlu0 %v5398_v59 }
 0x61e   :  { %v5185_v27 = vpop.xlane.xlu1 %5184 }
 0x61f   :  { %v5275_v53 = vmul.f32 0.0078125, %v5185_v27 }
 0x621   :  { %v10870_v33 = vsub.f32 %v10581_v21, %v5275_v53 }
 0x622   :  { %v5434_v30 = vpop.xlane.xlu1 %5433  ;;  %v5187_v23 = vpop.xlane.xlu0 %5186 }
 0x623   :  { %11474 = vst [vmem:[#allocation19_spill] sm:$0xff] %v10870_v33  ;;  %v5559_v34 = vmul.f32 0.0078125, %v5434_v30  ;;  %v5276_v55 = vmul.f32 0.0078125, %v5187_v23  ;;  %v5403_v11 = vmul.f32 %v10870_v33, %v10870_v33 }
 0x625   :  { %v5623_v42 = vadd.f32 1e-05, %v5559_v34  ;;  %v10875_v38 = vsub.f32 %v10585_v6, %v5276_v55  ;;  %5505 = vadd.xlane.f32.xlu1 %v5403_v11 }
 0x626   :  { %v5181_v26 = vpop.xlane.xlu1 %5180  ;;  %v5436_v15 = vpop.xlane.xlu0 %5435 }
 0x627   :  { %7398 = vrsqrt.f32 %v5623_v42  ;;  %v5273_v59 = vmul.f32 0.0078125, %v5181_v26  ;;  %v5560_v27 = vmul.f32 0.0078125, %v5436_v15  ;;  %v5404_v21 = vmul.f32 %v10875_v38, %v10875_v38 }
 0x629   :  { %v10880_v53 = vsub.f32 %v10597_v2, %v5273_v59  ;;  %v5624_v30 = vadd.f32 1e-05, %v5560_v27  ;;  %5507 = vadd.xlane.f32.xlu0 %v5404_v21 }
 0x62a   :  { %v5430_v23 = vpop.xlane.xlu1 %5429  ;;  %v5183_v33 = vpop.xlane.xlu0 %5182 }
 0x62b   :  { %7400 = vrsqrt.f32 %v5624_v30  ;;  %v5557_v34 = vmul.f32 0.0078125, %v5430_v23  ;;  %v5274_v6 = vmul.f32 0.0078125, %v5183_v33  ;;  %v5401_v55 = vmul.f32 %v10880_v53, %v10880_v53 }
 0x62d   :  { %v5621_v11 = vadd.f32 1e-05, %v5557_v34  ;;  %v10885_v42 = vsub.f32 %v10603_v28, %v5274_v6  ;;  %5501 = vadd.xlane.f32.xlu1 %v5401_v55 }
 0x62e   :  { %v5193_v26 = vpop.xlane.xlu1 %5192  ;;  %v5432_v15 = vpop.xlane.xlu0 %5431 }
 0x62f   :  { %11475 = vst [vmem:[#allocation20_spill] sm:$0xff] %v10885_v42  ;;  %7402 = vrsqrt.f32 %v5621_v11  ;;  %v5279_v2 = vmul.f32 0.0078125, %v5193_v26  ;;  %v5558_v59 = vmul.f32 0.0078125, %v5432_v15  ;;  %v5402_v27 = vmul.f32 %v10885_v42, %v10885_v42  ;;  %v10897_v11 = vld [vmem:[%s11231_s7] ss:$0 sm:$0xff] }
 0x631   :  { %v10890_v21 = vsub.f32 %v10612_v19, %v5279_v2  ;;  %v5622_v33 = vadd.f32 1e-05, %v5558_v59  ;;  %5503 = vadd.xlane.f32.xlu0 %v5402_v27  ;;  %v10906_v2 = vld [vmem:[%s11232_s8] ss:$0 sm:$0xff] }
 0x632   :  { %v5442_v30 = vpop.xlane.xlu1 %5441  ;;  %v5195_v23 = vpop.xlane.xlu0 %5194 }
 0x633   :  { %11476 = vst [vmem:[#allocation21_spill] sm:$0xff] %v10890_v21  ;;  %7404 = vrsqrt.f32 %v5622_v33  ;;  %v5563_v34 = vmul.f32 0.0078125, %v5442_v30  ;;  %v5280_v28 = vmul.f32 0.0078125, %v5195_v23  ;;  %v5407_v6 = vmul.f32 %v10890_v21, %v10890_v21 }
 0x634   :  { %v7399_v55 = vpop.eup %7398 }
 0x635   :  { %v5751_v26 = vmul.f32 %v7399_v55, %v10578_v48  ;;  %v5627_v19 = vadd.f32 1e-05, %v5563_v34  ;;  %v10901_v15 = vsub.f32 %v10621_v22, %v5280_v28  ;;  %5513 = vadd.xlane.f32.xlu1 %v5407_v6 }
 0x636   :  { %v5189_v59 = vpop.xlane.xlu1 %5188  ;;  %v5444_v27 = vpop.xlane.xlu0 %5443 }
 0x637   :  { %11477 = vst [vmem:[#allocation22_spill] sm:$0xff] %v10901_v15  ;;  %v5822_v33 = vmul.f32 %v10897_v11, %v5751_v26  ;;  %7406 = vrsqrt.f32 %v5627_v19  ;;  %v5277_v30 = vmul.f32 0.0078125, %v5189_v59  ;;  %v5564_v23 = vmul.f32 0.0078125, %v5444_v27 }
 0x638   :  { %v7401_v21 = vpop.eup %7400  ;;  %v5408_v48 = vmul.f32 %v10901_v15, %v10901_v15 }
 0x639   :  { %v5893_v22 = vadd.f32 %v10906_v2, %v5822_v33  ;;  %v5752_v34 = vmul.f32 %v7401_v21, %v10590_v39  ;;  %v10914_v28 = vsub.f32 %v10630_v13, %v5277_v30  ;;  %v5628_v6 = vadd.f32 1e-05, %v5564_v23 }
 0x63a   :  { %5515 = vadd.xlane.f32.xlu0 %v5408_v48  ;;  %v5438_v55 = vpop.xlane.xlu1 %5437  ;;  %v5191_v42 = vpop.xlane.xlu0 %5190 }
 0x63b   :  { %5957 = vst [vmem:[#allocation3 + $0x10] sm:$0xff] %v5893_v22  ;;  %v5823_v26 = vmul.f32 %v10897_v11, %v5752_v34  ;;  %7408 = vrsqrt.f32 %v5628_v6  ;;  %v5561_v19 = vmul.f32 0.0078125, %v5438_v55  ;;  %v5278_v59 = vmul.f32 0.0078125, %v5191_v42 }
 0x63c   :  { %v7403_v27 = vpop.eup %7402  ;;  %v5405_v15 = vmul.f32 %v10914_v28, %v10914_v28 }
 0x63d   :  { %v5894_v33 = vadd.f32 %v10906_v2, %v5823_v26  ;;  %v5749_v39 = vmul.f32 %v7403_v27, %v10594_v61  ;;  %v5625_v13 = vadd.f32 1e-05, %v5561_v19  ;;  %v10922_v21 = vsub.f32 %v10639_v62, %v5278_v59 }
 0x63e   :  { %5509 = vadd.xlane.f32.xlu1 %v5405_v15  ;;  %v5201_v30 = vpop.xlane.xlu1 %5200  ;;  %v5440_v23 = vpop.xlane.xlu0 %5439 }
 0x63f   :  { %5958 = vst [vmem:[#allocation3 + $0x18] sm:$0xff] %v5894_v33  ;;  %v5820_v48 = vmul.f32 %v10897_v11, %v5749_v39  ;;  %7410 = vrsqrt.f32 %v5625_v13  ;;  %v5283_v42 = vmul.f32 0.0078125, %v5201_v30  ;;  %v5562_v22 = vmul.f32 0.0078125, %v5440_v23 }
 0x640   :  { %v7405_v34 = vpop.eup %7404  ;;  %v5406_v6 = vmul.f32 %v10922_v21, %v10922_v21 }
 0x641   :  { %v5891_v55 = vadd.f32 %v10906_v2, %v5820_v48  ;;  %v5750_v61 = vmul.f32 %v7405_v34, %v10606_v56  ;;  %v10930_v62 = vsub.f32 %v10648_v5, %v5283_v42  ;;  %v5626_v15 = vadd.f32 1e-05, %v5562_v22 }
 0x642   :  { %5511 = vadd.xlane.f32.xlu0 %v5406_v6  ;;  %v5450_v26 = vpop.xlane.xlu1 %5449  ;;  %v5203_v19 = vpop.xlane.xlu0 %5202 }
 0x643   :  { %5955 = vst [vmem:[#allocation3] sm:$0xff] %v5891_v55  ;;  %v5821_v59 = vmul.f32 %v10897_v11, %v5750_v61  ;;  %7412 = vrsqrt.f32 %v5626_v15  ;;  %v5567_v27 = vmul.f32 0.0078125, %v5450_v26  ;;  %v5284_v33 = vmul.f32 0.0078125, %v5203_v19 }
 0x644   :  { %v7407_v39 = vpop.eup %7406  ;;  %v5411_v13 = vmul.f32 %v10930_v62, %v10930_v62 }
 0x645   :  { %v5892_v30 = vadd.f32 %v10906_v2, %v5821_v59  ;;  %v5755_v56 = vmul.f32 %v7407_v39, %v10615_v29  ;;  %v5631_v5 = vadd.f32 1e-05, %v5567_v27  ;;  %v10938_v23 = vsub.f32 %v10657_v60, %v5284_v33 }
 0x646   :  { %5521 = vadd.xlane.f32.xlu1 %v5411_v13  ;;  %v5197_v48 = vpop.xlane.xlu1 %5196  ;;  %v5452_v42 = vpop.xlane.xlu0 %5451 }
 0x647   :  { %5956 = vst [vmem:[#allocation3 + $0x8] sm:$0xff] %v5892_v30  ;;  %v5826_v22 = vmul.f32 %v10897_v11, %v5755_v56  ;;  %7414 = vrsqrt.f32 %v5631_v5  ;;  %v5281_v34 = vmul.f32 0.0078125, %v5197_v48  ;;  %v5568_v6 = vmul.f32 0.0078125, %v5452_v42 }
 0x648   :  { %v7409_v55 = vpop.eup %7408  ;;  %v5412_v61 = vmul.f32 %v10938_v23, %v10938_v23 }
 0x649   :  { %v5897_v15 = vadd.f32 %v10906_v2, %v5826_v22  ;;  %v5756_v29 = vmul.f32 %v7409_v55, %v10624_v18  ;;  %v10946_v60 = vsub.f32 %v10666_v58, %v5281_v34  ;;  %v5632_v26 = vadd.f32 1e-05, %v5568_v6 }
 0x64a   :  { %5523 = vadd.xlane.f32.xlu0 %v5412_v61  ;;  %v5446_v19 = vpop.xlane.xlu1 %5445  ;;  %v5199_v59 = vpop.xlane.xlu0 %5198 }
 0x64b   :  { %5961 = vst [vmem:[#allocation3 + $0x30] sm:$0xff] %v5897_v15  ;;  %v5827_v27 = vmul.f32 %v10897_v11, %v5756_v29  ;;  %7416 = vrsqrt.f32 %v5632_v26  ;;  %v5565_v33 = vmul.f32 0.0078125, %v5446_v19  ;;  %v5282_v39 = vmul.f32 0.0078125, %v5199_v59 }
 0x64c   :  { %v7411_v13 = vpop.eup %7410  ;;  %v5409_v30 = vmul.f32 %v10946_v60, %v10946_v60 }
 0x64d   :  { %v5898_v56 = vadd.f32 %v10906_v2, %v5827_v27  ;;  %v5753_v18 = vmul.f32 %v7411_v13, %v10633_v32  ;;  %v5629_v58 = vadd.f32 1e-05, %v5565_v33  ;;  %v10954_v5 = vsub.f32 %v10675_v52, %v5282_v39 }
 0x64e   :  { %5517 = vadd.xlane.f32.xlu1 %v5409_v30  ;;  %v5209_v48 = vpop.xlane.xlu1 %5208  ;;  %v5448_v42 = vpop.xlane.xlu0 %5447 }
 0x64f   :  { %5962 = vst [vmem:[#allocation3 + $0x38] sm:$0xff] %v5898_v56  ;;  %v5824_v22 = vmul.f32 %v10897_v11, %v5753_v18  ;;  %7418 = vrsqrt.f32 %v5629_v58  ;;  %v5287_v34 = vmul.f32 0.0078125, %v5209_v48  ;;  %v5566_v6 = vmul.f32 0.0078125, %v5448_v42 }
 0x650   :  { %v7413_v55 = vpop.eup %7412  ;;  %v5410_v61 = vmul.f32 %v10954_v5, %v10954_v5 }
 0x651   :  { %v5895_v15 = vadd.f32 %v10906_v2, %v5824_v22  ;;  %v5754_v32 = vmul.f32 %v7413_v55, %v10642_v24  ;;  %v10962_v52 = vsub.f32 %v10684_v41, %v5287_v34  ;;  %v5630_v29 = vadd.f32 1e-05, %v5566_v6 }
 0x652   :  { %5519 = vadd.xlane.f32.xlu0 %v5410_v61  ;;  %v5458_v26 = vpop.xlane.xlu1 %5457  ;;  %v5211_v19 = vpop.xlane.xlu0 %5210 }
 0x653   :  { %5959 = vst [vmem:[#allocation3 + $0x20] sm:$0xff] %v5895_v15  ;;  %v5825_v59 = vmul.f32 %v10897_v11, %v5754_v32  ;;  %7420 = vrsqrt.f32 %v5630_v29  ;;  %v5571_v27 = vmul.f32 0.0078125, %v5458_v26  ;;  %v5288_v33 = vmul.f32 0.0078125, %v5211_v19 }
 0x654   :  { %v7415_v39 = vpop.eup %7414  ;;  %v5415_v13 = vmul.f32 %v10962_v52, %v10962_v52 }
 0x655   :  { %v5896_v30 = vadd.f32 %v10906_v2, %v5825_v59  ;;  %v5759_v24 = vmul.f32 %v7415_v39, %v10651_v43  ;;  %v5635_v41 = vadd.f32 1e-05, %v5571_v27  ;;  %v10970_v56 = vsub.f32 %v10693_v47, %v5288_v33 }
 0x656   :  { %5529 = vadd.xlane.f32.xlu1 %v5415_v13  ;;  %v5205_v18 = vpop.xlane.xlu1 %5204  ;;  %v5460_v58 = vpop.xlane.xlu0 %5459 }
 0x657   :  { %5960 = vst [vmem:[#allocation3 + $0x28] sm:$0xff] %v5896_v30  ;;  %v5830_v48 = vmul.f32 %v10897_v11, %v5759_v24  ;;  %7422 = vrsqrt.f32 %v5635_v41  ;;  %v5285_v42 = vmul.f32 0.0078125, %v5205_v18  ;;  %v5572_v22 = vmul.f32 0.0078125, %v5460_v58 }
 0x658   :  { %v7417_v34 = vpop.eup %7416  ;;  %v5416_v6 = vmul.f32 %v10970_v56, %v10970_v56 }
 0x659   :  { %v5901_v55 = vadd.f32 %v10906_v2, %v5830_v48  ;;  %v5760_v43 = vmul.f32 %v7417_v34, %v10660_v25  ;;  %v10978_v47 = vsub.f32 %v10702_v51, %v5285_v42  ;;  %v5636_v61 = vadd.f32 1e-05, %v5572_v22 }
 0x65a   :  { %5531 = vadd.xlane.f32.xlu0 %v5416_v6  ;;  %v5454_v15 = vpop.xlane.xlu1 %5453  ;;  %v5207_v32 = vpop.xlane.xlu0 %5206 }
 0x65b   :  { %5965 = vst [vmem:[#allocation3 + $0x50] sm:$0xff] %v5901_v55  ;;  %v5831_v29 = vmul.f32 %v10897_v11, %v5760_v43  ;;  %7424 = vrsqrt.f32 %v5636_v61  ;;  %v5569_v26 = vmul.f32 0.0078125, %v5454_v15  ;;  %v5286_v19 = vmul.f32 0.0078125, %v5207_v32 }
 0x65c   :  { %v7419_v59 = vpop.eup %7418  ;;  %v5413_v27 = vmul.f32 %v10978_v47, %v10978_v47 }
 0x65d   :  { %v5902_v33 = vadd.f32 %v10906_v2, %v5831_v29  ;;  %v5757_v25 = vmul.f32 %v7419_v59, %v10669_v31  ;;  %v5633_v51 = vadd.f32 1e-05, %v5569_v26  ;;  %v10986_v39 = vsub.f32 %v10711_v45, %v5286_v19 }
 0x65e   :  { %5525 = vadd.xlane.f32.xlu1 %v5413_v27  ;;  %v5217_v13 = vpop.xlane.xlu1 %5216  ;;  %v5456_v30 = vpop.xlane.xlu0 %5455 }
 0x65f   :  { %5966 = vst [vmem:[#allocation3 + $0x58] sm:$0xff] %v5902_v33  ;;  %v5828_v24 = vmul.f32 %v10897_v11, %v5757_v25  ;;  %7426 = vrsqrt.f32 %v5633_v51  ;;  %v5291_v41 = vmul.f32 0.0078125, %v5217_v13  ;;  %v5570_v18 = vmul.f32 0.0078125, %v5456_v30 }
 0x660   :  { %v7421_v58 = vpop.eup %7420  ;;  %v5414_v48 = vmul.f32 %v10986_v39, %v10986_v39 }
 0x661   :  { %v5899_v42 = vadd.f32 %v10906_v2, %v5828_v24  ;;  %v5758_v31 = vmul.f32 %v7421_v58, %v10678_v17  ;;  %v10994_v45 = vsub.f32 %v10720_v14, %v5291_v41  ;;  %v5634_v22 = vadd.f32 1e-05, %v5570_v18 }
 0x662   :  { %5527 = vadd.xlane.f32.xlu0 %v5414_v48  ;;  %v5466_v34 = vpop.xlane.xlu1 %5465  ;;  %v5219_v6 = vpop.xlane.xlu0 %5218 }
 0x663   :  { %5963 = vst [vmem:[#allocation3 + $0x40] sm:$0xff] %v5899_v42  ;;  %v5829_v55 = vmul.f32 %v10897_v11, %v5758_v31  ;;  %7428 = vrsqrt.f32 %v5634_v22  ;;  %v5575_v43 = vmul.f32 0.0078125, %v5466_v34  ;;  %v5292_v61 = vmul.f32 0.0078125, %v5219_v6 }
 0x664   :  { %v7423_v15 = vpop.eup %7422  ;;  %v5419_v32 = vmul.f32 %v10994_v45, %v10994_v45 }
 0x665   :  { %v5900_v29 = vadd.f32 %v10906_v2, %v5829_v55  ;;  %v5763_v17 = vmul.f32 %v7423_v15, %v10687_v20  ;;  %v5639_v14 = vadd.f32 1e-05, %v5575_v43  ;;  %v11002_v26 = vsub.f32 %v10729_v44, %v5292_v61 }
 0x666   :  { %5537 = vadd.xlane.f32.xlu1 %v5419_v32  ;;  %v5213_v19 = vpop.xlane.xlu1 %5212  ;;  %v5468_v59 = vpop.xlane.xlu0 %5467 }
 0x667   :  { %5964 = vst [vmem:[#allocation3 + $0x48] sm:$0xff] %v5900_v29  ;;  %v5834_v27 = vmul.f32 %v10897_v11, %v5763_v17  ;;  %7430 = vrsqrt.f32 %v5639_v14  ;;  %v5289_v33 = vmul.f32 0.0078125, %v5213_v19  ;;  %v5576_v25 = vmul.f32 0.0078125, %v5468_v59  ;;  %v11479_v59 = vld [vmem:[#allocation7_spill] sm:$0xff] }
 0x668   :  { %v7425_v51 = vpop.eup %7424  ;;  %v5420_v13 = vmul.f32 %v11002_v26, %v11002_v26 }
 0x669   :  { %v5905_v30 = vadd.f32 %v10906_v2, %v5834_v27  ;;  %v5764_v20 = vmul.f32 %v7425_v51, %v10696_v57  ;;  %v11010_v44 = vsub.f32 %v10738_v8, %v5289_v33  ;;  %v5640_v24 = vadd.f32 1e-05, %v5576_v25  ;;  %v11478_v57 = vld [vmem:[#allocation6_spill] sm:$0xff] }
 0x66a   :  { %5539 = vadd.xlane.f32.xlu0 %v5420_v13  ;;  %v5462_v41 = vpop.xlane.xlu1 %5461  ;;  %v5215_v18 = vpop.xlane.xlu0 %5214 }
 0x66b   :  { %5969 = vst [vmem:[#allocation3 + $0x70] sm:$0xff] %v5905_v30  ;;  %v5835_v58 = vmul.f32 %v10897_v11, %v5764_v20  ;;  %7432 = vrsqrt.f32 %v5640_v24  ;;  %v5573_v48 = vmul.f32 0.0078125, %v5462_v41  ;;  %v5290_v42 = vmul.f32 0.0078125, %v5215_v18 }
 0x66c   :  { %v7427_v31 = vpop.eup %7426  ;;  %v5417_v22 = vmul.f32 %v11010_v44, %v11010_v44 }
 0x66d   :  { %v5906_v34 = vadd.f32 %v10906_v2, %v5835_v58  ;;  %v5761_v6 = vmul.f32 %v7427_v31, %v11478_v57  ;;  %v5637_v8 = vadd.f32 1e-05, %v5573_v48  ;;  %v11018_v55 = vsub.f32 %v10747_v35, %v5290_v42  ;;  %v11480_v58 = vld [vmem:[#allocation8_spill] sm:$0xff] }
 0x66e   :  { %5533 = vadd.xlane.f32.xlu1 %v5417_v22  ;;  %v5225_v43 = vpop.xlane.xlu1 %5224  ;;  %v5464_v61 = vpop.xlane.xlu0 %5463 }
 0x66f   :  { %5970 = vst [vmem:[#allocation3 + $0x78] sm:$0xff] %v5906_v34  ;;  %v5832_v15 = vmul.f32 %v10897_v11, %v5761_v6  ;;  %7434 = vrsqrt.f32 %v5637_v8  ;;  %v5295_v32 = vmul.f32 0.0078125, %v5225_v43  ;;  %v5574_v29 = vmul.f32 0.0078125, %v5464_v61 }
 0x670   :  { %v7429_v17 = vpop.eup %7428  ;;  %v5418_v14 = vmul.f32 %v11018_v55, %v11018_v55 }
 0x671   :  { %v5903_v19 = vadd.f32 %v10906_v2, %v5832_v15  ;;  %v5762_v27 = vmul.f32 %v7429_v17, %v11479_v59  ;;  %v11026_v35 = vsub.f32 %v10756_v0, %v5295_v32  ;;  %v5638_v33 = vadd.f32 1e-05, %v5574_v29  ;;  %v11481_v15 = vld [vmem:[#allocation9_spill] sm:$0xff] }
 0x672   :  { %5535 = vadd.xlane.f32.xlu0 %v5418_v14  ;;  %v5474_v25 = vpop.xlane.xlu1 %5473  ;;  %v5227_v51 = vpop.xlane.xlu0 %5226 }
 0x673   :  { %5967 = vst [vmem:[#allocation3 + $0x60] sm:$0xff] %v5903_v19  ;;  %v5833_v13 = vmul.f32 %v10897_v11, %v5762_v27  ;;  %7436 = vrsqrt.f32 %v5638_v33  ;;  %v5579_v30 = vmul.f32 0.0078125, %v5474_v25  ;;  %v5296_v20 = vmul.f32 0.0078125, %v5227_v51 }
 0x674   :  { %v7431_v24 = vpop.eup %7430  ;;  %v5423_v41 = vmul.f32 %v11026_v35, %v11026_v35 }
 0x675   :  { %v5904_v18 = vadd.f32 %v10906_v2, %v5833_v13  ;;  %v5767_v48 = vmul.f32 %v7431_v24, %v11480_v58  ;;  %v5643_v0 = vadd.f32 1e-05, %v5579_v30  ;;  %v11034_v42 = vsub.f32 %v10765_v1, %v5296_v20  ;;  %v11482_v13 = vld [vmem:[#allocation10_spill] sm:$0xff] }
 0x676   :  { %5545 = vadd.xlane.f32.xlu1 %v5423_v41  ;;  %v5221_v31 = vpop.xlane.xlu1 %5220  ;;  %v5476_v22 = vpop.xlane.xlu0 %5475 }
 0x677   :  { %5968 = vst [vmem:[#allocation3 + $0x68] sm:$0xff] %v5904_v18  ;;  %v5838_v34 = vmul.f32 %v10897_v11, %v5767_v48  ;;  %7438 = vrsqrt.f32 %v5643_v0  ;;  %v5293_v57 = vmul.f32 0.0078125, %v5221_v31  ;;  %v5580_v6 = vmul.f32 0.0078125, %v5476_v22  ;;  %v11483_v22 = vld [vmem:[#allocation11_spill] sm:$0xff] }
 0x678   :  { %v7433_v8 = vpop.eup %7432  ;;  %v5424_v43 = vmul.f32 %v11034_v42, %v11034_v42 }
 0x679   :  { %v5909_v61 = vadd.f32 %v10906_v2, %v5838_v34  ;;  %v5768_v32 = vmul.f32 %v7433_v8, %v11481_v15  ;;  %v11042_v1 = vsub.f32 %v10774_v46, %v5293_v57  ;;  %v5644_v29 = vadd.f32 1e-05, %v5580_v6 }
 0x67a   :  { %5547 = vadd.xlane.f32.xlu0 %v5424_v43  ;;  %v5470_v17 = vpop.xlane.xlu1 %5469  ;;  %v5223_v14 = vpop.xlane.xlu0 %5222 }
 0x67b   :  { %5973 = vst [vmem:[#allocation3 + $0x90] sm:$0xff] %v5909_v61  ;;  %v5839_v19 = vmul.f32 %v10897_v11, %v5768_v32  ;;  %7440 = vrsqrt.f32 %v5644_v29  ;;  %v5577_v59 = vmul.f32 0.0078125, %v5470_v17  ;;  %v5294_v27 = vmul.f32 0.0078125, %v5223_v14  ;;  %v11484_v32 = vld [vmem:[#allocation12_spill] sm:$0xff] }
 0x67c   :  { %v7435_v33 = vpop.eup %7434  ;;  %v5421_v25 = vmul.f32 %v11042_v1, %v11042_v1 }
 0x67d   :  { %v5910_v51 = vadd.f32 %v10906_v2, %v5839_v19  ;;  %v5765_v30 = vmul.f32 %v7435_v33, %v11482_v13  ;;  %v5641_v46 = vadd.f32 1e-05, %v5577_v59  ;;  %v11050_v20 = vsub.f32 %v10783_v54, %v5294_v27 }
 0x67e   :  { %5541 = vadd.xlane.f32.xlu1 %v5421_v25  ;;  %v5233_v24 = vpop.xlane.xlu1 %5232  ;;  %v5472_v41 = vpop.xlane.xlu0 %5471 }
 0x67f   :  { %5974 = vst [vmem:[#allocation3 + $0x98] sm:$0xff] %v5910_v51  ;;  %v5836_v18 = vmul.f32 %v10897_v11, %v5765_v30  ;;  %7442 = vrsqrt.f32 %v5641_v46  ;;  %v5578_v58 = vmul.f32 0.0078125, %v5472_v41  ;;  %v5422_v0 = vmul.f32 %v11050_v20, %v11050_v20  ;;  %v11485_v30 = vld [vmem:[#allocation13_spill] sm:$0xff] }
 0x680   :  { %v7437_v48 = vpop.eup %7436  ;;  %v5299_v51 = vmul.f32 0.0078125, %v5233_v24 }
 0x681   :  { %v5907_v31 = vadd.f32 %v10906_v2, %v5836_v18  ;;  %v5766_v34 = vmul.f32 %v7437_v48, %v11483_v22  ;;  %v5642_v57 = vadd.f32 1e-05, %v5578_v58  ;;  %5543 = vadd.xlane.f32.xlu0 %v5422_v0 }
 0x682   :  { %v5482_v54 = vpop.xlane.xlu1 %5481  ;;  %v5235_v6 = vpop.xlane.xlu0 %5234 }
 0x683   :  { %5971 = vst [vmem:[#allocation3 + $0x80] sm:$0xff] %v5907_v31  ;;  %v5837_v8 = vmul.f32 %v10897_v11, %v5766_v34  ;;  %7444 = vrsqrt.f32 %v5642_v57  ;;  %v5583_v43 = vmul.f32 0.0078125, %v5482_v54  ;;  %v11068_v57 = vsub.f32 %v10792_v7, %v5299_v51 }
 0x684   :  { %v7439_v61 = vpop.eup %7438  ;;  %v5300_v24 = vmul.f32 0.0078125, %v5235_v6 }
 0x685   :  { %v5908_v15 = vadd.f32 %v10906_v2, %v5837_v8  ;;  %v5771_v29 = vmul.f32 %v7439_v61, %v11484_v32  ;;  %v5647_v17 = vadd.f32 1e-05, %v5583_v43  ;;  %v11486_v8 = vld [vmem:[#allocation14_spill] sm:$0xff] }
 0x686   :  { %v5229_v14 = vpop.xlane.xlu1 %5228  ;;  %v5484_v19 = vpop.xlane.xlu0 %5483 }
 0x687   :  { %5972 = vst [vmem:[#allocation3 + $0x88] sm:$0xff] %v5908_v15  ;;  %v5842_v59 = vmul.f32 %v10897_v11, %v5771_v29  ;;  %7446 = vrsqrt.f32 %v5647_v17  ;;  %v5297_v27 = vmul.f32 0.0078125, %v5229_v14  ;;  %v5584_v33 = vmul.f32 0.0078125, %v5484_v19 }
 0x688   :  { %v7441_v25 = vpop.eup %7440  ;;  %v11079_v19 = vsub.f32 %v10801_v50, %v5300_v24 }
 0x689   :  { %v5913_v13 = vadd.f32 %v10906_v2, %v5842_v59  ;;  %v5772_v46 = vmul.f32 %v7441_v25, %v11485_v30  ;;  %v11064_v41 = vsub.f32 %v10810_v40, %v5297_v27  ;;  %v5648_v18 = vadd.f32 1e-05, %v5584_v33  ;;  %v11487_v33 = vld [vmem:[#allocation15_spill] sm:$0xff] }
 0x68a   :  { %v5478_v58 = vpop.xlane.xlu1 %5477  ;;  %v5231_v48 = vpop.xlane.xlu0 %5230  ;;  %v5427_v59 = vmul.f32 %v11068_v57, %v11068_v57 }
 0x68b   :  { %5977 = vst [vmem:[#allocation3 + $0xb0] sm:$0xff] %v5913_v13  ;;  %v5843_v0 = vmul.f32 %v10897_v11, %v5772_v46  ;;  %7448 = vrsqrt.f32 %v5648_v18  ;;  %v5581_v31 = vmul.f32 0.0078125, %v5478_v58  ;;  %v5298_v22 = vmul.f32 0.0078125, %v5231_v48 }
 0x68c   :  { %v7443_v34 = vpop.eup %7442  ;;  %v5425_v54 = vmul.f32 %v11064_v41, %v11064_v41 }
 0x68d   :  { %v5914_v40 = vadd.f32 %v10906_v2, %v5843_v0  ;;  %v5769_v43 = vmul.f32 %v7443_v34, %v11486_v8  ;;  %v5645_v61 = vadd.f32 1e-05, %v5581_v31  ;;  %v11075_v15 = vsub.f32 %v10819_v10, %v5298_v22  ;;  %v11488_v22 = vld [vmem:[#allocation16_spill] sm:$0xff] }
 0x68e   :  { %5549 = vadd.xlane.f32.xlu1 %v5425_v54  ;;  %v5490_v32 = vpop.xlane.xlu1 %5489  ;;  %v5480_v29 = vpop.xlane.xlu0 %5479  ;;  %v5428_v0 = vmul.f32 %v11079_v19, %v11079_v19 }
 0x68f   :  { %5978 = vst [vmem:[#allocation3 + $0xb8] sm:$0xff] %v5914_v40  ;;  %v5840_v17 = vmul.f32 %v10897_v11, %v5769_v43  ;;  %7450 = vrsqrt.f32 %v5645_v61  ;;  %v5587_v7 = vmul.f32 0.0078125, %v5490_v32  ;;  %v5582_v6 = vmul.f32 0.0078125, %v5480_v29  ;;  %v11489_v29 = vld [vmem:[#allocation17_spill] sm:$0xff] }
 0x690   :  { %v7445_v14 = vpop.eup %7444  ;;  %v5426_v10 = vmul.f32 %v11075_v15, %v11075_v15 }
 0x691   :  { %v5911_v27 = vadd.f32 %v10906_v2, %v5840_v17  ;;  %v5770_v25 = vmul.f32 %v7445_v14, %v11487_v33  ;;  %v5651_v51 = vadd.f32 1e-05, %v5587_v7  ;;  %v5646_v13 = vadd.f32 1e-05, %v5582_v6 }
 0x692   :  { %5553 = vadd.xlane.f32.xlu1 %v5427_v59  ;;  %5551 = vadd.xlane.f32.xlu0 %v5426_v10  ;;  %v5486_v30 = vpop.xlane.xlu1 %5485  ;;  %v5492_v46 = vpop.xlane.xlu0 %5491 }
 0x693   :  { %5975 = vst [vmem:[#allocation3 + $0xa0] sm:$0xff] %v5911_v27  ;;  %v5841_v50 = vmul.f32 %v10897_v11, %v5770_v25  ;;  %7452 = vrsqrt.f32 %v5651_v51  ;;  %v5585_v18 = vmul.f32 0.0078125, %v5486_v30  ;;  %v5588_v58 = vmul.f32 0.0078125, %v5492_v46 }
 0x694   :  { %v7447_v48 = vpop.eup %7446  ;;  %7454 = vrsqrt.f32 %v5646_v13 }
 0x695   :  { %v5912_v31 = vadd.f32 %v10906_v2, %v5841_v50  ;;  %v5775_v34 = vmul.f32 %v7447_v48, %v11488_v22  ;;  %v5649_v24 = vadd.f32 1e-05, %v5585_v18  ;;  %v5652_v54 = vadd.f32 1e-05, %v5588_v58 }
 0x696   :  { %5555 = vadd.xlane.f32.xlu0 %v5428_v0  ;;  %v5488_v40 = vpop.xlane.xlu0 %5487 }
 0x697   :  { %5976 = vst [vmem:[#allocation3 + $0xa8] sm:$0xff] %v5912_v31  ;;  %v5846_v8 = vmul.f32 %v10897_v11, %v5775_v34  ;;  %7456 = vrsqrt.f32 %v5649_v24  ;;  %v5586_v43 = vmul.f32 0.0078125, %v5488_v40 }
 0x698   :  { %v7449_v61 = vpop.eup %7448  ;;  %7458 = vrsqrt.f32 %v5652_v54 }
 0x699   :  { %v5917_v32 = vadd.f32 %v10906_v2, %v5846_v8  ;;  %v5776_v17 = vmul.f32 %v7449_v61, %v11489_v29  ;;  %v5650_v7 = vadd.f32 1e-05, %v5586_v43  ;;  %v11490_v43 = vld [vmem:[#allocation18_spill] sm:$0xff] }
 0x69b   :  { %5981 = vst [vmem:[#allocation3 + $0xd0] sm:$0xff] %v5917_v32  ;;  %v5847_v6 = vmul.f32 %v10897_v11, %v5776_v17  ;;  %7460 = vrsqrt.f32 %v5650_v7 }
 0x69c   :  { %v7451_v14 = vpop.eup %7450 }
 0x69d   :  { %v5918_v59 = vadd.f32 %v10906_v2, %v5847_v6  ;;  %v5773_v10 = vmul.f32 %v7451_v14, %v10813_v16 }
 0x69e   :  { %v5498_v27 = vpop.xlane.xlu1 %5497 }
 0x69f   :  { %5982 = vst [vmem:[#allocation3 + $0xd8] sm:$0xff] %v5918_v59  ;;  %v5844_v33 = vmul.f32 %v10897_v11, %v5773_v10  ;;  %v5591_v25 = vmul.f32 0.0078125, %v5498_v27 }
 0x6a0   :  { %v7453_v51 = vpop.eup %7452 }
 0x6a1   :  { %v7455_v13 = vpop.eup %7454  ;;  %v5915_v30 = vadd.f32 %v10906_v2, %v5844_v33  ;;  %v5779_v46 = vmul.f32 %v7453_v51, %v10827_v36  ;;  %v5655_v50 = vadd.f32 1e-05, %v5591_v25 }
 0x6a2   :  { %v5774_v18 = vmul.f32 %v7455_v13, %v10822_v4  ;;  %v5494_v58 = vpop.xlane.xlu1 %5493  ;;  %v5500_v48 = vpop.xlane.xlu0 %5499 }
 0x6a3   :  { %5979 = vst [vmem:[#allocation3 + $0xc0] sm:$0xff] %v5915_v30  ;;  %v5850_v0 = vmul.f32 %v10897_v11, %v5779_v46  ;;  %7462 = vrsqrt.f32 %v5655_v50  ;;  %v5589_v16 = vmul.f32 0.0078125, %v5494_v58  ;;  %v5592_v31 = vmul.f32 0.0078125, %v5500_v48 }
 0x6a4   :  { %v7457_v22 = vpop.eup %7456  ;;  %v5845_v34 = vmul.f32 %v10897_v11, %v5774_v18 }
 0x6a5   :  { %v7459_v24 = vpop.eup %7458  ;;  %v5921_v54 = vadd.f32 %v10906_v2, %v5850_v0  ;;  %v5777_v40 = vmul.f32 %v7457_v22, %v10835_v9  ;;  %v5653_v36 = vadd.f32 1e-05, %v5589_v16  ;;  %v5656_v8 = vadd.f32 1e-05, %v5592_v31 }
 0x6a6   :  { %v5916_v4 = vadd.f32 %v10906_v2, %v5845_v34  ;;  %v5780_v61 = vmul.f32 %v7459_v24, %v11490_v43  ;;  %v5496_v32 = vpop.xlane.xlu0 %5495 }
 0x6a7   :  { %5985 = vst [vmem:[#allocation3 + $0xf0] sm:$0xff] %v5921_v54  ;;  %v5848_v29 = vmul.f32 %v10897_v11, %v5777_v40  ;;  %7464 = vrsqrt.f32 %v5653_v36  ;;  %v5590_v17 = vmul.f32 0.0078125, %v5496_v32 }
 0x6a8   :  { %v7461_v7 = vpop.eup %7460  ;;  %5980 = vst [vmem:[#allocation3 + $0xc8] sm:$0xff] %v5916_v4  ;;  %v5851_v6 = vmul.f32 %v10897_v11, %v5780_v61  ;;  %7466 = vrsqrt.f32 %v5656_v8 }
 0x6a9   :  { %v5919_v14 = vadd.f32 %v10906_v2, %v5848_v29  ;;  %v5778_v9 = vmul.f32 %v7461_v7, %v10845_v37  ;;  %v5654_v59 = vadd.f32 1e-05, %v5590_v17 }
 0x6aa   :  { %v5922_v10 = vadd.f32 %v10906_v2, %v5851_v6 }
 0x6ab   :  { %5983 = vst [vmem:[#allocation3 + $0xe0] sm:$0xff] %v5919_v14  ;;  %v5849_v27 = vmul.f32 %v10897_v11, %v5778_v9  ;;  %7468 = vrsqrt.f32 %v5654_v59  ;;  %v11491_v14 = vld [vmem:[#allocation19_spill] sm:$0xff] }
 0x6ac   :  { %5986 = vst [vmem:[#allocation3 + $0xf8] sm:$0xff] %v5922_v10 }
 0x6ad   :  { %v5920_v33 = vadd.f32 %v10906_v2, %v5849_v27 }
 0x6ae   :  { %v5506_v25 = vpop.xlane.xlu1 %5505 }
 0x6af   :  { %5984 = vst [vmem:[#allocation3 + $0xe8] sm:$0xff] %v5920_v33  ;;  %v5595_v51 = vmul.f32 0.0078125, %v5506_v25 }
 0x6b0   :  { %v7463_v13 = vpop.eup %7462 }
 0x6b1   :  { %v5783_v30 = vmul.f32 %v7463_v13, %v10850_v63  ;;  %v5659_v46 = vadd.f32 1e-05, %v5595_v51 }
 0x6b2   :  { %v5508_v50 = vpop.xlane.xlu0 %5507 }
 0x6b3   :  { %v5854_v37 = vmul.f32 %v10897_v11, %v5783_v30  ;;  %7470 = vrsqrt.f32 %v5659_v46  ;;  %v5596_v18 = vmul.f32 0.0078125, %v5508_v50 }
 0x6b4   :  { %v7465_v58 = vpop.eup %7464 }
 0x6b5   :  { %v7467_v48 = vpop.eup %7466  ;;  %v5925_v0 = vadd.f32 %v10906_v2, %v5854_v37  ;;  %v5781_v16 = vmul.f32 %v7465_v58, %v10855_v3  ;;  %v5660_v31 = vadd.f32 1e-05, %v5596_v18 }
 0x6b6   :  { %v5784_v22 = vmul.f32 %v7467_v48, %v10858_v12  ;;  %v5502_v34 = vpop.xlane.xlu1 %5501 }
 0x6b7   :  { %5989 = vst [vmem:[#allocation3 + $0x110] sm:$0xff] %v5925_v0  ;;  %v5852_v24 = vmul.f32 %v10897_v11, %v5781_v16  ;;  %7472 = vrsqrt.f32 %v5660_v31  ;;  %v5593_v63 = vmul.f32 0.0078125, %v5502_v34  ;;  %v11492_v34 = vld [vmem:[#allocation20_spill] sm:$0xff] }
 0x6b8   :  { %v7469_v54 = vpop.eup %7468  ;;  %v5855_v40 = vmul.f32 %v10897_v11, %v5784_v22 }
 0x6b9   :  { %v5923_v36 = vadd.f32 %v10906_v2, %v5852_v24  ;;  %v5782_v8 = vmul.f32 %v7469_v54, %v10865_v49  ;;  %v5657_v4 = vadd.f32 1e-05, %v5593_v63 }
 0x6ba   :  { %v5926_v43 = vadd.f32 %v10906_v2, %v5855_v40  ;;  %v5504_v3 = vpop.xlane.xlu0 %5503 }
 0x6bb   :  { %5987 = vst [vmem:[#allocation3 + $0x100] sm:$0xff] %v5923_v36  ;;  %v5853_v12 = vmul.f32 %v10897_v11, %v5782_v8  ;;  %7474 = vrsqrt.f32 %v5657_v4  ;;  %v5594_v61 = vmul.f32 0.0078125, %v5504_v3  ;;  %v11493_v4 = vld [vmem:[#allocation21_spill] sm:$0xff] }
 0x6bc   :  { %5990 = vst [vmem:[#allocation3 + $0x118] sm:$0xff] %v5926_v43 }
 0x6bd   :  { %v5924_v32 = vadd.f32 %v10906_v2, %v5853_v12  ;;  %v5658_v29 = vadd.f32 1e-05, %v5594_v61 }
 0x6be   :  { %v5514_v17 = vpop.xlane.xlu1 %5513 }
 0x6bf   :  { %5988 = vst [vmem:[#allocation3 + $0x108] sm:$0xff] %v5924_v32  ;;  %7476 = vrsqrt.f32 %v5658_v29  ;;  %v5599_v7 = vmul.f32 0.0078125, %v5514_v17 }
 0x6c0   :  { %v7471_v6 = vpop.eup %7470 }
 0x6c1   :  { %v5787_v49 = vmul.f32 %v7471_v6, %v11491_v14  ;;  %v5663_v9 = vadd.f32 1e-05, %v5599_v7  ;;  %v11494_v7 = vld [vmem:[#allocation22_spill] sm:$0xff] }
 0x6c3   :  { %v5858_v59 = vmul.f32 %v10897_v11, %v5787_v49  ;;  %7478 = vrsqrt.f32 %v5663_v9  ;;  %v5516_v10 = vpop.xlane.xlu0 %5515 }
 0x6c4   :  { %v7473_v27 = vpop.eup %7472  ;;  %v5600_v33 = vmul.f32 0.0078125, %v5516_v10 }
 0x6c5   :  { %v5929_v25 = vadd.f32 %v10906_v2, %v5858_v59  ;;  %v5788_v51 = vmul.f32 %v7473_v27, %v10875_v38 }
 0x6c6   :  { %v5664_v13 = vadd.f32 1e-05, %v5600_v33 }
 0x6c7   :  { %5993 = vst [vmem:[#allocation3 + $0x130] sm:$0xff] %v5929_v25  ;;  %v5859_v30 = vmul.f32 %v10897_v11, %v5788_v51  ;;  %v5510_v46 = vpop.xlane.xlu1 %5509 }
 0x6c8   :  { %v7475_v50 = vpop.eup %7474  ;;  %7480 = vrsqrt.f32 %v5664_v13  ;;  %v5597_v37 = vmul.f32 0.0078125, %v5510_v46 }
 0x6c9   :  { %v5930_v18 = vadd.f32 %v10906_v2, %v5859_v30  ;;  %v5785_v58 = vmul.f32 %v7475_v50, %v10880_v53 }
 0x6ca   :  { %v5661_v48 = vadd.f32 1e-05, %v5597_v37 }
 0x6cb   :  { %5994 = vst [vmem:[#allocation3 + $0x138] sm:$0xff] %v5930_v18  ;;  %v5856_v0 = vmul.f32 %v10897_v11, %v5785_v58  ;;  %v5512_v16 = vpop.xlane.xlu0 %5511 }
 0x6cc   :  { %v7477_v31 = vpop.eup %7476  ;;  %7482 = vrsqrt.f32 %v5661_v48  ;;  %v5598_v38 = vmul.f32 0.0078125, %v5512_v16 }
 0x6cd   :  { %v5927_v22 = vadd.f32 %v10906_v2, %v5856_v0  ;;  %v5786_v24 = vmul.f32 %v7477_v31, %v11492_v34  ;;  %v11155_v34 = vld [vmem:[%s11231_s7] ss:$0 sm:$0xff]  ;;  %s7552_s7 = smov [#allocation3]  }
 0x6ce   :  { %v5662_v63 = vadd.f32 1e-05, %v5598_v38 }
 0x6cf   :  { %5991 = vst [vmem:[#allocation3 + $0x120] sm:$0xff] %v5927_v22  ;;  %v5857_v54 = vmul.f32 %v10897_v11, %v5786_v24  ;;  %v5522_v40 = vpop.xlane.xlu1 %5521 }
 0x6d0   :  { %v7479_v36 = vpop.eup %7478  ;;  %7484 = vrsqrt.f32 %v5662_v63  ;;  %v5603_v53 = vmul.f32 0.0078125, %v5522_v40  ;;  %v11161_v63 = vld [vmem:[%s11232_s8] ss:$0 sm:$0xff]  ;;  %s6024_s8 = sshll.u32 %s7552_s7, 4  ;;  %s6025_s8 = int_to_ptr.vmem [resolvable:$true] %s6024_s8 }
 0x6d1   :  { %v5928_v8 = vadd.f32 %v10906_v2, %v5857_v54  ;;  %v5791_v43 = vmul.f32 %v7479_v36, %v11493_v4  ;;  %s7528_s1 = scalar_lea.vmem %s6025_s8, 8192  ;;  %p7533_p1 = scmp.lt.s32.totalorder %s6025_s8, %s6025_s8 }
 0x6d2   :  { %v5667_v3 = vadd.f32 1e-05, %v5603_v53  ;;  %p7529_p0 = scmp.ne.s32.totalorder %s6025_s8, %s7528_s1  ;;  %p7534_p2 = scmp.lt.s32.totalorder %s7528_s1, %s7528_s1 }
 0x6d3   :  { %5992 = vst [vmem:[#allocation3 + $0x128] sm:$0xff] %v5928_v8  ;;  %v5862_v12 = vmul.f32 %v10897_v11, %v5791_v43  ;;  %v5524_v61 = vpop.xlane.xlu0 %5523 }
 0x6d4   :  { %7486 = vrsqrt.f32 %v5667_v3  ;;  %v5604_v32 = vmul.f32 0.0078125, %v5524_v61  ;;  %p7535_p3 = por %p7534_p2, %p7533_p1 }
 0x6d5   :  { %v7481_v29 = vpop.eup %7480  ;;  %v5933_v17 = vadd.f32 %v10906_v2, %v5862_v12 }
 0x6d6   :  { %v5792_v6 = vmul.f32 %v7481_v29, %v11494_v7  ;;  %v5668_v14 = vadd.f32 1e-05, %v5604_v32  ;;  %p7536_p4 = pnand %p7535_p3, %p7529_p0 }
 0x6d7   :  { %5997 = vst [vmem:[#allocation3 + $0x150] sm:$0xff] %v5933_v17  ;;  %v5518_v49 = vpop.xlane.xlu1 %5517 }
 0x6d8   :  { %v5863_v9 = vmul.f32 %v10897_v11, %v5792_v6  ;;  %7488 = vrsqrt.f32 %v5668_v14  ;;  %v5601_v59 = vmul.f32 0.0078125, %v5518_v49 }
 0x6d9   :  { %v7483_v10 = vpop.eup %7482 }
 0x6da   :  { %v5934_v27 = vadd.f32 %v10906_v2, %v5863_v9  ;;  %v5789_v33 = vmul.f32 %v7483_v10, %v10914_v28  ;;  %v5665_v25 = vadd.f32 1e-05, %v5601_v59 }
 0x6db   :  { %v5520_v51 = vpop.xlane.xlu0 %5519 }
 0x6dc   :  { %5998 = vst [vmem:[#allocation3 + $0x158] sm:$0xff] %v5934_v27  ;;  %v5860_v13 = vmul.f32 %v10897_v11, %v5789_v33  ;;  %7490 = vrsqrt.f32 %v5665_v25  ;;  %v5602_v30 = vmul.f32 0.0078125, %v5520_v51 }
 0x6dd   :  { %v7485_v46 = vpop.eup %7484 }
 0x6de   :  { %v5931_v50 = vadd.f32 %v10906_v2, %v5860_v13  ;;  %v5790_v37 = vmul.f32 %v7485_v46, %v10922_v21  ;;  %v5666_v18 = vadd.f32 1e-05, %v5602_v30 }
 0x6df   :  { %v5530_v58 = vpop.xlane.xlu1 %5529 }
 0x6e0   :  { %5995 = vst [vmem:[#allocation3 + $0x140] sm:$0xff] %v5931_v50  ;;  %v5861_v48 = vmul.f32 %v10897_v11, %v5790_v37  ;;  %7492 = vrsqrt.f32 %v5666_v18  ;;  %v5607_v0 = vmul.f32 0.0078125, %v5530_v58 }
 0x6e1   :  { %v7487_v28 = vpop.eup %7486 }
 0x6e2   :  { %v5932_v16 = vadd.f32 %v10906_v2, %v5861_v48  ;;  %v5795_v31 = vmul.f32 %v7487_v28, %v10930_v62  ;;  %v5671_v38 = vadd.f32 1e-05, %v5607_v0 }
 0x6e3   :  { %v5532_v22 = vpop.xlane.xlu0 %5531 }
 0x6e4   :  { %5996 = vst [vmem:[#allocation3 + $0x148] sm:$0xff] %v5932_v16  ;;  %v5866_v21 = vmul.f32 %v11155_v34, %v5795_v31  ;;  %7494 = vrsqrt.f32 %v5671_v38  ;;  %v5608_v24 = vmul.f32 0.0078125, %v5532_v22 }
 0x6e5   :  { %v7489_v11 = vpop.eup %7488 }
 0x6e6   :  { %v5937_v2 = vadd.f32 %v11161_v63, %v5866_v21  ;;  %v5796_v62 = vmul.f32 %v7489_v11, %v10938_v23  ;;  %v5672_v54 = vadd.f32 1e-05, %v5608_v24 }
 0x6e7   :  { %v5526_v40 = vpop.xlane.xlu1 %5525 }
 0x6e8   :  { %6001 = vst [vmem:[#allocation3 + $0x170] sm:$0xff] %v5937_v2  ;;  %v5867_v36 = vmul.f32 %v11155_v34, %v5796_v62  ;;  %7496 = vrsqrt.f32 %v5672_v54  ;;  %v5605_v53 = vmul.f32 0.0078125, %v5526_v40 }
 0x6e9   :  { %v7491_v8 = vpop.eup %7490 }
 0x6ea   :  { %v5938_v4 = vadd.f32 %v11161_v63, %v5867_v36  ;;  %v5793_v43 = vmul.f32 %v7491_v8, %v10946_v60  ;;  %v5669_v3 = vadd.f32 1e-05, %v5605_v53 }
 0x6eb   :  { %v5528_v12 = vpop.xlane.xlu0 %5527 }
 0x6ec   :  { %6002 = vst [vmem:[#allocation3 + $0x178] sm:$0xff] %v5938_v4  ;;  %v5864_v61 = vmul.f32 %v11155_v34, %v5793_v43  ;;  %7498 = vrsqrt.f32 %v5669_v3  ;;  %v5606_v32 = vmul.f32 0.0078125, %v5528_v12 }
 0x6ed   :  { %v7493_v23 = vpop.eup %7492 }
 0x6ee   :  { %v5935_v29 = vadd.f32 %v11161_v63, %v5864_v61  ;;  %v5794_v17 = vmul.f32 %v7493_v23, %v10954_v5  ;;  %v5670_v7 = vadd.f32 1e-05, %v5606_v32 }
 0x6ef   :  { %v5538_v6 = vpop.xlane.xlu1 %5537 }
 0x6f0   :  { %5999 = vst [vmem:[#allocation3 + $0x160] sm:$0xff] %v5935_v29  ;;  %v5865_v14 = vmul.f32 %v11155_v34, %v5794_v17  ;;  %7500 = vrsqrt.f32 %v5670_v7  ;;  %v5611_v49 = vmul.f32 0.0078125, %v5538_v6 }
 0x6f1   :  { %v7495_v60 = vpop.eup %7494 }
 0x6f2   :  { %v5936_v9 = vadd.f32 %v11161_v63, %v5865_v14  ;;  %v5799_v59 = vmul.f32 %v7495_v60, %v10962_v52  ;;  %v5675_v10 = vadd.f32 1e-05, %v5611_v49 }
 0x6f3   :  { %v5540_v27 = vpop.xlane.xlu0 %5539 }
 0x6f4   :  { %6000 = vst [vmem:[#allocation3 + $0x168] sm:$0xff] %v5936_v9  ;;  %v5870_v33 = vmul.f32 %v11155_v34, %v5799_v59  ;;  %7502 = vrsqrt.f32 %v5675_v10  ;;  %v5612_v25 = vmul.f32 0.0078125, %v5540_v27 }
 0x6f5   :  { %v7497_v5 = vpop.eup %7496 }
 0x6f6   :  { %v5941_v51 = vadd.f32 %v11161_v63, %v5870_v33  ;;  %v5800_v13 = vmul.f32 %v7497_v5, %v10970_v56  ;;  %v5676_v30 = vadd.f32 1e-05, %v5612_v25 }
 0x6f7   :  { %v5534_v46 = vpop.xlane.xlu1 %5533 }
 0x6f8   :  { %6005 = vst [vmem:[#allocation3 + $0x190] sm:$0xff] %v5941_v51  ;;  %v5871_v50 = vmul.f32 %v11155_v34, %v5800_v13  ;;  %7504 = vrsqrt.f32 %v5676_v30  ;;  %v5609_v37 = vmul.f32 0.0078125, %v5534_v46 }
 0x6f9   :  { %v7499_v52 = vpop.eup %7498 }
 0x6fa   :  { %v5942_v18 = vadd.f32 %v11161_v63, %v5871_v50  ;;  %v5797_v58 = vmul.f32 %v7499_v52, %v10978_v47  ;;  %v5673_v48 = vadd.f32 1e-05, %v5609_v37 }
 0x6fb   :  { %v5536_v0 = vpop.xlane.xlu0 %5535 }
 0x6fc   :  { %6006 = vst [vmem:[#allocation3 + $0x198] sm:$0xff] %v5942_v18  ;;  %v5868_v28 = vmul.f32 %v11155_v34, %v5797_v58  ;;  %7506 = vrsqrt.f32 %v5673_v48  ;;  %v5610_v16 = vmul.f32 0.0078125, %v5536_v0 }
 0x6fd   :  { %v7501_v56 = vpop.eup %7500 }
 0x6fe   :  { %v5939_v31 = vadd.f32 %v11161_v63, %v5868_v28  ;;  %v5798_v38 = vmul.f32 %v7501_v56, %v10986_v39  ;;  %v5674_v22 = vadd.f32 1e-05, %v5610_v16 }
 0x6ff   :  { %v5546_v21 = vpop.xlane.xlu1 %5545 }
 0x700   :  { %6003 = vst [vmem:[#allocation3 + $0x180] sm:$0xff] %v5939_v31  ;;  %v5869_v24 = vmul.f32 %v11155_v34, %v5798_v38  ;;  %7508 = vrsqrt.f32 %v5674_v22  ;;  %v5615_v11 = vmul.f32 0.0078125, %v5546_v21 }
 0x701   :  { %v7503_v47 = vpop.eup %7502 }
 0x702   :  { %v5940_v2 = vadd.f32 %v11161_v63, %v5869_v24  ;;  %v5803_v62 = vmul.f32 %v7503_v47, %v10994_v45  ;;  %v5679_v54 = vadd.f32 1e-05, %v5615_v11 }
 0x703   :  { %v5548_v40 = vpop.xlane.xlu0 %5547 }
 0x704   :  { %6004 = vst [vmem:[#allocation3 + $0x188] sm:$0xff] %v5940_v2  ;;  %v5874_v36 = vmul.f32 %v11155_v34, %v5803_v62  ;;  %7510 = vrsqrt.f32 %v5679_v54  ;;  %v5616_v53 = vmul.f32 0.0078125, %v5548_v40 }
 0x705   :  { %v7505_v39 = vpop.eup %7504 }
 0x706   :  { %v5945_v8 = vadd.f32 %v11161_v63, %v5874_v36  ;;  %v5804_v4 = vmul.f32 %v7505_v39, %v11002_v26  ;;  %v5680_v43 = vadd.f32 1e-05, %v5616_v53 }
 0x707   :  { %v5542_v3 = vpop.xlane.xlu1 %5541 }
 0x708   :  { %6009 = vst [vmem:[#allocation3 + $0x1b0] sm:$0xff] %v5945_v8  ;;  %v5875_v12 = vmul.f32 %v11155_v34, %v5804_v4  ;;  %7512 = vrsqrt.f32 %v5680_v43  ;;  %v5613_v61 = vmul.f32 0.0078125, %v5542_v3 }
 0x709   :  { %v7507_v45 = vpop.eup %7506 }
 0x70a   :  { %v5946_v32 = vadd.f32 %v11161_v63, %v5875_v12  ;;  %v5801_v23 = vmul.f32 %v7507_v45, %v11010_v44  ;;  %v5677_v29 = vadd.f32 1e-05, %v5613_v61  ;;  %v5544_v17 = vpop.xlane.xlu0 %5543 }
 0x70b   :  { %v5614_v6 = vmul.f32 0.0078125, %v5544_v17 }
 0x70c   :  { %6010 = vst [vmem:[#allocation3 + $0x1b8] sm:$0xff] %v5946_v32  ;;  %v5872_v7 = vmul.f32 %v11155_v34, %v5801_v23  ;;  %7514 = vrsqrt.f32 %v5677_v29 }
 0x70d   :  { %v7509_v26 = vpop.eup %7508  ;;  %v5678_v60 = vadd.f32 1e-05, %v5614_v6 }
 0x70e   :  { %v5943_v14 = vadd.f32 %v11161_v63, %v5872_v7  ;;  %v5802_v49 = vmul.f32 %v7509_v26, %v11018_v55 }
 0x70f   :  { %7516 = vrsqrt.f32 %v5678_v60 }
 0x710   :  { %6007 = vst [vmem:[#allocation3 + $0x1a0] sm:$0xff] %v5943_v14  ;;  %v5873_v9 = vmul.f32 %v11155_v34, %v5802_v49 }
 0x711   :  { %v7511_v59 = vpop.eup %7510 }
 0x712   :  { %v5944_v44 = vadd.f32 %v11161_v63, %v5873_v9  ;;  %v5807_v10 = vmul.f32 %v7511_v59, %v11026_v35 }
 0x714   :  { %6008 = vst [vmem:[#allocation3 + $0x1a8] sm:$0xff] %v5944_v44  ;;  %v5878_v27 = vmul.f32 %v11155_v34, %v5807_v10 }
 0x715   :  { %v7513_v33 = vpop.eup %7512 }
 0x716   :  { %v5949_v25 = vadd.f32 %v11161_v63, %v5878_v27  ;;  %v5808_v5 = vmul.f32 %v7513_v33, %v11034_v42 }
 0x717   :  { %v5550_v51 = vpop.xlane.xlu1 %5549 }
 0x718   :  { %6013 = vst [vmem:[#allocation3 + $0x1d0] sm:$0xff] %v5949_v25  ;;  %v5879_v55 = vmul.f32 %v11155_v34, %v5808_v5  ;;  %v5617_v13 = vmul.f32 0.0078125, %v5550_v51 }
 0x719   :  { %v7515_v30 = vpop.eup %7514 }
 0x71a   :  { %v5950_v46 = vadd.f32 %v11161_v63, %v5879_v55  ;;  %v5805_v50 = vmul.f32 %v7515_v30, %v11042_v1  ;;  %v5681_v37 = vadd.f32 1e-05, %v5617_v13 }
 0x71b   :  { %v5554_v35 = vpop.xlane.xlu1 %5553  ;;  %v5552_v52 = vpop.xlane.xlu0 %5551 }
 0x71c   :  { %6014 = vst [vmem:[#allocation3 + $0x1d8] sm:$0xff] %v5950_v46  ;;  %v5876_v18 = vmul.f32 %v11155_v34, %v5805_v50  ;;  %7518 = vrsqrt.f32 %v5681_v37  ;;  %v5619_v58 = vmul.f32 0.0078125, %v5554_v35  ;;  %v5618_v48 = vmul.f32 0.0078125, %v5552_v52  ;;  %v7517_v42 = vpop.eup %7516 }
 0x71d   :  { %v5806_v28 = vmul.f32 %v7517_v42, %v11050_v20 }
 0x71e   :  { %v5947_v0 = vadd.f32 %v11161_v63, %v5876_v18  ;;  %v5683_v16 = vadd.f32 1e-05, %v5619_v58  ;;  %v5682_v56 = vadd.f32 1e-05, %v5618_v48 }
 0x71f   :  { %v5556_v31 = vpop.xlane.xlu0 %5555  ;;  %v5877_v1 = vmul.f32 %v11155_v34, %v5806_v28 }
 0x720   :  { %6011 = vst [vmem:[#allocation3 + $0x1c0] sm:$0xff] %v5947_v0  ;;  %7520 = vrsqrt.f32 %v5683_v16  ;;  %v5620_v38 = vmul.f32 0.0078125, %v5556_v31 }
 0x721   :  { %7522 = vrsqrt.f32 %v5682_v56  ;;  %v5948_v22 = vadd.f32 %v11161_v63, %v5877_v1 }
 0x722   :  { %v5684_v21 = vadd.f32 1e-05, %v5620_v38 }
 0x723   :  { %6012 = vst [vmem:[#allocation3 + $0x1c8] sm:$0xff] %v5948_v22 }
 0x724   :  { %7524 = vrsqrt.f32 %v5684_v21 }
 0x729   :  { %v7519_v24 = vpop.eup %7518 }
 0x72a   :  { %v5809_v11 = vmul.f32 %v7519_v24, %v11064_v41 }
 0x72c   :  { %v5880_v47 = vmul.f32 %v11155_v34, %v5809_v11 }
 0x72d   :  { %v7521_v20 = vpop.eup %7520 }
 0x72e   :  { %v7523_v2 = vpop.eup %7522  ;;  %v5951_v62 = vadd.f32 %v11161_v63, %v5880_v47  ;;  %v5811_v54 = vmul.f32 %v7521_v20, %v11068_v57 }
 0x72f   :  { %v5810_v40 = vmul.f32 %v7523_v2, %v11075_v15 }
 0x730   :  { %6015 = vst [vmem:[#allocation3 + $0x1e0] sm:$0xff] %v5951_v62  ;;  %v5882_v36 = vmul.f32 %v11155_v34, %v5811_v54 }
 0x731   :  { %v7525_v53 = vpop.eup %7524  ;;  %v5881_v39 = vmul.f32 %v11155_v34, %v5810_v40 }
 0x732   :  { %v5953_v8 = vadd.f32 %v11161_v63, %v5882_v36  ;;  %v5812_v41 = vmul.f32 %v7525_v53, %v11079_v19 }
 0x733   :  { %v5952_v4 = vadd.f32 %v11161_v63, %v5881_v39 }
 0x734   :  { %6017 = vst [vmem:[#allocation3 + $0x1f0] sm:$0xff] %v5953_v8  ;;  %v5883_v43 = vmul.f32 %v11155_v34, %v5812_v41 }
 0x735   :  { %6016 = vst [vmem:[#allocation3 + $0x1e8] sm:$0xff] %v5952_v4 }
 0x736   :  { %v5954_v57 = vadd.f32 %v11161_v63, %v5883_v43 }
 0x738   :  { %6018 = vst [vmem:[#allocation3 + $0x1f8] sm:$0xff] %v5954_v57 }
 0x739   :  { %7539 = shalt.err (!%p7536_p4)
}
 0x73a   :  { %s7553_s5 = smov 128   ;;  %s7554_s12 = smov 8  }
 0x73b   :  { %6030 = dma.vmem_to_hbm [thread:$0]  %s6025_s8, 8192, %s11233_s9, [#allocation4], %s7553_s5, %s7553_s5, %s7554_s12  }
 0x73c   :  { %7548 = dma.done.wait [#allocation4], 8192  }
 0x73d   :  { %7549 = vsyncadd [#allocation4], 4294959104 }
 0x73e   :  { %6034 = vsyncpa [#allocation4], 1 }

</bundles_post_ra>
